<compile_context>
chip_gen: v5e
topology: v5e:2x2
jax: 0.10.0
libtpu: 0.0.40
codegen_flags: <defaults>
</compile_context>

<pallas_src>
import jax
import jax.numpy as jnp
import numpy as np
from jax import lax
from jax.experimental import pallas as pl
from jax.experimental.pallas import tpu as pltpu

_PW = 8  # sublane-aligned zero-pad width used on the W (sublane) axis


def _device_kind():
    try:
        return jax.devices()[0].device_kind.lower()
    except Exception:
        return ""


def _round_up(x, m):
    return -(-x // m) * m


def _padded_bytes(shape, itemsize):
    """Rough VMEM footprint of a value/block with (8,128) layout padding."""
    if len(shape) == 1:
        return _round_up(shape[0] * itemsize, 512)
    *lead, s, l = shape
    n = 1
    for d in lead:
        n *= d
    return n * _round_up(s, 8) * _round_up(l, 128) * itemsize


def _default_vmem_limit(NB, H, W, inp, Ho, Wo, oup, hidden, stride,
                        x_itemsize, dw_itemsize, device_kind):
    b = 0
    # pipelined input / output blocks (double buffered)
    b += 2 * _padded_bytes((NB, H, W, inp), x_itemsize)
    b += 2 * _padded_bytes((NB, Ho, Wo * oup), x_itemsize)
    # weights / folded BN params (double buffered, tiny)
    b += 2 * (_padded_bytes((inp, hidden), 2) + _padded_bytes((hidden, oup), 2)
              + _padded_bytes((9, hidden), 4)
              + 4 * _padded_bytes((1, hidden), 4) + 2 * _padded_bytes((1, oup), 4))
    # live value working set: expand output, padded activations + shifted copy,
    # depthwise accumulator + h2, project operands.
    b += _padded_bytes((NB, H, W, hidden), 4)
    b += 2 * _padded_bytes((NB, H + 2, W + 2 * _PW, hidden), 4)
    b += _padded_bytes((NB, Ho, Wo, hidden), dw_itemsize)
    b += 2 * _padded_bytes((NB, Ho, Wo, hidden), 4)
    if stride != 1:
        b += _padded_bytes((NB, H + 2, W + 2 * _PW, hidden), 4)  # pad_ref scratch
    est = int(b * 1.5) + (4 << 20)
    cap = (56 << 20) if ("v7" in device_kind or "7x" in device_kind) else (100 << 20)
    return max(min(est, cap), 32 << 20)


def _make_kernel(inp, oup, hidden, NB, H, W, Ho, Wo, stride,
                 has_expand, identity, dw_dtype, lane_dense_out):

    def kernel(x_ref, w1_ref, s1_ref, b1_ref, wd_ref, s2_ref, b2_ref,
               w3_ref, s3_ref, b3_ref, out_ref, *scratch):
        x = x_ref[...]                                       # input dtype (no blanket f32 cast)

        # ---- 1x1 expand conv + BN + ReLU6 (absent when expand_ratio == 1) --
        if has_expand:
            xm = x.reshape(NB * H * W, inp).astype(jnp.bfloat16)
            h = jnp.dot(xm, w1_ref[...],                     # bf16 MXU matmul, f32 acc
                        preferred_element_type=jnp.float32)
            h = jnp.clip(h * s1_ref[...] + b1_ref[...], 0.0, 6.0)   # folded BN + ReLU6
            h3 = h.reshape(NB, H, W, hidden)                 # f32
        else:
            h3 = x.astype(jnp.float32)                       # hidden == inp

        # Depthwise taps: single VMEM read, sliced in f32 (proven layout path),
        # then cast once per tap to the depthwise compute dtype.
        wd = wd_ref[...]                                     # (9, hidden) f32
        taps = [wd[k:k + 1, :].reshape(1, 1, 1, hidden).astype(dw_dtype)
                for k in range(9)]

        # Zero padding built in the value domain, f32 (sublane-aligned 8-wide
        # W pads so every concatenated piece sits on an (8,128) tile boundary).
        zh = jnp.zeros((NB, 1, W, hidden), jnp.float32)
        hp = jnp.concatenate([zh, h3, zh], axis=1)           # (NB, H+2, W,    hid)
        zw = jnp.zeros((NB, H + 2, _PW, hidden), jnp.float32)
        hpw = jnp.concatenate([zw, hp, zw], axis=2)          # (NB, H+2, W+16, hid)

        # ---- 3x3 depthwise conv (padding=1, given stride) + BN + ReLU6 ----
        acc = jnp.zeros((NB, Ho, Wo, hidden), dw_dtype)
        if stride == 1:
            # Hoist the 3 kw-shifted copies out of the kh loop: 2 misaligned
            # sublane relayouts total (offsets 7/9) + 1 aligned slice, then the
            # 9 taps are cheap H slices; MAC chain in dw_dtype (bf16 on v6e/v7x).
            for kw in range(3):
                sh = hpw[:, :, _PW - 1 + kw:_PW - 1 + kw + W, :].astype(dw_dtype)
                for kh in range(3):
                    acc = acc + sh[:, kh:kh + Ho, :, :] * taps[kh * 3 + kw]
        else:
            # stride 2: park the padded tensor in a VMEM scratch with one
            # aligned full-tile store, then read 4 even/odd phase tensors
            # (one strided read per H/W parity) instead of 9 strided gathers.
            pad_ref = scratch[0]
            pad_ref[...] = hpw
            p_ee = pad_ref[:, pl.ds(0, Ho + 1, 2), pl.ds(_PW, Wo, 2), :]
            p_eo = pad_ref[:, pl.ds(0, Ho + 1, 2), pl.ds(_PW - 1, Wo + 1, 2), :]
            p_oe = pad_ref[:, pl.ds(1, Ho, 2), pl.ds(_PW, Wo, 2), :]
            p_oo = pad_ref[:, pl.ds(1, Ho, 2), pl.ds(_PW - 1, Wo + 1, 2), :]
            for kh in range(3):
                for kw in range(3):
                    if kh == 1:
                        ph = p_oe if kw == 1 else p_oo
                    else:
                        base = p_ee if kw == 1 else p_eo
                        ph = base[:, kh // 2:kh // 2 + Ho, :, :]
                    if kw == 0:
                        patch = ph[:, :, 0:Wo, :]
                    elif kw == 1:
                        patch = ph
                    else:
                        patch = ph[:, :, 1:Wo + 1, :]
                    acc = acc + patch.astype(dw_dtype) * taps[kh * 3 + kw]

        h2 = acc.astype(jnp.float32).reshape(NB * Ho * Wo, hidden)
        h2 = jnp.clip(h2 * s2_ref[...] + b2_ref[...], 0.0, 6.0)     # BN + ReLU6

        # ---- 1x1 project conv + BN (no activation) ----
        o = jnp.dot(h2.astype(jnp.bfloat16), w3_ref[...],    # bf16 MXU matmul, f32 acc
                    preferred_element_type=jnp.float32)
        o = o * s3_ref[...] + b3_ref[...]

        # ---- residual ----
        if identity:
            o = o + x.reshape(NB * H * W, inp).astype(jnp.float32)

        if lane_dense_out:
            # lane-dense store: last dim Wo*oup >= 128 -> unmasked vst
            out_ref[...] = o.reshape(NB, Ho, Wo * oup).astype(out_ref.dtype)
        else:
            out_ref[...] = o.reshape(NB, Ho, Wo, oup).astype(out_ref.dtype)

    return kernel


def init_params(key, inp, oup, expand_ratio, eps=1e-5):
    hidden = int(round(inp * expand_ratio))
    has_expand = expand_ratio != 1
    keys = jax.random.split(key, 6)

    def bn(k, c):
        kg, kb, km, kv = jax.random.split(k, 4)
        gamma = jax.random.uniform(kg, (c,), jnp.float32, 0.5, 1.5)
        beta = 0.1 * jax.random.normal(kb, (c,), jnp.float32)
        mean = 0.1 * jax.random.normal(km, (c,), jnp.float32)
        var = jax.random.uniform(kv, (c,), jnp.float32, 0.5, 1.5)
        scale = gamma / jnp.sqrt(var + eps)
        bias = beta - mean * scale
        return scale.reshape(1, c), bias.reshape(1, c)

    w1 = 0.05 * jax.random.normal(keys[0], (inp, hidden), jnp.float32)   # 1x1 expand
    s1, b1 = bn(keys[1], hidden)
    wd = 0.05 * jax.random.normal(keys[2], (9, hidden), jnp.float32)     # 3x3 depthwise taps
    s2, b2 = bn(keys[3], hidden)
    w3 = 0.05 * jax.random.normal(keys[4], (hidden, oup), jnp.float32)   # 1x1 project
    s3, b3 = bn(keys[5], oup)
    return dict(w1=w1, s1=s1, b1=b1, wd=wd, s2=s2, b2=b2, w3=w3, s3=s3, b3=b3,
                hidden=hidden, has_expand=has_expand)


def inverted_residual_forward_nhwc(x_nhwc, params, stride, *, batch_block=None,
                                   vmem_limit_bytes=None, depthwise_bf16=None):
    N, H, W, inp = x_nhwc.shape
    hidden = params["hidden"]
    oup = params["w3"].shape[1]
    has_expand = params["has_expand"]
    identity = (stride == 1) and (inp == oup)
    Ho = (H + 2 - 3) // stride + 1
    Wo = (W + 2 - 3) // stride + 1

    # grid >= 2 by default so ("parallel",) actually shards across the two v7x
    # TensorCores and input/output DMAs double-buffer against compute.
    if batch_block is None:
        NB = N // 2 if (N % 2 == 0 and N >= 2) else 1
    else:
        NB = batch_block
    assert N % NB == 0, "batch_block must divide the batch size"

    dk = _device_kind()
    if depthwise_bf16 is None:
        # v2-v5 VPUs have no bf16 VALU: keep the depthwise MAC chain in f32 there.
        depthwise_bf16 = not any(t in dk for t in ("v2", "v3", "v4", "v5"))
    dw_dtype = jnp.bfloat16 if depthwise_bf16 else jnp.float32

    if vmem_limit_bytes is None:
        vmem_limit_bytes = _default_vmem_limit(
            NB, H, W, inp, Ho, Wo, oup, hidden, stride,
            x_nhwc.dtype.itemsize, jnp.dtype(dw_dtype).itemsize, dk)

    # Advisory cost estimate so XLA schedules the custom call sensibly.
    flops = 2 * 9 * N * Ho * Wo * hidden + 2 * N * Ho * Wo * hidden * oup
    if has_expand:
        flops += 2 * N * H * W * inp * hidden
    itemsize = x_nhwc.dtype.itemsize
    bytes_accessed = (x_nhwc.size * itemsize
                      + N * Ho * Wo * oup * itemsize
                      + 2 * (inp * hidden + hidden * oup)        # bf16 weights
                      + 4 * (9 * hidden + 4 * hidden + 2 * oup))  # f32 taps + BN
    cost = pl.CostEstimate(flops=int(flops), transcendentals=0,
                           bytes_accessed=int(bytes_accessed))

    def full(shape):
        return pl.BlockSpec(shape, lambda n, s=shape: (0,) * len(s))

    def run(lane_dense_out):
        kernel = _make_kernel(inp, oup, hidden, NB, H, W, Ho, Wo, stride,
                              has_expand, identity, dw_dtype, lane_dense_out)

        scratch_shapes = []
        if stride != 1:
            scratch_shapes.append(
                pltpu.VMEM((NB, H + 2, W + 2 * _PW, hidden), jnp.float32))

        if lane_dense_out:
            out_spec = pl.BlockSpec((NB, Ho, Wo * oup), lambda n: (n, 0, 0))
            out_shape = jax.ShapeDtypeStruct((N, Ho, Wo * oup), x_nhwc.dtype)
        else:
            out_spec = pl.BlockSpec((NB, Ho, Wo, oup), lambda n: (n, 0, 0, 0))
            out_shape = jax.ShapeDtypeStruct((N, Ho, Wo, oup), x_nhwc.dtype)

        grid_spec = pltpu.PrefetchScalarGridSpec(
            num_scalar_prefetch=0,
            grid=(N // NB,),
            in_specs=[
                pl.BlockSpec((NB, H, W, inp), lambda n: (n, 0, 0, 0)),
                full((inp, hidden)),
                full((1, hidden)), full((1, hidden)),
                full((9, hidden)),
                full((1, hidden)), full((1, hidden)),
                full((hidden, oup)),
                full((1, oup)), full((1, oup)),
            ],
            out_specs=out_spec,
            scratch_shapes=scratch_shapes,
        )

        out = pl.pallas_call(
            kernel,
            out_shape=out_shape,
            grid_spec=grid_spec,
            compiler_params=pltpu.CompilerParams(
                dimension_semantics=("parallel",),   # batch blocks are independent
                vmem_limit_bytes=int(vmem_limit_bytes)),
            cost_estimate=cost,
        )(x_nhwc,
          params["w1"].astype(jnp.bfloat16), params["s1"], params["b1"],
          params["wd"],
          params["s2"], params["b2"],
          params["w3"].astype(jnp.bfloat16), params["s3"], params["b3"])
        out = jax.block_until_ready(out)          # surface any lowering error here
        if lane_dense_out:
            out = out.reshape(N, Ho, Wo, oup)     # free metadata reshape in HBM
        return out

    try:
        return run(True)
    except Exception:
        # TODO(synk): the lane-dense store needs the in-kernel (Wo,oup)->(Wo*oup)
        # value reshape; if Mosaic rejects that relayout on this generation,
        # fall back to the (correct, lane-sparse) 4-D store.
        return run(False)


def inverted_residual_forward(x_nchw, params, stride, **kw):
    # PyTorch-layout convenience wrapper.  In a full network keep everything
    # NHWC and call inverted_residual_forward_nhwc directly to avoid the two
    # extra HBM transpose passes per block.
    x = jnp.transpose(x_nchw, (0, 2, 3, 1))                  # NCHW -> NHWC
    out = inverted_residual_forward_nhwc(x, params, stride, **kw)
    return jnp.transpose(out, (0, 3, 1, 2))                  # NHWC -> NCHW


def ref_forward(x_nchw, params, stride):
    """Pure-JAX f32 reference (inference-mode BN) for correctness checking."""
    x = jnp.transpose(x_nchw, (0, 2, 3, 1))
    inp = x.shape[-1]
    hidden = params["hidden"]
    oup = params["w3"].shape[1]
    h = x
    if params["has_expand"]:
        h = jnp.einsum("nhwc,cd->nhwd", x, params["w1"])
        h = jnp.clip(h * params["s1"][0] + params["b1"][0], 0.0, 6.0)
    wd = params["wd"].reshape(3, 3, hidden)[:, :, None, :]   # HWIO, I=1 (depthwise)
    h = lax.conv_general_dilated(h, wd, (stride, stride), ((1, 1), (1, 1)),
                                 dimension_numbers=("NHWC", "HWIO", "NHWC"),
                                 feature_group_count=hidden)
    h = jnp.clip(h * params["s2"][0] + params["b2"][0], 0.0, 6.0)
    o = jnp.einsum("nhwc,cd->nhwd", h, params["w3"])
    o = o * params["s3"][0] + params["b3"][0]
    if stride == 1 and inp == oup:
        o = o + x
    return jnp.transpose(o, (0, 3, 1, 2))


if __name__ == "__main__":
    key = jax.random.PRNGKey(0)
    kx1, kp1, kx2, kp2, kx3, kp3 = jax.random.split(key, 6)

    # Tolerance accounts for bf16 MXU 1x1 convs and the bf16 depthwise MAC
    # chain on v6e/v7x (inference-precision contract).
    RTOL = ATOL = 2e-2

    # Config A: most common MobileNetV2 block flavour -- stride=1,
    # expand_ratio=4, inp == oup -> identity (residual) path.
    # Default batch_block -> NB=1, grid=(2,) so the parallel axis really shards.
    N, C, H, W = 2, 16, 16, 16
    x1 = jax.random.normal(kx1, (N, C, H, W), jnp.float32)
    params_a = init_params(kp1, C, 16, expand_ratio=4)
    out_a = jax.block_until_ready(inverted_residual_forward(x1, params_a, stride=1))
    ref_a = ref_forward(x1, params_a, stride=1)
    np.testing.assert_allclose(np.asarray(out_a), np.asarray(ref_a),
                               rtol=RTOL, atol=ATOL)

    # Config B: expand_ratio == 1 branch (first backbone block flavour).
    x2 = jax.random.normal(kx2, (N, C, H, W), jnp.float32)
    params_b = init_params(kp2, C, 16, expand_ratio=1)
    out_b = jax.block_until_ready(
        inverted_residual_forward(x2, params_b, stride=1, batch_block=1))
    ref_b = ref_forward(x2, params_b, stride=1)
    np.testing.assert_allclose(np.asarray(out_b), np.asarray(ref_b),
                               rtol=RTOL, atol=ATOL)

    # Config C: stride=2 downsampling block (inp=16 -> oup=24, expand 6),
    # exercising the even/odd phase-decomposed depthwise path.
    x3 = jax.random.normal(kx3, (N, C, H, W), jnp.float32)
    params_c = init_params(kp3, C, 24, expand_ratio=6)
    out_c = jax.block_until_ready(inverted_residual_forward(x3, params_c, stride=2))
    ref_c = ref_forward(x3, params_c, stride=2)
    np.testing.assert_allclose(np.asarray(out_c), np.asarray(ref_c),
                               rtol=RTOL, atol=ATOL)

    print("KERNEL_OK")
</pallas_src>

<mosaic_0001>
module attributes {stable_mosaic.version = 11 : i64} {
  func.func @kernel(%arg0: i32, %arg1: memref<1x16x16x16xf32, #tpu.memory_space<vmem>>, %arg2: memref<16x64xbf16, #tpu.memory_space<vmem>>, %arg3: memref<1x64xf32, #tpu.memory_space<vmem>>, %arg4: memref<1x64xf32, #tpu.memory_space<vmem>>, %arg5: memref<9x64xf32, #tpu.memory_space<vmem>>, %arg6: memref<1x64xf32, #tpu.memory_space<vmem>>, %arg7: memref<1x64xf32, #tpu.memory_space<vmem>>, %arg8: memref<64x16xbf16, #tpu.memory_space<vmem>>, %arg9: memref<1x16xf32, #tpu.memory_space<vmem>>, %arg10: memref<1x16xf32, #tpu.memory_space<vmem>>, %arg11: memref<1x16x256xf32, #tpu.memory_space<vmem>>) attributes {dimension_semantics = [#tpu.dimension_semantics<parallel>], iteration_bounds = array<i64: 2>, scalar_prefetch = 0 : i64, scratch_operands = 0 : i64, tpu.core_type = #tpu.core_type<tc>, window_params = [{transform_indices = @transform_0, window_bounds = array<i64: 1, 16, 16, 16>}, {pipeline_mode = #tpu.pipeline_mode<synchronous>, transform_indices = @transform_1, window_bounds = array<i64: 16, 64>}, {pipeline_mode = #tpu.pipeline_mode<synchronous>, transform_indices = @transform_2, window_bounds = array<i64: 1, 64>}, {pipeline_mode = #tpu.pipeline_mode<synchronous>, transform_indices = @transform_3, window_bounds = array<i64: 1, 64>}, {pipeline_mode = #tpu.pipeline_mode<synchronous>, transform_indices = @transform_4, window_bounds = array<i64: 9, 64>}, {pipeline_mode = #tpu.pipeline_mode<synchronous>, transform_indices = @transform_5, window_bounds = array<i64: 1, 64>}, {pipeline_mode = #tpu.pipeline_mode<synchronous>, transform_indices = @transform_6, window_bounds = array<i64: 1, 64>}, {pipeline_mode = #tpu.pipeline_mode<synchronous>, transform_indices = @transform_7, window_bounds = array<i64: 64, 16>}, {pipeline_mode = #tpu.pipeline_mode<synchronous>, transform_indices = @transform_8, window_bounds = array<i64: 1, 16>}, {pipeline_mode = #tpu.pipeline_mode<synchronous>, transform_indices = @transform_9, window_bounds = array<i64: 1, 16>}, {transform_indices = @transform_10, window_bounds = array<i64: 1, 16, 256>}]} {
    %c0 = arith.constant 0 : index
    %c0_0 = arith.constant 0 : index
    %c0_1 = arith.constant 0 : index
    %c0_2 = arith.constant 0 : index
    %0 = vector.load %arg1[%c0, %c0_0, %c0_1, %c0_2] : memref<1x16x16x16xf32, #tpu.memory_space<vmem>>, vector<1x16x16x16xf32>
    %1 = vector.shape_cast %0 : vector<1x16x16x16xf32> to vector<256x16xf32>
    %2 = arith.truncf %1 : vector<256x16xf32> to vector<256x16xbf16>
    %c0_3 = arith.constant 0 : index
    %c0_4 = arith.constant 0 : index
    %3 = vector.load %arg2[%c0_3, %c0_4] : memref<16x64xbf16, #tpu.memory_space<vmem>>, vector<16x64xbf16>
    %cst = arith.constant dense<0.000000e+00> : vector<256x64xf32>
    %4 = tpu.matmul %2, %3, %cst {dimension_numbers = #tpu.dot_dimension_numbers<[1], [0], [0], [1], [0, 0, 1, 1], [], []>} : vector<256x16xbf16>, vector<16x64xbf16>, vector<256x64xf32> -> vector<256x64xf32>
    %c0_5 = arith.constant 0 : index
    %c0_6 = arith.constant 0 : index
    %5 = vector.load %arg3[%c0_5, %c0_6] : memref<1x64xf32, #tpu.memory_space<vmem>>, vector<1x64xf32>
    %6 = vector.broadcast %5 : vector<1x64xf32> to vector<256x64xf32>
    %7 = arith.mulf %4, %6 : vector<256x64xf32>
    %c0_7 = arith.constant 0 : index
    %c0_8 = arith.constant 0 : index
    %8 = vector.load %arg4[%c0_7, %c0_8] : memref<1x64xf32, #tpu.memory_space<vmem>>, vector<1x64xf32>
    %9 = vector.broadcast %8 : vector<1x64xf32> to vector<256x64xf32>
    %10 = arith.addf %7, %9 : vector<256x64xf32>
    %cst_9 = arith.constant 0.000000e+00 : f32
    %cst_10 = arith.constant 6.000000e+00 : f32
    %11 = vector.broadcast %cst_9 : f32 to vector<256x64xf32>
    %12 = arith.maximumf %11, %10 : vector<256x64xf32>
    %13 = vector.broadcast %cst_10 : f32 to vector<256x64xf32>
    %14 = arith.minimumf %13, %12 : vector<256x64xf32>
    %15 = vector.shape_cast %14 : vector<256x64xf32> to vector<1x16x16x64xf32>
    %c0_11 = arith.constant 0 : index
    %c0_12 = arith.constant 0 : index
    %16 = vector.load %arg5[%c0_11, %c0_12] : memref<9x64xf32, #tpu.memory_space<vmem>>, vector<9x64xf32>
    %17 = vector.extract_strided_slice %16 {offsets = [0, 0], sizes = [1, 64], strides = [1, 1]} : vector<9x64xf32> to vector<1x64xf32>
    %18 = vector.shape_cast %17 : vector<1x64xf32> to vector<1x1x1x64xf32>
    %19 = arith.truncf %18 : vector<1x1x1x64xf32> to vector<1x1x1x64xbf16>
    %20 = vector.extract_strided_slice %16 {offsets = [1, 0], sizes = [1, 64], strides = [1, 1]} : vector<9x64xf32> to vector<1x64xf32>
    %21 = vector.shape_cast %20 : vector<1x64xf32> to vector<1x1x1x64xf32>
    %22 = arith.truncf %21 : vector<1x1x1x64xf32> to vector<1x1x1x64xbf16>
    %23 = vector.extract_strided_slice %16 {offsets = [2, 0], sizes = [1, 64], strides = [1, 1]} : vector<9x64xf32> to vector<1x64xf32>
    %24 = vector.shape_cast %23 : vector<1x64xf32> to vector<1x1x1x64xf32>
    %25 = arith.truncf %24 : vector<1x1x1x64xf32> to vector<1x1x1x64xbf16>
    %26 = vector.extract_strided_slice %16 {offsets = [3, 0], sizes = [1, 64], strides = [1, 1]} : vector<9x64xf32> to vector<1x64xf32>
    %27 = vector.shape_cast %26 : vector<1x64xf32> to vector<1x1x1x64xf32>
    %28 = arith.truncf %27 : vector<1x1x1x64xf32> to vector<1x1x1x64xbf16>
    %29 = vector.extract_strided_slice %16 {offsets = [4, 0], sizes = [1, 64], strides = [1, 1]} : vector<9x64xf32> to vector<1x64xf32>
    %30 = vector.shape_cast %29 : vector<1x64xf32> to vector<1x1x1x64xf32>
    %31 = arith.truncf %30 : vector<1x1x1x64xf32> to vector<1x1x1x64xbf16>
    %32 = vector.extract_strided_slice %16 {offsets = [5, 0], sizes = [1, 64], strides = [1, 1]} : vector<9x64xf32> to vector<1x64xf32>
    %33 = vector.shape_cast %32 : vector<1x64xf32> to vector<1x1x1x64xf32>
    %34 = arith.truncf %33 : vector<1x1x1x64xf32> to vector<1x1x1x64xbf16>
    %35 = vector.extract_strided_slice %16 {offsets = [6, 0], sizes = [1, 64], strides = [1, 1]} : vector<9x64xf32> to vector<1x64xf32>
    %36 = vector.shape_cast %35 : vector<1x64xf32> to vector<1x1x1x64xf32>
    %37 = arith.truncf %36 : vector<1x1x1x64xf32> to vector<1x1x1x64xbf16>
    %38 = vector.extract_strided_slice %16 {offsets = [7, 0], sizes = [1, 64], strides = [1, 1]} : vector<9x64xf32> to vector<1x64xf32>
    %39 = vector.shape_cast %38 : vector<1x64xf32> to vector<1x1x1x64xf32>
    %40 = arith.truncf %39 : vector<1x1x1x64xf32> to vector<1x1x1x64xbf16>
    %41 = vector.extract_strided_slice %16 {offsets = [8, 0], sizes = [1, 64], strides = [1, 1]} : vector<9x64xf32> to vector<1x64xf32>
    %42 = vector.shape_cast %41 : vector<1x64xf32> to vector<1x1x1x64xf32>
    %43 = arith.truncf %42 : vector<1x1x1x64xf32> to vector<1x1x1x64xbf16>
    %cst_13 = arith.constant 0.000000e+00 : f32
    %44 = vector.broadcast %cst_13 : f32 to vector<1x1x16x64xf32>
    %45 = tpu.concatenate %44, %15, %44 in 1 : vector<1x1x16x64xf32>, vector<1x16x16x64xf32>, vector<1x1x16x64xf32> -> vector<1x18x16x64xf32>
    %cst_14 = arith.constant 0.000000e+00 : f32
    %46 = vector.broadcast %cst_14 : f32 to vector<1x18x8x64xf32>
    %47 = tpu.concatenate %46, %45, %46 in 2 : vector<1x18x8x64xf32>, vector<1x18x16x64xf32>, vector<1x18x8x64xf32> -> vector<1x18x32x64xf32>
    %cst_15 = arith.constant 0.000000e+00 : bf16
    %48 = vector.broadcast %cst_15 : bf16 to vector<1x16x16x64xbf16>
    %49 = vector.extract_strided_slice %47 {offsets = [0, 0, 7, 0], sizes = [1, 18, 16, 64], strides = [1, 1, 1, 1]} : vector<1x18x32x64xf32> to vector<1x18x16x64xf32>
    %50 = arith.truncf %49 : vector<1x18x16x64xf32> to vector<1x18x16x64xbf16>
    %51 = vector.extract_strided_slice %50 {offsets = [0, 0, 0, 0], sizes = [1, 16, 16, 64], strides = [1, 1, 1, 1]} : vector<1x18x16x64xbf16> to vector<1x16x16x64xbf16>
    %52 = vector.broadcast %19 : vector<1x1x1x64xbf16> to vector<1x16x16x64xbf16>
    %53 = arith.mulf %51, %52 : vector<1x16x16x64xbf16>
    %54 = arith.addf %48, %53 : vector<1x16x16x64xbf16>
    %55 = vector.extract_strided_slice %50 {offsets = [0, 1, 0, 0], sizes = [1, 16, 16, 64], strides = [1, 1, 1, 1]} : vector<1x18x16x64xbf16> to vector<1x16x16x64xbf16>
    %56 = vector.broadcast %28 : vector<1x1x1x64xbf16> to vector<1x16x16x64xbf16>
    %57 = arith.mulf %55, %56 : vector<1x16x16x64xbf16>
    %58 = arith.addf %54, %57 : vector<1x16x16x64xbf16>
    %59 = vector.extract_strided_slice %50 {offsets = [0, 2, 0, 0], sizes = [1, 16, 16, 64], strides = [1, 1, 1, 1]} : vector<1x18x16x64xbf16> to vector<1x16x16x64xbf16>
    %60 = vector.broadcast %37 : vector<1x1x1x64xbf16> to vector<1x16x16x64xbf16>
    %61 = arith.mulf %59, %60 : vector<1x16x16x64xbf16>
    %62 = arith.addf %58, %61 : vector<1x16x16x64xbf16>
    %63 = vector.extract_strided_slice %47 {offsets = [0, 0, 8, 0], sizes = [1, 18, 16, 64], strides = [1, 1, 1, 1]} : vector<1x18x32x64xf32> to vector<1x18x16x64xf32>
    %64 = arith.truncf %63 : vector<1x18x16x64xf32> to vector<1x18x16x64xbf16>
    %65 = vector.extract_strided_slice %64 {offsets = [0, 0, 0, 0], sizes = [1, 16, 16, 64], strides = [1, 1, 1, 1]} : vector<1x18x16x64xbf16> to vector<1x16x16x64xbf16>
    %66 = vector.broadcast %22 : vector<1x1x1x64xbf16> to vector<1x16x16x64xbf16>
    %67 = arith.mulf %65, %66 : vector<1x16x16x64xbf16>
    %68 = arith.addf %62, %67 : vector<1x16x16x64xbf16>
    %69 = vector.extract_strided_slice %64 {offsets = [0, 1, 0, 0], sizes = [1, 16, 16, 64], strides = [1, 1, 1, 1]} : vector<1x18x16x64xbf16> to vector<1x16x16x64xbf16>
    %70 = vector.broadcast %31 : vector<1x1x1x64xbf16> to vector<1x16x16x64xbf16>
    %71 = arith.mulf %69, %70 : vector<1x16x16x64xbf16>
    %72 = arith.addf %68, %71 : vector<1x16x16x64xbf16>
    %73 = vector.extract_strided_slice %64 {offsets = [0, 2, 0, 0], sizes = [1, 16, 16, 64], strides = [1, 1, 1, 1]} : vector<1x18x16x64xbf16> to vector<1x16x16x64xbf16>
    %74 = vector.broadcast %40 : vector<1x1x1x64xbf16> to vector<1x16x16x64xbf16>
    %75 = arith.mulf %73, %74 : vector<1x16x16x64xbf16>
    %76 = arith.addf %72, %75 : vector<1x16x16x64xbf16>
    %77 = vector.extract_strided_slice %47 {offsets = [0, 0, 9, 0], sizes = [1, 18, 16, 64], strides = [1, 1, 1, 1]} : vector<1x18x32x64xf32> to vector<1x18x16x64xf32>
    %78 = arith.truncf %77 : vector<1x18x16x64xf32> to vector<1x18x16x64xbf16>
    %79 = vector.extract_strided_slice %78 {offsets = [0, 0, 0, 0], sizes = [1, 16, 16, 64], strides = [1, 1, 1, 1]} : vector<1x18x16x64xbf16> to vector<1x16x16x64xbf16>
    %80 = vector.broadcast %25 : vector<1x1x1x64xbf16> to vector<1x16x16x64xbf16>
    %81 = arith.mulf %79, %80 : vector<1x16x16x64xbf16>
    %82 = arith.addf %76, %81 : vector<1x16x16x64xbf16>
    %83 = vector.extract_strided_slice %78 {offsets = [0, 1, 0, 0], sizes = [1, 16, 16, 64], strides = [1, 1, 1, 1]} : vector<1x18x16x64xbf16> to vector<1x16x16x64xbf16>
    %84 = vector.broadcast %34 : vector<1x1x1x64xbf16> to vector<1x16x16x64xbf16>
    %85 = arith.mulf %83, %84 : vector<1x16x16x64xbf16>
    %86 = arith.addf %82, %85 : vector<1x16x16x64xbf16>
    %87 = vector.extract_strided_slice %78 {offsets = [0, 2, 0, 0], sizes = [1, 16, 16, 64], strides = [1, 1, 1, 1]} : vector<1x18x16x64xbf16> to vector<1x16x16x64xbf16>
    %88 = vector.broadcast %43 : vector<1x1x1x64xbf16> to vector<1x16x16x64xbf16>
    %89 = arith.mulf %87, %88 : vector<1x16x16x64xbf16>
    %90 = arith.addf %86, %89 : vector<1x16x16x64xbf16>
    %91 = arith.extf %90 : vector<1x16x16x64xbf16> to vector<1x16x16x64xf32>
    %92 = vector.shape_cast %91 : vector<1x16x16x64xf32> to vector<256x64xf32>
    %c0_16 = arith.constant 0 : index
    %c0_17 = arith.constant 0 : index
    %93 = vector.load %arg6[%c0_16, %c0_17] : memref<1x64xf32, #tpu.memory_space<vmem>>, vector<1x64xf32>
    %94 = vector.broadcast %93 : vector<1x64xf32> to vector<256x64xf32>
    %95 = arith.mulf %92, %94 : vector<256x64xf32>
    %c0_18 = arith.constant 0 : index
    %c0_19 = arith.constant 0 : index
    %96 = vector.load %arg7[%c0_18, %c0_19] : memref<1x64xf32, #tpu.memory_space<vmem>>, vector<1x64xf32>
    %97 = vector.broadcast %96 : vector<1x64xf32> to vector<256x64xf32>
    %98 = arith.addf %95, %97 : vector<256x64xf32>
    %cst_20 = arith.constant 0.000000e+00 : f32
    %cst_21 = arith.constant 6.000000e+00 : f32
    %99 = vector.broadcast %cst_20 : f32 to vector<256x64xf32>
    %100 = arith.maximumf %99, %98 : vector<256x64xf32>
    %101 = vector.broadcast %cst_21 : f32 to vector<256x64xf32>
    %102 = arith.minimumf %101, %100 : vector<256x64xf32>
    %103 = arith.truncf %102 : vector<256x64xf32> to vector<256x64xbf16>
    %c0_22 = arith.constant 0 : index
    %c0_23 = arith.constant 0 : index
    %104 = vector.load %arg8[%c0_22, %c0_23] : memref<64x16xbf16, #tpu.memory_space<vmem>>, vector<64x16xbf16>
    %cst_24 = arith.constant dense<0.000000e+00> : vector<256x16xf32>
    %105 = tpu.matmul %103, %104, %cst_24 {dimension_numbers = #tpu.dot_dimension_numbers<[1], [0], [0], [1], [0, 0, 1, 1], [], []>} : vector<256x64xbf16>, vector<64x16xbf16>, vector<256x16xf32> -> vector<256x16xf32>
    %c0_25 = arith.constant 0 : index
    %c0_26 = arith.constant 0 : index
    %106 = vector.load %arg9[%c0_25, %c0_26] : memref<1x16xf32, #tpu.memory_space<vmem>>, vector<1x16xf32>
    %107 = vector.broadcast %106 : vector<1x16xf32> to vector<256x16xf32>
    %108 = arith.mulf %105, %107 : vector<256x16xf32>
    %c0_27 = arith.constant 0 : index
    %c0_28 = arith.constant 0 : index
    %109 = vector.load %arg10[%c0_27, %c0_28] : memref<1x16xf32, #tpu.memory_space<vmem>>, vector<1x16xf32>
    %110 = vector.broadcast %109 : vector<1x16xf32> to vector<256x16xf32>
    %111 = arith.addf %108, %110 : vector<256x16xf32>
    %112 = vector.shape_cast %0 : vector<1x16x16x16xf32> to vector<256x16xf32>
    %113 = arith.addf %111, %112 : vector<256x16xf32>
    %114 = vector.shape_cast %113 : vector<256x16xf32> to vector<1x16x256xf32>
    %c0_29 = arith.constant 0 : index
    %c0_30 = arith.constant 0 : index
    %c0_31 = arith.constant 0 : index
    %115 = vector.load %arg11[%c0_29, %c0_30, %c0_31] : memref<1x16x256xf32, #tpu.memory_space<vmem>>, vector<1x16x256xf32>
    tpu.vector_store %arg11[%c0_29, %c0_30, %c0_31], %114 {strides = array<i32>} : memref<1x16x256xf32, #tpu.memory_space<vmem>>, vector<1x16x256xf32>,
    return
  }
  func.func @transform_0(%arg0: i32) -> (i32, i32, i32, i32) {
    %c0_i32 = arith.constant 0 : i32
    %c0_i32_0 = arith.constant 0 : i32
    %c0_i32_1 = arith.constant 0 : i32
    %c0_i32_2 = arith.constant 0 : i32
    return %arg0, %c0_i32, %c0_i32_0, %c0_i32_1 : i32, i32, i32, i32
  }
  func.func @transform_1(%arg0: i32) -> (i32, i32) {
    %c0_i32 = arith.constant 0 : i32
    %c0_i32_0 = arith.constant 0 : i32
    %c0_i32_1 = arith.constant 0 : i32
    return %c0_i32, %c0_i32_0 : i32, i32
  }
  func.func @transform_2(%arg0: i32) -> (i32, i32) {
    %c0_i32 = arith.constant 0 : i32
    %c0_i32_0 = arith.constant 0 : i32
    %c0_i32_1 = arith.constant 0 : i32
    return %c0_i32, %c0_i32_0 : i32, i32
  }
  func.func @transform_3(%arg0: i32) -> (i32, i32) {
    %c0_i32 = arith.constant 0 : i32
    %c0_i32_0 = arith.constant 0 : i32
    %c0_i32_1 = arith.constant 0 : i32
    return %c0_i32, %c0_i32_0 : i32, i32
  }
  func.func @transform_4(%arg0: i32) -> (i32, i32) {
    %c0_i32 = arith.constant 0 : i32
    %c0_i32_0 = arith.constant 0 : i32
    %c0_i32_1 = arith.constant 0 : i32
    return %c0_i32, %c0_i32_0 : i32, i32
  }
  func.func @transform_5(%arg0: i32) -> (i32, i32) {
    %c0_i32 = arith.constant 0 : i32
    %c0_i32_0 = arith.constant 0 : i32
    %c0_i32_1 = arith.constant 0 : i32
    return %c0_i32, %c0_i32_0 : i32, i32
  }
  func.func @transform_6(%arg0: i32) -> (i32, i32) {
    %c0_i32 = arith.constant 0 : i32
    %c0_i32_0 = arith.constant 0 : i32
    %c0_i32_1 = arith.constant 0 : i32
    return %c0_i32, %c0_i32_0 : i32, i32
  }
  func.func @transform_7(%arg0: i32) -> (i32, i32) {
    %c0_i32 = arith.constant 0 : i32
    %c0_i32_0 = arith.constant 0 : i32
    %c0_i32_1 = arith.constant 0 : i32
    return %c0_i32, %c0_i32_0 : i32, i32
  }
  func.func @transform_8(%arg0: i32) -> (i32, i32) {
    %c0_i32 = arith.constant 0 : i32
    %c0_i32_0 = arith.constant 0 : i32
    %c0_i32_1 = arith.constant 0 : i32
    return %c0_i32, %c0_i32_0 : i32, i32
  }
  func.func @transform_9(%arg0: i32) -> (i32, i32) {
    %c0_i32 = arith.constant 0 : i32
    %c0_i32_0 = arith.constant 0 : i32
    %c0_i32_1 = arith.constant 0 : i32
    return %c0_i32, %c0_i32_0 : i32, i32
  }
  func.func @transform_10(%arg0: i32) -> (i32, i32, i32) {
    %c0_i32 = arith.constant 0 : i32
    %c0_i32_0 = arith.constant 0 : i32
    %c0_i32_1 = arith.constant 0 : i32
    return %arg0, %c0_i32, %c0_i32_0 : i32, i32, i32
  }
}

module attributes {stable_mosaic.version = 11 : i64} {
  func.func @kernel(%arg0: i32, %arg1: memref<1x16x16x16xf32, #tpu.memory_space<vmem>>, %arg2: memref<16x64xbf16, #tpu.memory_space<vmem>>, %arg3: memref<1x64xf32, #tpu.memory_space<vmem>>, %arg4: memref<1x64xf32, #tpu.memory_space<vmem>>, %arg5: memref<9x64xf32, #tpu.memory_space<vmem>>, %arg6: memref<1x64xf32, #tpu.memory_space<vmem>>, %arg7: memref<1x64xf32, #tpu.memory_space<vmem>>, %arg8: memref<64x16xbf16, #tpu.memory_space<vmem>>, %arg9: memref<1x16xf32, #tpu.memory_space<vmem>>, %arg10: memref<1x16xf32, #tpu.memory_space<vmem>>, %arg11: memref<1x16x16x16xf32, #tpu.memory_space<vmem>>) attributes {dimension_semantics = [#tpu.dimension_semantics<parallel>], iteration_bounds = array<i64: 2>, scalar_prefetch = 0 : i64, scratch_operands = 0 : i64, tpu.core_type = #tpu.core_type<tc>, window_params = [{transform_indices = @transform_0, window_bounds = array<i64: 1, 16, 16, 16>}, {pipeline_mode = #tpu.pipeline_mode<synchronous>, transform_indices = @transform_1, window_bounds = array<i64: 16, 64>}, {pipeline_mode = #tpu.pipeline_mode<synchronous>, transform_indices = @transform_2, window_bounds = array<i64: 1, 64>}, {pipeline_mode = #tpu.pipeline_mode<synchronous>, transform_indices = @transform_3, window_bounds = array<i64: 1, 64>}, {pipeline_mode = #tpu.pipeline_mode<synchronous>, transform_indices = @transform_4, window_bounds = array<i64: 9, 64>}, {pipeline_mode = #tpu.pipeline_mode<synchronous>, transform_indices = @transform_5, window_bounds = array<i64: 1, 64>}, {pipeline_mode = #tpu.pipeline_mode<synchronous>, transform_indices = @transform_6, window_bounds = array<i64: 1, 64>}, {pipeline_mode = #tpu.pipeline_mode<synchronous>, transform_indices = @transform_7, window_bounds = array<i64: 64, 16>}, {pipeline_mode = #tpu.pipeline_mode<synchronous>, transform_indices = @transform_8, window_bounds = array<i64: 1, 16>}, {pipeline_mode = #tpu.pipeline_mode<synchronous>, transform_indices = @transform_9, window_bounds = array<i64: 1, 16>}, {transform_indices = @transform_10, window_bounds = array<i64: 1, 16, 16, 16>}]} {
    %c0 = arith.constant 0 : index
    %c0_0 = arith.constant 0 : index
    %c0_1 = arith.constant 0 : index
    %c0_2 = arith.constant 0 : index
    %0 = vector.load %arg1[%c0, %c0_0, %c0_1, %c0_2] : memref<1x16x16x16xf32, #tpu.memory_space<vmem>>, vector<1x16x16x16xf32>
    %1 = vector.shape_cast %0 : vector<1x16x16x16xf32> to vector<256x16xf32>
    %2 = arith.truncf %1 : vector<256x16xf32> to vector<256x16xbf16>
    %c0_3 = arith.constant 0 : index
    %c0_4 = arith.constant 0 : index
    %3 = vector.load %arg2[%c0_3, %c0_4] : memref<16x64xbf16, #tpu.memory_space<vmem>>, vector<16x64xbf16>
    %cst = arith.constant dense<0.000000e+00> : vector<256x64xf32>
    %4 = tpu.matmul %2, %3, %cst {dimension_numbers = #tpu.dot_dimension_numbers<[1], [0], [0], [1], [0, 0, 1, 1], [], []>} : vector<256x16xbf16>, vector<16x64xbf16>, vector<256x64xf32> -> vector<256x64xf32>
    %c0_5 = arith.constant 0 : index
    %c0_6 = arith.constant 0 : index
    %5 = vector.load %arg3[%c0_5, %c0_6] : memref<1x64xf32, #tpu.memory_space<vmem>>, vector<1x64xf32>
    %6 = vector.broadcast %5 : vector<1x64xf32> to vector<256x64xf32>
    %7 = arith.mulf %4, %6 : vector<256x64xf32>
    %c0_7 = arith.constant 0 : index
    %c0_8 = arith.constant 0 : index
    %8 = vector.load %arg4[%c0_7, %c0_8] : memref<1x64xf32, #tpu.memory_space<vmem>>, vector<1x64xf32>
    %9 = vector.broadcast %8 : vector<1x64xf32> to vector<256x64xf32>
    %10 = arith.addf %7, %9 : vector<256x64xf32>
    %cst_9 = arith.constant 0.000000e+00 : f32
    %cst_10 = arith.constant 6.000000e+00 : f32
    %11 = vector.broadcast %cst_9 : f32 to vector<256x64xf32>
    %12 = arith.maximumf %11, %10 : vector<256x64xf32>
    %13 = vector.broadcast %cst_10 : f32 to vector<256x64xf32>
    %14 = arith.minimumf %13, %12 : vector<256x64xf32>
    %15 = vector.shape_cast %14 : vector<256x64xf32> to vector<1x16x16x64xf32>
    %c0_11 = arith.constant 0 : index
    %c0_12 = arith.constant 0 : index
    %16 = vector.load %arg5[%c0_11, %c0_12] : memref<9x64xf32, #tpu.memory_space<vmem>>, vector<9x64xf32>
    %17 = vector.extract_strided_slice %16 {offsets = [0, 0], sizes = [1, 64], strides = [1, 1]} : vector<9x64xf32> to vector<1x64xf32>
    %18 = vector.shape_cast %17 : vector<1x64xf32> to vector<1x1x1x64xf32>
    %19 = arith.truncf %18 : vector<1x1x1x64xf32> to vector<1x1x1x64xbf16>
    %20 = vector.extract_strided_slice %16 {offsets = [1, 0], sizes = [1, 64], strides = [1, 1]} : vector<9x64xf32> to vector<1x64xf32>
    %21 = vector.shape_cast %20 : vector<1x64xf32> to vector<1x1x1x64xf32>
    %22 = arith.truncf %21 : vector<1x1x1x64xf32> to vector<1x1x1x64xbf16>
    %23 = vector.extract_strided_slice %16 {offsets = [2, 0], sizes = [1, 64], strides = [1, 1]} : vector<9x64xf32> to vector<1x64xf32>
    %24 = vector.shape_cast %23 : vector<1x64xf32> to vector<1x1x1x64xf32>
    %25 = arith.truncf %24 : vector<1x1x1x64xf32> to vector<1x1x1x64xbf16>
    %26 = vector.extract_strided_slice %16 {offsets = [3, 0], sizes = [1, 64], strides = [1, 1]} : vector<9x64xf32> to vector<1x64xf32>
    %27 = vector.shape_cast %26 : vector<1x64xf32> to vector<1x1x1x64xf32>
    %28 = arith.truncf %27 : vector<1x1x1x64xf32> to vector<1x1x1x64xbf16>
    %29 = vector.extract_strided_slice %16 {offsets = [4, 0], sizes = [1, 64], strides = [1, 1]} : vector<9x64xf32> to vector<1x64xf32>
    %30 = vector.shape_cast %29 : vector<1x64xf32> to vector<1x1x1x64xf32>
    %31 = arith.truncf %30 : vector<1x1x1x64xf32> to vector<1x1x1x64xbf16>
    %32 = vector.extract_strided_slice %16 {offsets = [5, 0], sizes = [1, 64], strides = [1, 1]} : vector<9x64xf32> to vector<1x64xf32>
    %33 = vector.shape_cast %32 : vector<1x64xf32> to vector<1x1x1x64xf32>
    %34 = arith.truncf %33 : vector<1x1x1x64xf32> to vector<1x1x1x64xbf16>
    %35 = vector.extract_strided_slice %16 {offsets = [6, 0], sizes = [1, 64], strides = [1, 1]} : vector<9x64xf32> to vector<1x64xf32>
    %36 = vector.shape_cast %35 : vector<1x64xf32> to vector<1x1x1x64xf32>
    %37 = arith.truncf %36 : vector<1x1x1x64xf32> to vector<1x1x1x64xbf16>
    %38 = vector.extract_strided_slice %16 {offsets = [7, 0], sizes = [1, 64], strides = [1, 1]} : vector<9x64xf32> to vector<1x64xf32>
    %39 = vector.shape_cast %38 : vector<1x64xf32> to vector<1x1x1x64xf32>
    %40 = arith.truncf %39 : vector<1x1x1x64xf32> to vector<1x1x1x64xbf16>
    %41 = vector.extract_strided_slice %16 {offsets = [8, 0], sizes = [1, 64], strides = [1, 1]} : vector<9x64xf32> to vector<1x64xf32>
    %42 = vector.shape_cast %41 : vector<1x64xf32> to vector<1x1x1x64xf32>
    %43 = arith.truncf %42 : vector<1x1x1x64xf32> to vector<1x1x1x64xbf16>
    %cst_13 = arith.constant 0.000000e+00 : f32
    %44 = vector.broadcast %cst_13 : f32 to vector<1x1x16x64xf32>
    %45 = tpu.concatenate %44, %15, %44 in 1 : vector<1x1x16x64xf32>, vector<1x16x16x64xf32>, vector<1x1x16x64xf32> -> vector<1x18x16x64xf32>
    %cst_14 = arith.constant 0.000000e+00 : f32
    %46 = vector.broadcast %cst_14 : f32 to vector<1x18x8x64xf32>
    %47 = tpu.concatenate %46, %45, %46 in 2 : vector<1x18x8x64xf32>, vector<1x18x16x64xf32>, vector<1x18x8x64xf32> -> vector<1x18x32x64xf32>
    %cst_15 = arith.constant 0.000000e+00 : bf16
    %48 = vector.broadcast %cst_15 : bf16 to vector<1x16x16x64xbf16>
    %49 = vector.extract_strided_slice %47 {offsets = [0, 0, 7, 0], sizes = [1, 18, 16, 64], strides = [1, 1, 1, 1]} : vector<1x18x32x64xf32> to vector<1x18x16x64xf32>
    %50 = arith.truncf %49 : vector<1x18x16x64xf32> to vector<1x18x16x64xbf16>
    %51 = vector.extract_strided_slice %50 {offsets = [0, 0, 0, 0], sizes = [1, 16, 16, 64], strides = [1, 1, 1, 1]} : vector<1x18x16x64xbf16> to vector<1x16x16x64xbf16>
    %52 = vector.broadcast %19 : vector<1x1x1x64xbf16> to vector<1x16x16x64xbf16>
    %53 = arith.mulf %51, %52 : vector<1x16x16x64xbf16>
    %54 = arith.addf %48, %53 : vector<1x16x16x64xbf16>
    %55 = vector.extract_strided_slice %50 {offsets = [0, 1, 0, 0], sizes = [1, 16, 16, 64], strides = [1, 1, 1, 1]} : vector<1x18x16x64xbf16> to vector<1x16x16x64xbf16>
    %56 = vector.broadcast %28 : vector<1x1x1x64xbf16> to vector<1x16x16x64xbf16>
    %57 = arith.mulf %55, %56 : vector<1x16x16x64xbf16>
    %58 = arith.addf %54, %57 : vector<1x16x16x64xbf16>
    %59 = vector.extract_strided_slice %50 {offsets = [0, 2, 0, 0], sizes = [1, 16, 16, 64], strides = [1, 1, 1, 1]} : vector<1x18x16x64xbf16> to vector<1x16x16x64xbf16>
    %60 = vector.broadcast %37 : vector<1x1x1x64xbf16> to vector<1x16x16x64xbf16>
    %61 = arith.mulf %59, %60 : vector<1x16x16x64xbf16>
    %62 = arith.addf %58, %61 : vector<1x16x16x64xbf16>
    %63 = vector.extract_strided_slice %47 {offsets = [0, 0, 8, 0], sizes = [1, 18, 16, 64], strides = [1, 1, 1, 1]} : vector<1x18x32x64xf32> to vector<1x18x16x64xf32>
    %64 = arith.truncf %63 : vector<1x18x16x64xf32> to vector<1x18x16x64xbf16>
    %65 = vector.extract_strided_slice %64 {offsets = [0, 0, 0, 0], sizes = [1, 16, 16, 64], strides = [1, 1, 1, 1]} : vector<1x18x16x64xbf16> to vector<1x16x16x64xbf16>
    %66 = vector.broadcast %22 : vector<1x1x1x64xbf16> to vector<1x16x16x64xbf16>
    %67 = arith.mulf %65, %66 : vector<1x16x16x64xbf16>
    %68 = arith.addf %62, %67 : vector<1x16x16x64xbf16>
    %69 = vector.extract_strided_slice %64 {offsets = [0, 1, 0, 0], sizes = [1, 16, 16, 64], strides = [1, 1, 1, 1]} : vector<1x18x16x64xbf16> to vector<1x16x16x64xbf16>
    %70 = vector.broadcast %31 : vector<1x1x1x64xbf16> to vector<1x16x16x64xbf16>
    %71 = arith.mulf %69, %70 : vector<1x16x16x64xbf16>
    %72 = arith.addf %68, %71 : vector<1x16x16x64xbf16>
    %73 = vector.extract_strided_slice %64 {offsets = [0, 2, 0, 0], sizes = [1, 16, 16, 64], strides = [1, 1, 1, 1]} : vector<1x18x16x64xbf16> to vector<1x16x16x64xbf16>
    %74 = vector.broadcast %40 : vector<1x1x1x64xbf16> to vector<1x16x16x64xbf16>
    %75 = arith.mulf %73, %74 : vector<1x16x16x64xbf16>
    %76 = arith.addf %72, %75 : vector<1x16x16x64xbf16>
    %77 = vector.extract_strided_slice %47 {offsets = [0, 0, 9, 0], sizes = [1, 18, 16, 64], strides = [1, 1, 1, 1]} : vector<1x18x32x64xf32> to vector<1x18x16x64xf32>
    %78 = arith.truncf %77 : vector<1x18x16x64xf32> to vector<1x18x16x64xbf16>
    %79 = vector.extract_strided_slice %78 {offsets = [0, 0, 0, 0], sizes = [1, 16, 16, 64], strides = [1, 1, 1, 1]} : vector<1x18x16x64xbf16> to vector<1x16x16x64xbf16>
    %80 = vector.broadcast %25 : vector<1x1x1x64xbf16> to vector<1x16x16x64xbf16>
    %81 = arith.mulf %79, %80 : vector<1x16x16x64xbf16>
    %82 = arith.addf %76, %81 : vector<1x16x16x64xbf16>
    %83 = vector.extract_strided_slice %78 {offsets = [0, 1, 0, 0], sizes = [1, 16, 16, 64], strides = [1, 1, 1, 1]} : vector<1x18x16x64xbf16> to vector<1x16x16x64xbf16>
    %84 = vector.broadcast %34 : vector<1x1x1x64xbf16> to vector<1x16x16x64xbf16>
    %85 = arith.mulf %83, %84 : vector<1x16x16x64xbf16>
    %86 = arith.addf %82, %85 : vector<1x16x16x64xbf16>
    %87 = vector.extract_strided_slice %78 {offsets = [0, 2, 0, 0], sizes = [1, 16, 16, 64], strides = [1, 1, 1, 1]} : vector<1x18x16x64xbf16> to vector<1x16x16x64xbf16>
    %88 = vector.broadcast %43 : vector<1x1x1x64xbf16> to vector<1x16x16x64xbf16>
    %89 = arith.mulf %87, %88 : vector<1x16x16x64xbf16>
    %90 = arith.addf %86, %89 : vector<1x16x16x64xbf16>
    %91 = arith.extf %90 : vector<1x16x16x64xbf16> to vector<1x16x16x64xf32>
    %92 = vector.shape_cast %91 : vector<1x16x16x64xf32> to vector<256x64xf32>
    %c0_16 = arith.constant 0 : index
    %c0_17 = arith.constant 0 : index
    %93 = vector.load %arg6[%c0_16, %c0_17] : memref<1x64xf32, #tpu.memory_space<vmem>>, vector<1x64xf32>
    %94 = vector.broadcast %93 : vector<1x64xf32> to vector<256x64xf32>
    %95 = arith.mulf %92, %94 : vector<256x64xf32>
    %c0_18 = arith.constant 0 : index
    %c0_19 = arith.constant 0 : index
    %96 = vector.load %arg7[%c0_18, %c0_19] : memref<1x64xf32, #tpu.memory_space<vmem>>, vector<1x64xf32>
    %97 = vector.broadcast %96 : vector<1x64xf32> to vector<256x64xf32>
    %98 = arith.addf %95, %97 : vector<256x64xf32>
    %cst_20 = arith.constant 0.000000e+00 : f32
    %cst_21 = arith.constant 6.000000e+00 : f32
    %99 = vector.broadcast %cst_20 : f32 to vector<256x64xf32>
    %100 = arith.maximumf %99, %98 : vector<256x64xf32>
    %101 = vector.broadcast %cst_21 : f32 to vector<256x64xf32>
    %102 = arith.minimumf %101, %100 : vector<256x64xf32>
    %103 = arith.truncf %102 : vector<256x64xf32> to vector<256x64xbf16>
    %c0_22 = arith.constant 0 : index
    %c0_23 = arith.constant 0 : index
    %104 = vector.load %arg8[%c0_22, %c0_23] : memref<64x16xbf16, #tpu.memory_space<vmem>>, vector<64x16xbf16>
    %cst_24 = arith.constant dense<0.000000e+00> : vector<256x16xf32>
    %105 = tpu.matmul %103, %104, %cst_24 {dimension_numbers = #tpu.dot_dimension_numbers<[1], [0], [0], [1], [0, 0, 1, 1], [], []>} : vector<256x64xbf16>, vector<64x16xbf16>, vector<256x16xf32> -> vector<256x16xf32>
    %c0_25 = arith.constant 0 : index
    %c0_26 = arith.constant 0 : index
    %106 = vector.load %arg9[%c0_25, %c0_26] : memref<1x16xf32, #tpu.memory_space<vmem>>, vector<1x16xf32>
    %107 = vector.broadcast %106 : vector<1x16xf32> to vector<256x16xf32>
    %108 = arith.mulf %105, %107 : vector<256x16xf32>
    %c0_27 = arith.constant 0 : index
    %c0_28 = arith.constant 0 : index
    %109 = vector.load %arg10[%c0_27, %c0_28] : memref<1x16xf32, #tpu.memory_space<vmem>>, vector<1x16xf32>
    %110 = vector.broadcast %109 : vector<1x16xf32> to vector<256x16xf32>
    %111 = arith.addf %108, %110 : vector<256x16xf32>
    %112 = vector.shape_cast %0 : vector<1x16x16x16xf32> to vector<256x16xf32>
    %113 = arith.addf %111, %112 : vector<256x16xf32>
    %114 = vector.shape_cast %113 : vector<256x16xf32> to vector<1x16x16x16xf32>
    %c0_29 = arith.constant 0 : index
    %c0_30 = arith.constant 0 : index
    %c0_31 = arith.constant 0 : index
    %c0_32 = arith.constant 0 : index
    %115 = vector.load %arg11[%c0_29, %c0_30, %c0_31, %c0_32] : memref<1x16x16x16xf32, #tpu.memory_space<vmem>>, vector<1x16x16x16xf32>
    tpu.vector_store %arg11[%c0_29, %c0_30, %c0_31, %c0_32], %114 {strides = array<i32>} : memref<1x16x16x16xf32, #tpu.memory_space<vmem>>, vector<1x16x16x16xf32>,
    return
  }
  func.func @transform_0(%arg0: i32) -> (i32, i32, i32, i32) {
    %c0_i32 = arith.constant 0 : i32
    %c0_i32_0 = arith.constant 0 : i32
    %c0_i32_1 = arith.constant 0 : i32
    %c0_i32_2 = arith.constant 0 : i32
    return %arg0, %c0_i32, %c0_i32_0, %c0_i32_1 : i32, i32, i32, i32
  }
  func.func @transform_1(%arg0: i32) -> (i32, i32) {
    %c0_i32 = arith.constant 0 : i32
    %c0_i32_0 = arith.constant 0 : i32
    %c0_i32_1 = arith.constant 0 : i32
    return %c0_i32, %c0_i32_0 : i32, i32
  }
  func.func @transform_2(%arg0: i32) -> (i32, i32) {
    %c0_i32 = arith.constant 0 : i32
    %c0_i32_0 = arith.constant 0 : i32
    %c0_i32_1 = arith.constant 0 : i32
    return %c0_i32, %c0_i32_0 : i32, i32
  }
  func.func @transform_3(%arg0: i32) -> (i32, i32) {
    %c0_i32 = arith.constant 0 : i32
    %c0_i32_0 = arith.constant 0 : i32
    %c0_i32_1 = arith.constant 0 : i32
    return %c0_i32, %c0_i32_0 : i32, i32
  }
  func.func @transform_4(%arg0: i32) -> (i32, i32) {
    %c0_i32 = arith.constant 0 : i32
    %c0_i32_0 = arith.constant 0 : i32
    %c0_i32_1 = arith.constant 0 : i32
    return %c0_i32, %c0_i32_0 : i32, i32
  }
  func.func @transform_5(%arg0: i32) -> (i32, i32) {
    %c0_i32 = arith.constant 0 : i32
    %c0_i32_0 = arith.constant 0 : i32
    %c0_i32_1 = arith.constant 0 : i32
    return %c0_i32, %c0_i32_0 : i32, i32
  }
  func.func @transform_6(%arg0: i32) -> (i32, i32) {
    %c0_i32 = arith.constant 0 : i32
    %c0_i32_0 = arith.constant 0 : i32
    %c0_i32_1 = arith.constant 0 : i32
    return %c0_i32, %c0_i32_0 : i32, i32
  }
  func.func @transform_7(%arg0: i32) -> (i32, i32) {
    %c0_i32 = arith.constant 0 : i32
    %c0_i32_0 = arith.constant 0 : i32
    %c0_i32_1 = arith.constant 0 : i32
    return %c0_i32, %c0_i32_0 : i32, i32
  }
  func.func @transform_8(%arg0: i32) -> (i32, i32) {
    %c0_i32 = arith.constant 0 : i32
    %c0_i32_0 = arith.constant 0 : i32
    %c0_i32_1 = arith.constant 0 : i32
    return %c0_i32, %c0_i32_0 : i32, i32
  }
  func.func @transform_9(%arg0: i32) -> (i32, i32) {
    %c0_i32 = arith.constant 0 : i32
    %c0_i32_0 = arith.constant 0 : i32
    %c0_i32_1 = arith.constant 0 : i32
    return %c0_i32, %c0_i32_0 : i32, i32
  }
  func.func @transform_10(%arg0: i32) -> (i32, i32, i32, i32) {
    %c0_i32 = arith.constant 0 : i32
    %c0_i32_0 = arith.constant 0 : i32
    %c0_i32_1 = arith.constant 0 : i32
    %c0_i32_2 = arith.constant 0 : i32
    return %arg0, %c0_i32, %c0_i32_0, %c0_i32_1 : i32, i32, i32, i32
  }
}

</mosaic_0001>

<bundles_post_ra>
// kernel: tpu_custom_call.1
= control target key start
LH: loop header
LB: loop body
LE: loop exit
PB: predicated region body
PF: predicated region fallthrough
CT: control target
= control target key end

     0   :  { %15 = vsyncpa [#allocation3], 0  ;;  %s6396_s0 = inlined_call_operand.hbm [shape: f32[2,16,16,16], index: 0, kind: input, shape index: {}]   ;;  %s6397_s1 = inlined_call_operand.vmem [shape: bf16[16,64], index: 1, kind: input, shape index: {}]   ;;  %s6398_s2 = inlined_call_operand.vmem [shape: f32[1,64], index: 2, kind: input, shape index: {}]   ;;  %s6399_s3 = inlined_call_operand.vmem [shape: f32[1,64], index: 3, kind: input, shape index: {}]   ;;  %s6400_s4 = inlined_call_operand.vmem [shape: f32[9,64], index: 4, kind: input, shape index: {}]   ;;  %s6401_s5 = inlined_call_operand.vmem [shape: f32[1,64], index: 5, kind: input, shape index: {}]   ;;  %s6402_s6 = inlined_call_operand.vmem [shape: f32[1,64], index: 6, kind: input, shape index: {}]   ;;  %s6403_s7 = inlined_call_operand.vmem [shape: bf16[64,16], index: 7, kind: input, shape index: {}]   ;;  %s6404_s8 = inlined_call_operand.vmem [shape: f32[1,16], index: 8, kind: input, shape index: {}]   ;;  %s6405_s9 = inlined_call_operand.vmem [shape: f32[1,16], index: 9, kind: input, shape index: {}]   ;;  %s6406_s10 = inlined_call_operand.hbm [shape: f32[2,16,16,16], index: 10, kind: output, shape index: {}]  }
   0x1   :  { %17 = vsyncpa [#allocation3 + $0x1], 0 }
   0x2   :  { %18 = vsyncpa [#allocation4], 0 }
   0x3   :  { %20 = vsyncpa [#allocation4 + $0x1], 0  ;;  %s4669_s13 = smov 0   ;;  %s4671_s14 = smov 0  }
   0x4   :  { %s4673_s15 = smov 0   ;;  %s4675_s16 = smov 0  }
   0x5 LB: > { %6437 = sst [smem:[#allocation8_spill]] %s4603_s15  ;;  %s4690_s17 = sadd.s32 4294967295, %s4607_s16   ;;  %s4607_s16 = sphi %s4675_s16, %s6500_s16   ;;  %s4603_s15 = sphi %s4673_s15, %s6502_s15   ;;  %s4599_s14 = sphi %s4671_s14, %s6504_s14   ;;  %s4595_s13 = sphi %s4669_s13, %s6503_s13  }
   0x6   : > { %s4329_s18 = sadd.s32 4294967294, %s4607_s16   ;;  %s4694_s19 = sadd.s32 1, %s4607_s16  }
   0x7   : > { %6438 = sst [smem:[#allocation9_spill]] %s4694_s19  ;;  %s33_s20 = sadd.s32 1, %s4603_s15 }
   0x8   : > { %s30_s21 = ssub.s32 %s4607_s16, %s4694_s19  ;;  %p40_p0 = scmp.ne.s32.totalorder %s4603_s15, %s4599_s14 }
   0x9   : > { %p31_p1 = scmp.eq.s32.totalorder %s30_s21, 0  ;;  %p41_p2 = scmp.eq.s32.totalorder %s4607_s16, 0 }
   0xa   : > { %p46_p3 = scmp.ne.s32.totalorder %s4599_s14, %s4595_s13  ;;  %p47_p4 = scmp.eq.s32.totalorder %s4690_s17, 0 }
   0xb   : > { %s4706_s22 = scalar_select %p31_p1, %s4603_s15, %s33_s20  }
   0xc   : > { %p4708_p5 = por %p41_p2, %p40_p0  ;;  %p4712_p6 = por %p47_p4, %p46_p3 }
   0xd   : > { %6439 = sst [smem:[#allocation10_spill]] %s4706_s22  ;;  %p259_p7 = scmp.eq.s32.totalorder %s4690_s17, 1 }
   0xe   : > { %p265_p8 = scmp.eq.s32.totalorder %s4329_s18, 1  ;;  %p4419_p10 = scmp.lt.s32.totalorder %s4607_s16, 2 }
   0xf   : > { %p4719_p11 = por %p259_p7, %p40_p0  ;;  %s312_s27 = sand.u32 1, %s4603_s15  }
  0x10   : > { %p4723_p12 = por %p265_p8, %p46_p3  ;;  %s4395_s28 = sshll.u32 %s4607_s16, 8 }
  0x11   : > { %s4332_s29 = sshll.u32 %s312_s27, 8  ;;  %s321_s12 = scalar_lea.hbm %s6396_s0, %s4395_s28 }
  0x12   : > { %s6443_s26 = scalar_select %p4723_p12, 1, 0 }
  0x13   : > { %s322_s20 = sshll.u32 %s321_s12, 4  ;;  %s316_s18 = scalar_lea.vmem [#allocation2], %s4332_s29  ;;  %s323_s20 = int_to_ptr.hbm [resolvable:$true] %s322_s20 }
  0x14   : > { %6444 = sst [smem:[#allocation11_spill]] %s6443_s26  ;;  %s324_s21 = sshll.u32 %s316_s18, 4  ;;  %s325_s21 = int_to_ptr.vmem [resolvable:$true] %s324_s21 }
  0x15   : > { %p4734_p13 = pnand %p4419_p10, %p4708_p5  ;;  %p4335_p0 = scmp.ge.s32.totalorder %s4607_s16, 1 }
  0x16   : > { %p332_p1 = scmp.lt.s32.totalorder %s4607_s16, 3  ;;  %s313_s15 = scalar_lea.sflag [#allocation3], %s312_s27 }
  0x17   : > { %s4511_s19 = sshra.s32 %s323_s20, 4  ;;  %p4515_p3 = pneg %p4734_p13  ;;  %s4512_s19 = int_to_ptr.hbm [resolvable:$true] %s4511_s19 }
  0x18   : > { %s4513_s26 = scalar_lea.hbm %s4512_s19, 256  ;;  %s4518_s23 = scalar_lea.hbm %s6396_s0, 512 }
  0x19   : > { %p4514_p2 = scmp.ne.s32.totalorder %s4512_s19, %s4513_s26  ;;  %p4519_p5 = scmp.lt.s32.totalorder %s4512_s19, %s6396_s0 }
  0x1a   : > { %p4520_p8 = scmp.lt.s32.totalorder %s4518_s23, %s4513_s26 }
  0x1b   : > { %p4516_p4 = pnand %p4515_p3, %p4514_p2 }
  0x1c   : > { %p4521_p10 = por %p4520_p8, %p4519_p5 }
  0x1d   : > { %p4517_p7 = pneg %p4516_p4 }
  0x1f   : > { %p4522_p9 = pnand %p4521_p10, %p4517_p7 }
  0x21   : > { %4525 = shalt.err (!%p4522_p9)
}
  0x22   : > { %s4609_s27 = smov 128   ;;  %s4610_s12 = smov 8  }
  0x23   : > { %4414 = dma.hbm_to_vmem [thread:$0]  (!%p4734_p13), %s323_s20, 4096, %s325_s21, %s313_s15, %s4609_s27, %s4609_s27, %s4610_s12  }
  0x24   : > { %p333_p2 = pnand %p4335_p0, %p332_p1 }
  0x26   : > { %336 = sbr.rel (%p333_p2) target bundleno = 1029 (0x405), region = 60 }
  0x2b   : > { %s4755_s18 = sand.u32 1, %s4599_s14  }
  0x2c   : > { %s4336_s19 = sshll.u32 %s4755_s18, 8  ;;  %s339_s26 = scalar_lea.sflag [#allocation3], %s4755_s18 }
  0x2d   : > { %s4761_s28 = scalar_lea.vmem [#allocation2], %s4336_s19 }
  0x2e   : > { %4586 = dma.done.wait (%p4712_p6), %s339_s26, 4096  }
  0x2f   : > { %4588 = vsyncadd (%p4712_p6), %s339_s26, 4294963200  ;;  %v4396_v0 = vld [vmem:[%s6397_s1] sm:$0xff]  ;;  %v382_v2 = vld [vmem:[%s4761_s28 + $0x8] sm:$0xff]  ;;  %vm437_vm0 = vcmask 130048   ;;  %v4611_v41 = vmov 0.0|0.0   ;;  %vm1495_vm1 = vcmask 1046528  }
  0x30   : > { %v381_v1 = vld [vmem:[%s4761_s28] sm:$0xff]  ;;  %493 = vmatpush.bf16.msra.mxu0 %v4396_v0  ;;  %4402 = vmatpush.bf16.msra.mxu3 %v4396_v0  ;;  %v383_v4 = vld [vmem:[%s4761_s28 + $0x10] sm:$0xff]  ;;  %v384_v5 = vld [vmem:[%s4761_s28 + $0x18] sm:$0xff]  ;;  %v4811_v42 = vunpack.c.l.bf16 %v4611_v41  ;;  %vm2594_vm2 = vcmask 1045504   ;;  %vm3669_vm3 = vcmask 1040384   ;;  %vm3966_vm4 = vcmask 523264  }
  0x31   : > { %v413_v3 = vpack.c.bf16 %v382_v2, %v381_v1  ;;  %v414_v6 = vpack.c.bf16 %v384_v5, %v383_v4  ;;  %v385_v7 = vld [vmem:[%s4761_s28 + $0x20] sm:$0xff]  ;;  %v386_v8 = vld [vmem:[%s4761_s28 + $0x28] sm:$0xff]  ;;  %v399_v10 = vld [vmem:[%s4761_s28 + $0x90] sm:$0xff]  ;;  %s5797_s21 = scalar_lea.vmem [#allocation5], %s4336_s19  ;;  %s4401_s11 = sshll.u32 %s4690_s17, 8 }
  0x32   : > { %v415_v9 = vpack.c.bf16 %v386_v8, %v385_v7  ;;  %v400_v11 = vld [vmem:[%s4761_s28 + $0x98] sm:$0xff]  ;;  %v387_v13 = vld [vmem:[%s4761_s28 + $0x30] sm:$0xff]  ;;  %v401_v16 = vld [vmem:[%s4761_s28 + $0xa0] sm:$0xff]  ;;  %6446 = vst [vmem:[#allocation12_spill] sm:$0xff] %v4811_v42  ;;  %s4252_s26 = scalar_lea.hbm %s6406_s10, %s4401_s11  ;;  %s4253_s15 = sshll.u32 %s5797_s21, 4  ;;  %s4254_s15 = int_to_ptr.vmem [resolvable:$true] %s4253_s15 }
  0x33   : > { %4342 = vmatmul.msk.bf16.vlgmr.msra.gmra.mxu0 %vm437_vm0, %v413_v3  ;;  %v422_v12 = vpack.c.bf16 %v400_v11, %v399_v10  ;;  %v388_v14 = vld [vmem:[%s4761_s28 + $0x38] sm:$0xff]  ;;  %v402_v17 = vld [vmem:[%s4761_s28 + $0xa8] sm:$0xff]  ;;  %v389_v19 = vld [vmem:[%s4761_s28 + $0x40] sm:$0xff]  ;;  %s4255_s22 = sshll.u32 %s4252_s26, 4  ;;  %s4241_s17 = scalar_lea.sflag [#allocation4], %s4755_s18  ;;  %s4256_s22 = int_to_ptr.hbm [resolvable:$true] %s4255_s22 }
  0x34   : > { %v416_v15 = vpack.c.bf16 %v388_v14, %v387_v13  ;;  %v423_v18 = vpack.c.bf16 %v402_v17, %v401_v16  ;;  %v390_v20 = vld [vmem:[%s4761_s28 + $0x48] sm:$0xff]  ;;  %v403_v22 = vld [vmem:[%s4761_s28 + $0xb0] sm:$0xff]  ;;  %v404_v23 = vld [vmem:[%s4761_s28 + $0xb8] sm:$0xff]  ;;  %s4555_s24 = sshra.s32 %s4256_s22, 4  ;;  %s4561_s23 = scalar_lea.hbm %s6406_s10, 512  ;;  %s4556_s24 = int_to_ptr.hbm [resolvable:$true] %s4555_s24 }
  0x35   : > { %4351 = vmatmul.msk.bf16.vlgmr.msra.gmra.mxu3 %vm437_vm0, %v422_v12  ;;  %v417_v21 = vpack.c.bf16 %v390_v20, %v389_v19  ;;  %v424_v24 = vpack.c.bf16 %v404_v23, %v403_v22  ;;  %v391_v25 = vld [vmem:[%s4761_s28 + $0x50] sm:$0xff]  ;;  %v392_v26 = vld [vmem:[%s4761_s28 + $0x58] sm:$0xff]  ;;  %v405_v28 = vld [vmem:[%s4761_s28 + $0xc0] sm:$0xff]  ;;  %s4557_s20 = scalar_lea.hbm %s4556_s24, 256  ;;  %p4562_p0 = scmp.lt.s32.totalorder %s4556_s24, %s6406_s10 }
  0x36   : > { %v418_v27 = vpack.c.bf16 %v392_v26, %v391_v25  ;;  %v406_v29 = vld [vmem:[%s4761_s28 + $0xc8] sm:$0xff]  ;;  %v711_v30 = vld [vmem:[%s6400_s4] sm:$0xff]  ;;  %v407_v45 = vld [vmem:[%s4761_s28 + $0xd0] sm:$0xff]  ;;  %p4558_p6 = scmp.ne.s32.totalorder %s4556_s24, %s4557_s20  ;;  %p4563_p1 = scmp.lt.s32.totalorder %s4561_s23, %s4557_s20 }
  0x37   : > { %v425_v31 = vpack.c.bf16 %v406_v29, %v405_v28  ;;  %v713_v32 = vpack.c.bf16 %v711_v30, %v711_v30  ;;  %v393_v36 = vld [vmem:[%s4761_s28 + $0x60] sm:$0xff]  ;;  %v394_v37 = vld [vmem:[%s4761_s28 + $0x68] sm:$0xff]  ;;  %v408_v46 = vld [vmem:[%s4761_s28 + $0xd8] sm:$0xff] }
  0x38   : > { %v419_v40 = vpack.c.bf16 %v394_v37, %v393_v36  ;;  %v426_v47 = vpack.c.bf16 %v408_v46, %v407_v45  ;;  %v395_v53 = vld [vmem:[%s4761_s28 + $0x70] sm:$0xff]  ;;  %v396_v54 = vld [vmem:[%s4761_s28 + $0x78] sm:$0xff]  ;;  %v409_v1 = vld [vmem:[%s4761_s28 + $0xe0] sm:$0xff]  ;;  %p4559_p9 = pnand %p4558_p6, %p4719_p11  ;;  %p4564_p3 = por %p4563_p1, %p4562_p0 }
  0x39   : > { %v939_v33 = vshrl.u32 %v713_v32, 16  ;;  %v4803_v34 = vpack.i.b16 %v713_v32, %v713_v32  ;;  %v420_v58 = vpack.c.bf16 %v396_v54, %v395_v53  ;;  %v410_v2 = vld [vmem:[%s4761_s28 + $0xe8] sm:$0xff]  ;;  %v4854_v11 = vld [vmem:[%s6398_s2] ss:$0 sm:$0xff]  ;;  %v412_v36 = vld [vmem:[%s4761_s28 + $0xf8] sm:$0xff] }
  0x3a   : > { %v712_v3 = vld [vmem:[%s6400_s4 + $0x8] sm:$0x1]  ;;  %v427_v4 = vpack.c.bf16 %v410_v2, %v409_v1  ;;  %p4560_p13 = pneg %p4559_p9 }
  0x3b   : > { %v4805_v35 = vpack.i.b16 %v939_v33, %v939_v33  ;;  %v751_v38 = vperm.slane %v4803_v34, 0  ;;  %v1142_v52 = vperm.slane %v4803_v34, 3  ;;  %v714_v5 = vpack.c.bf16 %v712_v3, %v712_v3  ;;  %v398_v10 = vld [vmem:[%s4761_s28 + $0x88] sm:$0xff]  ;;  %v411_v33 = vld [vmem:[%s4761_s28 + $0xf0] sm:$0xff] }
  0x3c   : > { %p4565_p4 = pnand %p4564_p3, %p4560_p13 }
  0x3d   : > { %v942_v39 = vperm.slane %v4805_v35, 1  ;;  %v4813_v43 = vunpack.c.l.bf16 %v751_v38  ;;  %v4830_v57 = vunpack.c.l.bf16 %v1142_v52  ;;  %v1336_v61 = vperm.slane %v4805_v35, 0 }
  0x3e   : > { %v3192_v14 = vpack.i.b16 %v714_v5, %v714_v5  ;;  %v2800_v20 = vperm.slane %v4805_v35, 2  ;;  %v428_v38 = vpack.c.bf16 %v412_v36, %v411_v33 }
  0x3f   : > { %v4815_v44 = vunpack.c.l.bf16 %v942_v39  ;;  %v784_v48 = vmul.f32 %v4813_v43, %v4811_v42  ;;  %v1144_v60 = vmul.f32 %v4830_v57, %v4811_v42  ;;  %v4837_v0 = vunpack.c.l.bf16 %v1336_v61 }
  0x40   : > { %v3194_v23 = vperm.slane %v3192_v14, 0  ;;  %v4870_v28 = vunpack.c.l.bf16 %v2800_v20 }
  0x41   : > { %v946_v49 = vmul.f32 %v4815_v44, %v4811_v42  ;;  %v908_v50 = vpack.c.bf16 %v784_v48, %v784_v48  ;;  %v1175_v63 = vpack.c.bf16 %v1144_v60, %v1144_v60  ;;  %v1338_v8 = vmul.f32 %v4837_v0, %v4811_v42 }
  0x42   : > { %v4878_v32 = vunpack.c.l.bf16 %v3194_v23  ;;  %v2804_v39 = vmul.f32 %v4870_v28, %v4811_v42 }
  0x43   : > { %4343 = vmatmul.msk.bf16.gmra.mxu0 %vm437_vm0, %v414_v6  ;;  %v979_v51 = vpack.c.bf16 %v946_v49, %v946_v49  ;;  %v4828_v55 = vunpack.c.l.bf16 %v908_v50  ;;  %v4845_v7 = vunpack.c.l.bf16 %v1175_v63  ;;  %v1369_v13 = vpack.c.bf16 %v1338_v8, %v1338_v8 }
  0x45   : > { %4352 = vmatmul.msk.bf16.gmra.mxu3 %vm437_vm0, %v423_v18  ;;  %v1043_v56 = vunpack.c.l.bf16 %v979_v51  ;;  %v2420_v18 = vperm.slane %v4803_v34, 1  ;;  %v1433_v22 = vunpack.c.l.bf16 %v1369_v13  ;;  %v2837_v51 = vpack.c.bf16 %v2804_v39, %v2804_v39 }
  0x47   : > { %v1076_v59 = vadd.f32 %v1043_v56, %v4828_v55  ;;  %v4867_v25 = vunpack.c.l.bf16 %v2420_v18  ;;  %v4874_v30 = vrot.slane %v1433_v22, 1  ;;  %v2918_v2 = vunpack.c.l.bf16 %v2837_v51 }
  0x49   : > { %v1109_v62 = vpack.c.bf16 %v1076_v59, %v1076_v59 }
  0x4b   : > { %v1206_v6 = vunpack.c.l.bf16 %v1109_v62 }
  0x4d   : > { %v1270_v12 = vadd.f32 %v4845_v7, %v1206_v6  ;;  %v2056_v6 = vperm.slane %v4805_v35, 3 }
  0x4f   : > { %v4911_v23 = vunpack.c.l.bf16 %v2056_v6 }
  0x53   : > { %4344 = vmatmul.msk.bf16.gmra.mxu0 %vm437_vm0, %v415_v9  ;;  %v397_v9 = vld [vmem:[%s4761_s28 + $0x80] sm:$0xff] }
  0x54   : > { %v421_v16 = vpack.c.bf16 %v398_v10, %v397_v9 }
  0x55   : > { %4353 = vmatmul.msk.bf16.gmra.mxu3 %vm437_vm0, %v424_v24 }
  0x63   : > { %4345 = vmatmul.msk.bf16.gmra.mxu0 %vm437_vm0, %v416_v15  ;;  %v4860_v15 = vld [vmem:[%s6399_s3] ss:$0 sm:$0xff] }
  0x65   : > { %4354 = vmatmul.msk.bf16.gmra.mxu3 %vm437_vm0, %v425_v31  ;;  %v2422_v31 = vmul.f32 %v4867_v25, %v4811_v42 }
  0x67   : > { %v2453_v48 = vpack.c.bf16 %v2422_v31, %v2422_v31 }
  0x69   : > { %v2532_v59 = vunpack.c.l.bf16 %v2453_v48 }
  0x73   : > { %4346 = vmatmul.msk.bf16.gmra.mxu0 %vm437_vm0, %v417_v21  ;;  %v1303_v21 = vpack.c.bf16 %v1270_v12, %v1270_v12 }
  0x75   : > { %4355 = vmatmul.msk.bf16.gmra.mxu3 %vm437_vm0, %v426_v47  ;;  %v4872_v29 = vunpack.c.l.bf16 %v1303_v21  ;;  %v4909_v21 = vrot.slane %v2918_v2, 2 }
  0x77   : > { %v1590_v47 = vadd.f32 %v4874_v30, %v4872_v29 }
  0x83   : > { %4347 = vmatmul.msk.bf16.gmra.mxu0 %vm437_vm0, %v418_v27  ;;  %v1686_v27 = vperm.slane %v4803_v34, 2  ;;  %v3198_v34 = vmul.f32 %v4878_v32, %v4811_v42 }
  0x85   : > { %4356 = vmatmul.msk.bf16.gmra.mxu3 %vm437_vm0, %v427_v4  ;;  %v4886_v45 = vunpack.c.l.bf16 %v1686_v27  ;;  %v3229_v52 = vpack.c.bf16 %v3198_v34, %v3198_v34 }
  0x87   : > { %v3308_v3 = vunpack.c.l.bf16 %v3229_v52 }
  0x89   : > { %v4914_v27 = vrot.slane %v3308_v3, 2 }
  0x93   : > { %4348 = vmatmul.msk.bf16.gmra.mxu0 %vm437_vm0, %v419_v40 }
  0x95   : > { %4357 = vmatmul.msk.bf16.gmra.mxu3 %vm437_vm0, %v428_v38 }
  0xa3   : > { %4349 = vmatmul.msk.bf16.gmra.mxu0 %vm437_vm0, %v420_v58  ;;  %v1638_v58 = vpack.c.bf16 %v1590_v47, %v1590_v47 }
  0xa5   : > { %v1752_v13 = vunpack.c.l.bf16 %v1638_v58 }
  0xb0   : > { %v495_v17 = vpop.f32.mrf.mxu0 }
  0xb1   : > { %v579_v19 = vmul.f32 %v4854_v11, %v495_v17 }
  0xb3   : > { %v615_v24 = vadd.f32 %v4860_v15, %v579_v19  ;;  %4350 = vmatmul.msk.bf16.gmra.mxu0 %vm437_vm0, %v421_v16  ;;  %v4906_v19 = vrot.slane %v2532_v59, 2 }
  0xb5   : > { %v647_v26 = vmax.f32 %v615_v24, 0.0 }
  0xb7   : > { %v679_v37 = vmin.f32 %v647_v26, 6.0 }
  0xb8   : > { %v497_v40 = vpop.f32.mrf.mxu0 }
  0xb9   : > { %v716_v41 = vpack.c.bf16 %v679_v37, %v679_v37  ;;  %v580_v46 = vmul.f32 %v4854_v11, %v497_v40 }
  0xbb   : > { %v753_v49 = vunpack.c.l.bf16 %v716_v41  ;;  %v616_v50 = vadd.f32 %v4860_v15, %v580_v46 }
  0xbd   : > { %v947_v53 = vmul.f32 %v4815_v44, %v753_v49  ;;  %v1339_v54 = vmul.f32 %v4837_v0, %v753_v49  ;;  %v1688_v56 = vmul.f32 %v4886_v45, %v753_v49  ;;  %v648_v60 = vmax.f32 %v616_v50, 0.0 }
  0xbe   : > { %v2802_v1 = vmul.f32 %v4870_v28, %v753_v49  ;;  %v785_v8 = vmul.f32 %v4813_v43, %v753_v49  ;;  %v2423_v18 = vmul.f32 %v4867_v25, %v753_v49 }
  0xbf   : > { %v980_v61 = vpack.c.bf16 %v947_v53, %v947_v53  ;;  %v1370_v62 = vpack.c.bf16 %v1339_v54, %v1339_v54  ;;  %v1720_v63 = vpack.c.bf16 %v1688_v56, %v1688_v56  ;;  %v680_v4 = vmin.f32 %v648_v60, 6.0 }
  0xc0   : > { %v500_v5 = vpop.f32.mrf.mxu0  ;;  %v2835_v20 = vpack.c.bf16 %v2802_v1, %v2802_v1  ;;  %v909_v24 = vpack.c.bf16 %v785_v8, %v785_v8  ;;  %v2454_v39 = vpack.c.bf16 %v2423_v18, %v2423_v18 }
  0xc1   : > { %v1044_v9 = vunpack.c.l.bf16 %v980_v61  ;;  %v4899_v10 = vunpack.c.l.bf16 %v1370_v62  ;;  %v4901_v12 = vunpack.c.l.bf16 %v1720_v63  ;;  %v717_v14 = vpack.c.bf16 %v680_v4, %v680_v4 }
  0xc2   : > { %v581_v16 = vmul.f32 %v4854_v11, %v500_v5  ;;  %v4925_v41 = vunpack.c.l.bf16 %v2835_v20  ;;  %v4933_v2 = vunpack.c.l.bf16 %v909_v24  ;;  %v4938_v6 = vunpack.c.l.bf16 %v2454_v39 }
  0xc3   : > { %v1498_v17 = vrot.slane %v4899_v10, 1  ;;  %v1864_v35 = vrot.slane %v4901_v12, 1  ;;  %v754_v22 = vunpack.c.l.bf16 %v717_v14  ;;  %v1077_v26 = vadd.f32 %v1044_v9, %v4828_v55 }
  0xc4   : > { %v617_v31 = vadd.f32 %v4860_v15, %v581_v16  ;;  %v6414_v18 = vrot.slane %v4925_v41, 2 }
  0xc5   : > { %v1593_v33 = vadd.f32 %v1498_v17, %v4872_v29  ;;  %v948_v36 = vmul.f32 %v4815_v44, %v754_v22  ;;  %v1340_v37 = vmul.f32 %v4837_v0, %v754_v22  ;;  %v1689_v38 = vmul.f32 %v4886_v45, %v754_v22 }
  0xc6   : > { %v786_v34 = vmul.f32 %v4813_v43, %v754_v22  ;;  %v2424_v40 = vmul.f32 %v4867_v25, %v754_v22  ;;  %v1960_v46 = vadd.f32 %v1864_v35, %v1752_v13  ;;  %v1110_v51 = vpack.c.bf16 %v1077_v26, %v1077_v26 }
  0xc7   : > { %v981_v47 = vpack.c.bf16 %v948_v36, %v948_v36  ;;  %v1371_v48 = vpack.c.bf16 %v1340_v37, %v1340_v37  ;;  %v1721_v49 = vpack.c.bf16 %v1689_v38, %v1689_v38  ;;  %v2803_v53 = vmul.f32 %v4870_v28, %v754_v22 }
  0xc8   : > { %v502_v50 = vpop.f32.mrf.mxu0  ;;  %v2455_v52 = vpack.c.bf16 %v2424_v40, %v2424_v40  ;;  %v649_v54 = vmax.f32 %v617_v31, 0.0  ;;  %v1641_v56 = vpack.c.bf16 %v1593_v33, %v1593_v33  ;;  %v910_v61 = vpack.c.bf16 %v786_v34, %v786_v34 }
  0xc9   : > { %v1045_v58 = vunpack.c.l.bf16 %v981_v47  ;;  %v4928_v59 = vunpack.c.l.bf16 %v1371_v48  ;;  %v4930_v60 = vunpack.c.l.bf16 %v1721_v49  ;;  %v2836_v62 = vpack.c.bf16 %v2803_v53, %v2803_v53 }
  0xca   : > { %v681_v63 = vmin.f32 %v649_v54, 6.0  ;;  %v582_v1 = vmul.f32 %v4854_v11, %v502_v50  ;;  %v2008_v3 = vpack.c.bf16 %v1960_v46, %v1960_v46  ;;  %v4936_v5 = vunpack.c.l.bf16 %v2455_v52 }
  0xcb   : > { %v1078_v4 = vadd.f32 %v1045_v58, %v4828_v55  ;;  %v2917_v8 = vunpack.c.l.bf16 %v2836_v62  ;;  %v1207_v13 = vunpack.c.l.bf16 %v1110_v51  ;;  %v6412_v14 = vrot.slane %v4928_v59, 1 }
  0xcc   : > { %v718_v9 = vpack.c.bf16 %v681_v63, %v681_v63  ;;  %v618_v12 = vadd.f32 %v4860_v15, %v582_v1  ;;  %v6413_v16 = vrot.slane %v4930_v60, 1  ;;  %v4944_v20 = vunpack.c.l.bf16 %v1641_v56 }
  0xcd   : > { %v4946_v22 = vunpack.c.l.bf16 %v910_v61  ;;  %v1111_v26 = vpack.c.bf16 %v1078_v4, %v1078_v4  ;;  %v2598_v31 = vrot.slane %v4936_v5, 2  ;;  %v2983_v33 = vrot.slane %v2917_v8, 2 }
  0xce   : > { %v4948_v55 = vunpack.c.l.bf16 %v718_v9  ;;  %v650_v24 = vmax.f32 %v618_v12, 0.0  ;;  %v2120_v37 = vunpack.c.l.bf16 %v2008_v3  ;;  %v4961_v46 = vsel %vm1495_vm1, %v1498_v17, %v6412_v14 }
  0xcf   : > { %v4966_v47 = vsel %vm1495_vm1, %v1864_v35, %v6413_v16  ;;  %v1208_v10 = vunpack.c.l.bf16 %v1111_v26  ;;  %v4976_v17 = vsel %vm2594_vm2, %v6414_v18, %v2983_v33  ;;  %v6411_v35 = vrot.slane %v4938_v6, 2 }
  0xd0   : > { %v505_v36 = vpop.f32.mrf.mxu0  ;;  %v682_v38 = vmin.f32 %v650_v24, 6.0  ;;  %v1145_v34 = vmul.f32 %v4830_v57, %v4948_v55  ;;  %v2058_v40 = vmul.f32 %v4911_v23, %v4948_v55  ;;  %v3196_v48 = vmul.f32 %v4878_v32, %v4948_v55 }
  0xd1   : > { %v583_v39 = vmul.f32 %v4854_v11, %v505_v36  ;;  %v949_v49 = vmul.f32 %v4815_v44, %v4948_v55  ;;  %v4983_v63 = vsel %vm2594_vm2, %v2983_v33, %v4909_v21  ;;  %v4987_v3 = vmul.f32 %v4886_v45, %v4948_v55 }
  0xd2   : > { %v719_v50 = vpack.c.bf16 %v682_v38, %v682_v38  ;;  %v1176_v52 = vpack.c.bf16 %v1145_v34, %v1145_v34  ;;  %v2089_v53 = vpack.c.bf16 %v2058_v40, %v2058_v40  ;;  %v3227_v1 = vpack.c.bf16 %v3196_v48, %v3196_v48 }
  0xd3   : > { %v619_v51 = vadd.f32 %v4860_v15, %v583_v39  ;;  %v982_v54 = vpack.c.bf16 %v949_v49, %v949_v49  ;;  %v4994_v4 = vsel %vm2594_vm2, %v6411_v35, %v2598_v31  ;;  %v540_v35 = vpop.f32.mrf.mxu3 }
  0xd4   : > { %v4979_v56 = vunpack.c.l.bf16 %v719_v50  ;;  %v1240_v61 = vunpack.c.l.bf16 %v1176_v52  ;;  %v2168_v62 = vunpack.c.l.bf16 %v2089_v53 }
  0xd5   : > { %v651_v58 = vmax.f32 %v619_v51, 0.0  ;;  %v1046_v39 = vunpack.c.l.bf16 %v982_v54 }
  0xd6   : > { %v1146_v9 = vmul.f32 %v4830_v57, %v4979_v56  ;;  %v1271_v12 = vadd.f32 %v1240_v61, %v1207_v13  ;;  %v2059_v24 = vmul.f32 %v4911_v23, %v4979_v56  ;;  %v2230_v33 = vrot.slane %v2168_v62, 1 }
  0xd7   : > { %v683_v8 = vmin.f32 %v651_v58, 6.0  ;;  %v3197_v36 = vmul.f32 %v4878_v32, %v4979_v56  ;;  %v950_v38 = vmul.f32 %v4815_v44, %v4979_v56  ;;  %v5006_v62 = vunpack.c.l.bf16 %v3227_v1 }
  0xd8   : > { %v507_v26 = vpop.f32.mrf.mxu0  ;;  %v1177_v48 = vpack.c.bf16 %v1146_v9, %v1146_v9  ;;  %v1304_v49 = vpack.c.bf16 %v1271_v12, %v1271_v12  ;;  %v2090_v50 = vpack.c.bf16 %v2059_v24, %v2059_v24  ;;  %v2324_v51 = vadd.f32 %v2230_v33, %v2120_v37 }
  0xd9   : > { %v720_v34 = vpack.c.bf16 %v683_v8, %v683_v8  ;;  %v584_v40 = vmul.f32 %v4854_v11, %v507_v26  ;;  %v3228_v13 = vpack.c.bf16 %v3197_v36, %v3197_v36  ;;  %v983_v52 = vpack.c.bf16 %v950_v38, %v950_v38 }
  0xda   : > { %v1241_v58 = vunpack.c.l.bf16 %v1177_v48  ;;  %v1401_v61 = vunpack.c.l.bf16 %v1304_v49  ;;  %v5008_v14 = vunpack.c.l.bf16 %v2090_v50  ;;  %v2372_v16 = vpack.c.bf16 %v2324_v51, %v2324_v51 }
  0xdb   : > { %v620_v53 = vadd.f32 %v4860_v15, %v584_v40  ;;  %v3307_v54 = vunpack.c.l.bf16 %v3228_v13  ;;  %v1047_v8 = vunpack.c.l.bf16 %v983_v52  ;;  %v1722_v37 = vpack.c.bf16 %v4987_v3, %v4987_v3 }
  0xdc   : > { %v1272_v26 = vadd.f32 %v1241_v58, %v1208_v10  ;;  %v1591_v9 = vadd.f32 %v4874_v30, %v1401_v61  ;;  %v5013_v12 = vunpack.c.l.bf16 %v720_v34  ;;  %v2231_v24 = vrot.slane %v5008_v14, 1 }
  0xdd   : > { %v652_v18 = vmax.f32 %v620_v53, 0.0  ;;  %v2484_v36 = vunpack.c.l.bf16 %v2372_v16  ;;  %v1079_v1 = vadd.f32 %v1046_v39, %v4933_v2  ;;  %v5021_v10 = vsel %vm2594_vm2, %v2598_v31, %v4906_v19 }
  0xde   : > { %v1305_v40 = vpack.c.bf16 %v1272_v26, %v1272_v26  ;;  %v1639_v48 = vpack.c.bf16 %v1591_v9, %v1591_v9  ;;  %v3368_v34 = vrot.slane %v5006_v62, 2  ;;  %v3369_v51 = vrot.slane %v3307_v54, 2  ;;  %v542_v54 = vpop.f32.mrf.mxu3 }
  0xdf   : > { %v684_v38 = vmin.f32 %v652_v18, 6.0  ;;  %v2704_v50 = vadd.f32 %v4906_v19, %v2484_v36  ;;  %v1080_v13 = vadd.f32 %v1047_v8, %v4946_v22  ;;  %v2232_v5 = vsel %vm1495_vm1, %v2230_v33, %v2231_v24 }
  0xe0   : > { %v510_v49 = vpop.f32.mrf.mxu0  ;;  %v1402_v18 = vunpack.c.l.bf16 %v1305_v40  ;;  %v1753_v39 = vunpack.c.l.bf16 %v1639_v48  ;;  %v1112_v31 = vpack.c.bf16 %v1079_v1, %v1079_v1  ;;  %v1147_v53 = vmul.f32 %v4830_v57, %v5013_v12 }
  0xe1   : > { %v721_v16 = vpack.c.bf16 %v684_v38, %v684_v38  ;;  %v585_v2 = vmul.f32 %v4854_v11, %v510_v49  ;;  %v2752_v52 = vpack.c.bf16 %v2704_v50, %v2704_v50  ;;  %v597_v22 = vmul.f32 %v4854_v11, %v540_v35  ;;  %v4400_v38 = vld [vmem:[%s6403_s7 + $0x18] sm:$0xff] }
  0xe2   : > { %v1592_v62 = vadd.f32 %v4874_v30, %v1402_v18  ;;  %v1961_v8 = vadd.f32 %v4966_v47, %v1753_v39  ;;  %v1113_v9 = vpack.c.bf16 %v1080_v13, %v1080_v13  ;;  %v1178_v36 = vpack.c.bf16 %v1147_v53, %v1147_v53  ;;  %4019 = vmatpush.bf16.msra.mxu1 %v4400_v38 }
  0xe3   : > { %v5032_v58 = vunpack.c.l.bf16 %v721_v16  ;;  %v621_v61 = vadd.f32 %v4860_v15, %v585_v2  ;;  %v2868_v26 = vunpack.c.l.bf16 %v2752_v52  ;;  %v633_v1 = vadd.f32 %v4860_v15, %v597_v22  ;;  %4403 = vmatpush.bf16.msra.mxu2 %v4400_v38 }
  0xe4   : > { %v1640_v40 = vpack.c.bf16 %v1592_v62, %v1592_v62  ;;  %v2009_v35 = vpack.c.bf16 %v1961_v8, %v1961_v8  ;;  %v6447_v30 = vrot.slane %v4925_v41, 2  ;;  %v1209_v50 = vunpack.c.l.bf16 %v1112_v31  ;;  %v4399_v62 = vld [vmem:[%s6403_s7 + $0x10] sm:$0xff] }
  0xe5   : > { %v653_v33 = vmax.f32 %v621_v61, 0.0  ;;  %v1148_v48 = vmul.f32 %v4830_v57, %v5032_v58  ;;  %v1242_v47 = vunpack.c.l.bf16 %v1178_v36  ;;  %v665_v16 = vmax.f32 %v633_v1, 0.0 }
  0xe6   : > { %v3095_v49 = vadd.f32 %v6447_v30, %v2868_v26  ;;  %v1754_v13 = vunpack.c.l.bf16 %v1640_v40  ;;  %v5047_v2 = vsel %vm2594_vm2, %v3368_v34, %v3369_v51  ;;  %v2121_v52 = vunpack.c.l.bf16 %v2009_v35  ;;  %4020 = vmatpush.bf16.msra.mxu1 %v4399_v62 }
  0xe7   : > { %v1179_v18 = vpack.c.bf16 %v1148_v48, %v1148_v48  ;;  %v5051_v61 = vsel %vm2594_vm2, %v3369_v51, %v4914_v27  ;;  %v1273_v22 = vadd.f32 %v1242_v47, %v1209_v50  ;;  %v685_v41 = vmin.f32 %v653_v33, 6.0  ;;  %4404 = vmatpush.bf16.msra.mxu2 %v4399_v62 }
  0xe8   : > { %v512_v39 = vpop.f32.mrf.mxu0  ;;  %v3143_v53 = vpack.c.bf16 %v3095_v49, %v3095_v49  ;;  %v6448_v8 = vrot.slane %v4930_v60, 1  ;;  %v1210_v36 = vunpack.c.l.bf16 %v1113_v9  ;;  %v2325_v1 = vadd.f32 %v2232_v5, %v2121_v52  ;;  %v545_v49 = vpop.f32.mrf.mxu3 }
  0xe9   : > { %v586_v31 = vmul.f32 %v4854_v11, %v512_v39  ;;  %v1243_v40 = vunpack.c.l.bf16 %v1179_v18  ;;  %v1306_v48 = vpack.c.bf16 %v1273_v22, %v1273_v22  ;;  %v697_v51 = vmin.f32 %v665_v16, 6.0  ;;  %v4398_v16 = vld [vmem:[%s6403_s7 + $0x8] sm:$0xff] }
  0xea   : > { %v1962_v26 = vadd.f32 %v6448_v8, %v1754_v13  ;;  %v3258_v38 = vunpack.c.l.bf16 %v3143_v53  ;;  %v598_v30 = vmul.f32 %v4854_v11, %v542_v54  ;;  %v1691_v33 = vmul.f32 %v4886_v45, %v4979_v56  ;;  %4021 = vmatpush.bf16.msra.mxu1 %v4398_v16 }
  0xeb   : > { %v622_v35 = vadd.f32 %v4860_v15, %v586_v31  ;;  %v2373_v47 = vpack.c.bf16 %v2325_v1, %v2325_v1  ;;  %v1274_v13 = vadd.f32 %v1243_v40, %v1210_v36  ;;  %v722_v9 = vpack.c.bf16 %v685_v41, %v685_v41  ;;  %4405 = vmatpush.bf16.msra.mxu2 %v4398_v16 }
  0xec   : > { %v2010_v50 = vpack.c.bf16 %v1962_v26, %v1962_v26  ;;  %v3477_v60 = vadd.f32 %v3368_v34, %v3258_v38  ;;  %v634_v18 = vadd.f32 %v4860_v15, %v598_v30  ;;  %v1403_v39 = vunpack.c.l.bf16 %v1306_v48 }
  0xed   : > { %v654_v5 = vmax.f32 %v622_v35, 0.0  ;;  %v2485_v52 = vunpack.c.l.bf16 %v2373_v47  ;;  %v1307_v22 = vpack.c.bf16 %v1274_v13, %v1274_v13  ;;  %v734_v62 = vpack.c.bf16 %v697_v51, %v697_v51 }
  0xee   : > { %v2122_v54 = vunpack.c.l.bf16 %v2010_v50  ;;  %v3525_v53 = vpack.c.bf16 %v3477_v60, %v3477_v60  ;;  %v666_v8 = vmax.f32 %v634_v18, 0.0  ;;  %v1594_v34 = vadd.f32 %v4961_v46, %v1403_v39  ;;  %v4397_v46 = vld [vmem:[%s6403_s7] sm:$0xff] }
  0xef   : > { %v686_v31 = vmin.f32 %v654_v5, 6.0  ;;  %v2705_v36 = vadd.f32 %v4906_v19, %v2485_v52  ;;  %v1404_v38 = vunpack.c.l.bf16 %v1307_v22  ;;  %v5073_v40 = vunpack.c.l.bf16 %v722_v9  ;;  %4022 = vmatpush.bf16.msra.mxu1 %v4397_v46  ;;  %4406 = vmatpush.bf16.msra.mxu2 %v4397_v46 }
  0xf0   : > { %v515_v41 = vpop.f32.mrf.mxu0  ;;  %v2326_v26 = vadd.f32 %v2231_v24, %v2122_v54  ;;  %v5071_v1 = vunpack.c.l.bf16 %v3525_v53  ;;  %v698_v51 = vmin.f32 %v666_v8, 6.0  ;;  %v6449_v14 = vrot.slane %v4928_v59, 1  ;;  %v547_v18 = vpop.f32.mrf.mxu3 }
  0xf1   : > { %v723_v48 = vpack.c.bf16 %v686_v31, %v686_v31  ;;  %v587_v35 = vmul.f32 %v4854_v11, %v515_v41  ;;  %v2753_v50 = vpack.c.bf16 %v2705_v36, %v2705_v36  ;;  %v1642_v47 = vpack.c.bf16 %v1594_v34, %v1594_v34 }
  0xf2   : > { %v2374_v30 = vpack.c.bf16 %v2326_v26, %v2326_v26  ;;  %v1595_v24 = vadd.f32 %v6449_v14, %v1404_v38  ;;  %v5082_v13 = vunpack.c.l.bf16 %v734_v62  ;;  %v599_v9 = vmul.f32 %v4854_v11, %v545_v49 }
  0xf3   : > { %v623_v60 = vadd.f32 %v4860_v15, %v587_v35  ;;  %v1723_v5 = vpack.c.bf16 %v1691_v33, %v1691_v33  ;;  %v2869_v39 = vunpack.c.l.bf16 %v2753_v50  ;;  %v3670_v54 = vrot.slane %v5071_v1, 7 }
  0xf4   : > { %6450 = vst [vmem:[#allocation13_spill] sm:$0xff] %v5082_v13  ;;  %v2486_v16 = vunpack.c.l.bf16 %v2374_v30  ;;  %v1643_v52 = vpack.c.bf16 %v1595_v24, %v1595_v24  ;;  %v735_v22 = vpack.c.bf16 %v698_v51, %v698_v51  ;;  %v635_v59 = vadd.f32 %v4860_v15, %v599_v9 }
  0xf5   : > { %v655_v53 = vmax.f32 %v623_v60, 0.0  ;;  %v1802_v31 = vunpack.c.l.bf16 %v1722_v37  ;;  %v5090_v62 = vunpack.c.l.bf16 %v723_v48  ;;  %v3096_v33 = vadd.f32 %v4976_v17, %v2869_v39 }
  0xf6   : > { %v2706_v49 = vadd.f32 %v4906_v19, %v2486_v16  ;;  %v1756_v8 = vunpack.c.l.bf16 %v1642_v47  ;;  %v667_v41 = vmax.f32 %v635_v59, 0.0  ;;  %v1803_v26 = vunpack.c.l.bf16 %v1723_v5 }
  0xf7   : > { %v687_v34 = vmin.f32 %v655_v53, 6.0  ;;  %v1867_v36 = vrot.slane %v1802_v31, 1  ;;  %v3144_v51 = vpack.c.bf16 %v3096_v33, %v3096_v33  ;;  %v1757_v46 = vunpack.c.l.bf16 %v1643_v52 }
  0xf8   : > { %v517_v38 = vpop.f32.mrf.mxu0  ;;  %v2754_v35 = vpack.c.bf16 %v2706_v49, %v2706_v49  ;;  %v2060_v30 = vmul.f32 %v4911_v23, %v5013_v12  ;;  %v5097_v37 = vunpack.c.l.bf16 %v735_v22  ;;  %v699_v48 = vmin.f32 %v667_v41, 6.0  ;;  %v550_v49 = vpop.f32.mrf.mxu3 }
  0xf9   : > { %v588_v3 = vmul.f32 %v4854_v11, %v517_v38  ;;  %v1868_v50 = vrot.slane %v1803_v26, 1  ;;  %v3259_v14 = vunpack.c.l.bf16 %v3144_v51  ;;  %v1963_v24 = vadd.f32 %v1867_v36, %v4944_v20 }
  0xfa   : > { %6451 = vst [vmem:[#allocation14_spill] sm:$0xff] %v5097_v37  ;;  %v2870_v17 = vunpack.c.l.bf16 %v2754_v35  ;;  %v2061_v47 = vmul.f32 %v4911_v23, %v5032_v58  ;;  %v724_v60 = vpack.c.bf16 %v687_v34, %v687_v34  ;;  %v600_v5 = vmul.f32 %v4854_v11, %v547_v18 }
  0xfb   : > { %v624_v9 = vadd.f32 %v4860_v15, %v588_v3  ;;  %v2091_v16 = vpack.c.bf16 %v2060_v30, %v2060_v30  ;;  %v3478_v52 = vadd.f32 %v5047_v2, %v3259_v14  ;;  %v1869_v53 = vsel %vm1495_vm1, %v1867_v36, %v1868_v50 }
  0xfc   : > { %v3097_v39 = vadd.f32 %v4983_v63, %v2870_v17  ;;  %v1965_v22 = vadd.f32 %v1868_v50, %v1757_v46  ;;  %v736_v31 = vpack.c.bf16 %v699_v48, %v699_v48  ;;  %v636_v20 = vadd.f32 %v4860_v15, %v600_v5 }
  0xfd   : > { %v656_v59 = vmax.f32 %v624_v9, 0.0  ;;  %v1964_v33 = vadd.f32 %v1869_v53, %v1756_v8  ;;  %v3526_v34 = vpack.c.bf16 %v3478_v52, %v3478_v52  ;;  %v2011_v26 = vpack.c.bf16 %v1963_v24, %v1963_v24  ;;  %v5116_v8 = vld [vmem:[%s6401_s5] ss:$0 sm:$0xff] }
  0xfe   : > { %v3145_v41 = vpack.c.bf16 %v3097_v39, %v3097_v39  ;;  %v2092_v38 = vpack.c.bf16 %v2061_v47, %v2061_v47  ;;  %v5108_v35 = vunpack.c.l.bf16 %v724_v60  ;;  %v668_v51 = vmax.f32 %v636_v20, 0.0 }
  0xff   : > { %v688_v18 = vmin.f32 %v656_v59, 6.0  ;;  %v2012_v63 = vpack.c.bf16 %v1964_v33, %v1964_v33  ;;  %v3574_v3 = vunpack.c.l.bf16 %v3526_v34  ;;  %v2013_v36 = vpack.c.bf16 %v1965_v22, %v1965_v22 }
 0x100   : > { %v520_v30 = vpop.f32.mrf.mxu0  ;;  %v3260_v2 = vunpack.c.l.bf16 %v3145_v41  ;;  %v2170_v46 = vunpack.c.l.bf16 %v2091_v16  ;;  %v5111_v50 = vunpack.c.l.bf16 %v736_v31  ;;  %v700_v17 = vmin.f32 %v668_v51, 6.0  ;;  %v5123_v16 = vld [vmem:[%s6402_s6] ss:$0 sm:$0xff] }
 0x101   : > { %v589_v48 = vmul.f32 %v4854_v11, %v520_v30  ;;  %v2123_v14 = vunpack.c.l.bf16 %v2011_v26  ;;  %v725_v24 = vpack.c.bf16 %v688_v18, %v688_v18  ;;  %v3671_v60 = vrot.slane %v3574_v3, 7  ;;  %v552_v26 = vpop.f32.mrf.mxu3 }
 0x102   : > { %6452 = vst [vmem:[#allocation15_spill] sm:$0xff] %v5111_v50  ;;  %v3479_v47 = vadd.f32 %v5051_v61, %v3260_v2  ;;  %v2171_v9 = vunpack.c.l.bf16 %v2092_v38  ;;  %v601_v39 = vmul.f32 %v4854_v11, %v550_v49  ;;  %v2124_v52 = vunpack.c.l.bf16 %v2012_v63 }
 0x103   : > { %v625_v5 = vadd.f32 %v4860_v15, %v589_v48  ;;  %v2125_v53 = vunpack.c.l.bf16 %v2013_v36  ;;  %v3672_v59 = vsel %vm3669_vm3, %v3670_v54, %v3671_v60  ;;  %v2233_v31 = vrot.slane %v2170_v46, 1 }
 0x104   : > { %v3527_v22 = vpack.c.bf16 %v3479_v47, %v3479_v47  ;;  %v2234_v61 = vrot.slane %v2171_v9, 1  ;;  %v737_v33 = vpack.c.bf16 %v700_v17, %v700_v17  ;;  %v3786_v41 = vmul.f32 %v5116_v8, %v3672_v59 }
 0x105   : > { %v657_v20 = vmax.f32 %v625_v5, 0.0  ;;  %v637_v34 = vadd.f32 %v4860_v15, %v601_v39  ;;  %v602_v18 = vmul.f32 %v4854_v11, %v552_v26  ;;  %v2327_v51 = vadd.f32 %v2233_v31, %v2123_v14 }
 0x106   : > { %v3575_v38 = vunpack.c.l.bf16 %v3527_v22  ;;  %v2235_v49 = vsel %vm1495_vm1, %v2233_v31, %v2234_v61  ;;  %v3822_v1 = vadd.f32 %v5123_v16, %v3786_v41  ;;  %v2329_v46 = vadd.f32 %v2234_v61, %v2125_v53 }
 0x107   : > { %v689_v63 = vmin.f32 %v657_v20, 6.0  ;;  %v669_v30 = vmax.f32 %v637_v34, 0.0  ;;  %v2328_v54 = vadd.f32 %v2235_v49, %v2124_v52  ;;  %v638_v36 = vadd.f32 %v4860_v15, %v602_v18 }
 0x108   : > { %v522_v2 = vpop.f32.mrf.mxu0  ;;  %v3673_v3 = vrot.slane %v3575_v38, 7  ;;  %v2375_v48 = vpack.c.bf16 %v2327_v51, %v2327_v51  ;;  %v5135_v17 = vunpack.c.l.bf16 %v725_v24  ;;  %v2377_v59 = vpack.c.bf16 %v2329_v46, %v2329_v46 }
 0x109   : > { %v726_v47 = vpack.c.bf16 %v689_v63, %v689_v63  ;;  %v590_v9 = vmul.f32 %v4854_v11, %v522_v2  ;;  %v701_v5 = vmin.f32 %v669_v30, 6.0  ;;  %v670_v14 = vmax.f32 %v638_v36, 0.0 }
 0x10a   : > { %v3674_v39 = vsel %vm3669_vm3, %v3671_v60, %v3673_v3  ;;  %v2376_v22 = vpack.c.bf16 %v2328_v54, %v2328_v54  ;;  %v5140_v31 = vunpack.c.l.bf16 %v737_v33  ;;  %v3854_v53 = vmax.f32 %v3822_v1, 0.0 }
 0x10b   : > { %v626_v52 = vadd.f32 %v4860_v15, %v590_v9  ;;  %v3787_v20 = vmul.f32 %v5116_v8, %v3674_v39  ;;  %v738_v61 = vpack.c.bf16 %v701_v5, %v701_v5  ;;  %v702_v24 = vmin.f32 %v670_v14, 6.0 }
 0x10c   : > { %6453 = vst [vmem:[#allocation16_spill] sm:$0xff] %v5140_v31  ;;  %v2487_v41 = vunpack.c.l.bf16 %v2375_v48  ;;  %v2488_v34 = vunpack.c.l.bf16 %v2376_v22  ;;  %v2489_v18 = vunpack.c.l.bf16 %v2377_v59  ;;  %v2805_v60 = vmul.f32 %v4870_v28, %v4948_v55 }
 0x10d   : > { %v658_v26 = vmax.f32 %v626_v52, 0.0  ;;  %v3823_v38 = vadd.f32 %v5123_v16, %v3787_v20  ;;  %v5146_v49 = vunpack.c.l.bf16 %v726_v47  ;;  %v739_v51 = vpack.c.bf16 %v702_v24, %v702_v24 }
 0x10e   : > { %v6454_v33 = vrot.slane %v4938_v6, 2  ;;  %v2708_v30 = vadd.f32 %v4994_v4, %v2488_v34  ;;  %v2709_v2 = vadd.f32 %v5021_v10, %v2489_v18  ;;  %v2806_v3 = vmul.f32 %v4870_v28, %v4979_v56 }
 0x10f   : > { %v690_v1 = vmin.f32 %v658_v26, 6.0  ;;  %v3855_v54 = vmax.f32 %v3823_v38, 0.0  ;;  %v3886_v46 = vmin.f32 %v3854_v53, 6.0  ;;  %v2838_v5 = vpack.c.bf16 %v2805_v60, %v2805_v60  ;;  %v555_v53 = vpop.f32.mrf.mxu3 }
 0x110   : > { %v2707_v63 = vadd.f32 %v6454_v33, %v2487_v41  ;;  %v525_v36 = vpop.f32.mrf.mxu0  ;;  %v2756_v9 = vpack.c.bf16 %v2708_v30, %v2708_v30  ;;  %v5155_v14 = vunpack.c.l.bf16 %v738_v61  ;;  %v2757_v6 = vpack.c.bf16 %v2709_v2, %v2709_v2 }
 0x111   : > { %v591_v47 = vmul.f32 %v4854_v11, %v525_v36  ;;  %v3887_v39 = vmin.f32 %v3855_v54, 6.0  ;;  %v5157_v22 = vunpack.c.l.bf16 %v739_v51  ;;  %v2839_v4 = vpack.c.bf16 %v2806_v3, %v2806_v3 }
 0x112   : > { %v2755_v48 = vpack.c.bf16 %v2707_v63, %v2707_v63  ;;  %6455 = vst [vmem:[#allocation17_spill] sm:$0xff] %v5155_v14  ;;  %v2919_v52 = vunpack.c.l.bf16 %v2838_v5  ;;  %v727_v10 = vpack.c.bf16 %v690_v1, %v690_v1  ;;  %v2872_v41 = vunpack.c.l.bf16 %v2756_v9 }
 0x113   : > { %6456 = vst [vmem:[#allocation18_spill] sm:$0xff] %v5157_v22  ;;  %v627_v20 = vadd.f32 %v4860_v15, %v591_v47  ;;  %v3918_v24 = vpack.c.bf16 %v3887_v39, %v3886_v46  ;;  %v2920_v34 = vunpack.c.l.bf16 %v2839_v4  ;;  %v3199_v38 = vmul.f32 %v4878_v32, %v5013_v12 }
 0x114   : > { %v2871_v59 = vunpack.c.l.bf16 %v2755_v48  ;;  %v2987_v26 = vrot.slane %v2919_v52, 2  ;;  %v3200_v61 = vmul.f32 %v4878_v32, %v5032_v58  ;;  %v2873_v60 = vunpack.c.l.bf16 %v2757_v6 }
 0x115   : > { %v659_v18 = vmax.f32 %v627_v20, 0.0  ;;  %4374 = vmatmul.msk.bf16.vlgmr.msra.gmra.mxu1 %vm3966_vm4, %v3918_v24  ;;  %v603_v51 = vmul.f32 %v4854_v11, %v555_v53  ;;  %v787_v33 = vmul.f32 %v4813_v43, %v4948_v55  ;;  %v2988_v63 = vrot.slane %v2920_v34, 2 }
 0x116   : > { %v3098_v30 = vadd.f32 %v2987_v26, %v2871_v59  ;;  %v3230_v1 = vpack.c.bf16 %v3199_v38, %v3199_v38  ;;  %v3231_v54 = vpack.c.bf16 %v3200_v61, %v3200_v61  ;;  %v5168_v2 = vunpack.c.l.bf16 %v727_v10 }
 0x117   : > { %v691_v3 = vmin.f32 %v659_v18, 6.0  ;;  %v639_v36 = vadd.f32 %v4860_v15, %v603_v51  ;;  %v788_v46 = vmul.f32 %v4813_v43, %v4979_v56  ;;  %v2989_v9 = vsel %vm2594_vm2, %v2987_v26, %v2988_v63  ;;  %v557_v26 = vpop.f32.mrf.mxu3 }
 0x118   : > { %v527_v48 = vpop.f32.mrf.mxu0  ;;  %v2990_v5 = vsel %vm2594_vm2, %v2988_v63, %v4909_v21  ;;  %v3146_v47 = vpack.c.bf16 %v3098_v30, %v3098_v30  ;;  %v3309_v39 = vunpack.c.l.bf16 %v3230_v1  ;;  %v3099_v4 = vadd.f32 %v2989_v9, %v2872_v41 }
 0x119   : > { %v592_v6 = vmul.f32 %v4854_v11, %v527_v48  ;;  %v3100_v59 = vadd.f32 %v2990_v5, %v2873_v60  ;;  %v911_v52 = vpack.c.bf16 %v787_v33, %v787_v33  ;;  %v3310_v20 = vunpack.c.l.bf16 %v3231_v54 }
 0x11a   : > { %v3261_v10 = vunpack.c.l.bf16 %v3146_v47  ;;  %v3373_v24 = vrot.slane %v3309_v39, 2  ;;  %v671_v53 = vmax.f32 %v639_v36, 0.0  ;;  %v728_v34 = vpack.c.bf16 %v691_v3, %v691_v3 }
 0x11b   : > { %v628_v38 = vadd.f32 %v4860_v15, %v592_v6  ;;  %v3147_v61 = vpack.c.bf16 %v3099_v4, %v3099_v4  ;;  %v3148_v18 = vpack.c.bf16 %v3100_v59, %v3100_v59  ;;  %v3374_v51 = vrot.slane %v3310_v20, 2 }
 0x11c   : > { %v3480_v42 = vadd.f32 %v3373_v24, %v3261_v10  ;;  %v703_v63 = vmin.f32 %v671_v53, 6.0  ;;  %v604_v30 = vmul.f32 %v4854_v11, %v557_v26  ;;  %v951_v60 = vmul.f32 %v4815_v44, %v5013_v12 }
 0x11d   : > { %v660_v1 = vmax.f32 %v628_v38, 0.0  ;;  %v3262_v48 = vunpack.c.l.bf16 %v3147_v61  ;;  %v3263_v41 = vunpack.c.l.bf16 %v3148_v18  ;;  %v3375_v33 = vsel %vm2594_vm2, %v3373_v24, %v3374_v51 }
 0x11e   : > { %v3376_v54 = vsel %vm2594_vm2, %v3374_v51, %v4914_v27  ;;  %v3528_v3 = vpack.c.bf16 %v3480_v42, %v3480_v42  ;;  %v912_v36 = vpack.c.bf16 %v788_v46, %v788_v46  ;;  %v640_v39 = vadd.f32 %v4860_v15, %v604_v30 }
 0x11f   : > { %v692_v9 = vmin.f32 %v660_v1, 6.0  ;;  %v3481_v5 = vadd.f32 %v3375_v33, %v3262_v48  ;;  %v3482_v47 = vadd.f32 %v3376_v54, %v3263_v41  ;;  %v5185_v6 = vunpack.c.l.bf16 %v728_v34 }
 0x120   : > { %v530_v4 = vpop.f32.mrf.mxu0  ;;  %v3576_v59 = vunpack.c.l.bf16 %v3528_v3  ;;  %v952_v10 = vmul.f32 %v4815_v44, %v5032_v58  ;;  %v984_v20 = vpack.c.bf16 %v951_v60, %v951_v60  ;;  %v740_v61 = vpack.c.bf16 %v703_v63, %v703_v63 }
 0x121   : > { %v593_v24 = vmul.f32 %v4854_v11, %v530_v4  ;;  %v3529_v53 = vpack.c.bf16 %v3481_v5, %v3481_v5  ;;  %v3530_v38 = vpack.c.bf16 %v3482_v47, %v3482_v47  ;;  %v729_v42 = vpack.c.bf16 %v692_v9, %v692_v9 }
 0x122   : > { %v3675_v46 = vrot.slane %v3576_v59, 7  ;;  %v672_v18 = vmax.f32 %v640_v39, 0.0  ;;  %v985_v26 = vpack.c.bf16 %v952_v10, %v952_v10  ;;  %v1015_v1 = vunpack.c.l.bf16 %v911_v52 }
 0x123   : > { %v629_v51 = vadd.f32 %v4860_v15, %v593_v24  ;;  %v3577_v30 = vunpack.c.l.bf16 %v3529_v53  ;;  %v3578_v34 = vunpack.c.l.bf16 %v3530_v38  ;;  %v1016_v41 = vunpack.c.l.bf16 %v912_v36 }
 0x124   : > { %v704_v48 = vmin.f32 %v672_v18, 6.0  ;;  %v1048_v33 = vunpack.c.l.bf16 %v984_v20  ;;  %v1049_v54 = vunpack.c.l.bf16 %v985_v26  ;;  %v1149_v5 = vmul.f32 %v4830_v57, %v5073_v40 }
 0x125   : > { %v661_v3 = vmax.f32 %v629_v51, 0.0  ;;  %v3676_v60 = vrot.slane %v3577_v30, 7  ;;  %v3678_v22 = vrot.slane %v3578_v34, 7  ;;  %v5193_v63 = vunpack.c.l.bf16 %v740_v61 }
 0x126   : > { %v1081_v9 = vadd.f32 %v1048_v33, %v1015_v1  ;;  %v1082_v47 = vadd.f32 %v1049_v54, %v1016_v41  ;;  %v1150_v15 = vmul.f32 %v4830_v57, %v5090_v62  ;;  %v741_v36 = vpack.c.bf16 %v704_v48, %v704_v48 }
 0x127   : > { %6457 = vst [vmem:[#allocation19_spill] sm:$0xff] %v5193_v63  ;;  %v3677_v39 = vsel %vm3669_vm3, %v3675_v46, %v3676_v60  ;;  %v3679_v52 = vsel %vm3669_vm3, %v3676_v60, %v3678_v22  ;;  %v1180_v4 = vpack.c.bf16 %v1149_v5, %v1149_v5  ;;  %v5199_v59 = vunpack.c.l.bf16 %v729_v42  ;;  %v5211_v42 = vld [vmem:[%s6399_s3] ss:$0 sm:$0xff] }
 0x128   : > { %v3788_v10 = vmul.f32 %v5116_v8, %v3677_v39  ;;  %v3789_v20 = vmul.f32 %v5116_v8, %v3679_v52  ;;  %v532_v24 = vpop.f32.mrf.mxu0  ;;  %v1114_v53 = vpack.c.bf16 %v1081_v9, %v1081_v9  ;;  %v5203_v38 = vmin.f32 %v661_v3, 6.0 }
 0x129   : > { %v594_v61 = vmul.f32 %v4854_v11, %v532_v24  ;;  %v1115_v18 = vpack.c.bf16 %v1082_v47, %v1082_v47  ;;  %v1181_v26 = vpack.c.bf16 %v1150_v15, %v1150_v15  ;;  %v1244_v30 = vunpack.c.l.bf16 %v1180_v4 }
 0x12a   : > { %v3824_v46 = vadd.f32 %v5123_v16, %v3788_v10  ;;  %v3825_v22 = vadd.f32 %v5123_v16, %v3789_v20  ;;  %v1211_v51 = vunpack.c.l.bf16 %v1114_v53  ;;  %v5214_v1 = vunpack.c.l.bf16 %v741_v36 }
 0x12b   : > { %v630_v34 = vadd.f32 %v5211_v42, %v594_v61  ;;  %v1212_v48 = vunpack.c.l.bf16 %v1115_v18  ;;  %v1245_v41 = vunpack.c.l.bf16 %v1181_v26  ;;  %v1341_v3 = vmul.f32 %v4837_v0, %v4948_v55 }
 0x12c   : > { %6458 = vst [vmem:[#allocation20_spill] sm:$0xff] %v5214_v1  ;;  %v3856_v11 = vmax.f32 %v3824_v46, 0.0  ;;  %v3857_v33 = vmax.f32 %v3825_v22, 0.0  ;;  %v1275_v54 = vadd.f32 %v1244_v30, %v1211_v51  ;;  %v1342_v9 = vmul.f32 %v4837_v0, %v4979_v56  ;;  %v5229_v22 = vld [vmem:[%s6398_s2] ss:$0 sm:$0xff] }
 0x12d   : > { %v662_v60 = vmax.f32 %v630_v34, 0.0  ;;  %v1276_v5 = vadd.f32 %v1245_v41, %v1212_v48  ;;  %v1692_v47 = vmul.f32 %v4886_v45, %v5013_v12  ;;  %v1372_v36 = vpack.c.bf16 %v1341_v3, %v1341_v3 }
 0x12e   : > { %v3888_v15 = vmin.f32 %v3856_v11, 6.0  ;;  %v3889_v39 = vmin.f32 %v3857_v33, 6.0  ;;  %v1308_v52 = vpack.c.bf16 %v1275_v54, %v1275_v54  ;;  %v1373_v20 = vpack.c.bf16 %v1342_v9, %v1342_v9 }
 0x12f   : > { %v694_v4 = vmin.f32 %v662_v60, 6.0  ;;  %v1309_v10 = vpack.c.bf16 %v1276_v5, %v1276_v5  ;;  %v1693_v24 = vmul.f32 %v4886_v45, %v5032_v58  ;;  %v730_v53 = vpack.c.bf16 %v5203_v38, %v5203_v38 }
 0x130   : > { %v3919_v61 = vpack.c.bf16 %v3889_v39, %v3888_v15  ;;  %v535_v18 = vpop.f32.mrf.mxu0  ;;  %v1436_v26 = vunpack.c.l.bf16 %v1372_v36  ;;  %v1724_v46 = vpack.c.bf16 %v1692_v47, %v1692_v47  ;;  %v1405_v30 = vunpack.c.l.bf16 %v1308_v52 }
 0x131   : > { %v595_v51 = vmul.f32 %v5229_v22, %v535_v18  ;;  %v1406_v34 = vunpack.c.l.bf16 %v1309_v10  ;;  %v1437_v48 = vunpack.c.l.bf16 %v1373_v20  ;;  %v1725_v11 = vpack.c.bf16 %v1693_v24, %v1693_v24 }
 0x132   : > { %4375 = vmatmul.msk.bf16.gmra.mxu1 %vm3966_vm4, %v3919_v61  ;;  %v1501_v41 = vrot.slane %v1436_v26, 1  ;;  %v1804_v33 = vunpack.c.l.bf16 %v1724_v46  ;;  %v2062_v38 = vmul.f32 %v4911_v23, %v5073_v40  ;;  %v731_v54 = vpack.c.bf16 %v694_v4, %v694_v4 }
 0x133   : > { %v631_v3 = vadd.f32 %v5211_v42, %v595_v51  ;;  %v1502_v60 = vrot.slane %v1437_v48, 1  ;;  %v2063_v5 = vmul.f32 %v4911_v23, %v5090_v62  ;;  %v1805_v47 = vunpack.c.l.bf16 %v1725_v11 }
 0x134   : > { %v1596_v9 = vadd.f32 %v1501_v41, %v4872_v29  ;;  %v1870_v15 = vrot.slane %v1804_v33, 1  ;;  %v2093_v39 = vpack.c.bf16 %v2062_v38, %v2062_v38  ;;  %v2425_v48 = vmul.f32 %v4867_v25, %v4948_v55 }
 0x135   : > { %v663_v52 = vmax.f32 %v631_v3, 0.0  ;;  %v1503_v36 = vsel %vm1495_vm1, %v1501_v41, %v1502_v60  ;;  %v1598_v10 = vadd.f32 %v1502_v60, %v1406_v34  ;;  %v2094_v20 = vpack.c.bf16 %v2063_v5, %v2063_v5 }
 0x136   : > { %v1597_v24 = vadd.f32 %v1503_v36, %v1405_v30  ;;  %v1644_v61 = vpack.c.bf16 %v1596_v9, %v1596_v9  ;;  %v1871_v18 = vrot.slane %v1805_v47, 1  ;;  %v2172_v4 = vunpack.c.l.bf16 %v2093_v39 }
 0x137   : > { %v695_v26 = vmin.f32 %v663_v52, 6.0  ;;  %v1646_v46 = vpack.c.bf16 %v1598_v10, %v1598_v10  ;;  %v2173_v51 = vunpack.c.l.bf16 %v2094_v20  ;;  %v5242_v1 = vunpack.c.l.bf16 %v730_v53 }
 0x138   : > { %v5244_v11 = vunpack.c.l.bf16 %v731_v54  ;;  %v1645_v33 = vpack.c.bf16 %v1597_v24, %v1597_v24  ;;  %v1758_v38 = vunpack.c.l.bf16 %v1644_v61  ;;  %v1872_v34 = vsel %vm1495_vm1, %v1870_v15, %v1871_v18 }
 0x139   : > { %v732_v3 = vpack.c.bf16 %v695_v26, %v695_v26  ;;  %v1760_v41 = vunpack.c.l.bf16 %v1646_v46  ;;  %v2426_v30 = vmul.f32 %v4867_v25, %v4979_v56  ;;  %v2456_v9 = vpack.c.bf16 %v2425_v48, %v2425_v48 }
 0x13a   : > { %v1759_v60 = vunpack.c.l.bf16 %v1645_v33  ;;  %v1966_v5 = vadd.f32 %v1870_v15, %v1758_v38  ;;  %v2807_v47 = vmul.f32 %v4870_v28, %v5013_v12  ;;  %v2236_v53 = vrot.slane %v2172_v4, 1 }
 0x13b   : > { %v1968_v55 = vadd.f32 %v1871_v18, %v1760_v41  ;;  %v2237_v39 = vrot.slane %v2173_v51, 1  ;;  %v2457_v54 = vpack.c.bf16 %v2426_v30, %v2426_v30  ;;  %v2535_v10 = vunpack.c.l.bf16 %v2456_v9 }
 0x13c   : > { %v1967_v52 = vadd.f32 %v1872_v34, %v1759_v60  ;;  %v2014_v36 = vpack.c.bf16 %v1966_v5, %v1966_v5  ;;  %v2808_v20 = vmul.f32 %v4870_v28, %v5032_v58  ;;  %v2840_v26 = vpack.c.bf16 %v2807_v47, %v2807_v47 }
 0x13d   : > { %v2016_v24 = vpack.c.bf16 %v1968_v55, %v1968_v55  ;;  %v2536_v61 = vunpack.c.l.bf16 %v2457_v54  ;;  %v3201_v56 = vmul.f32 %v4878_v32, %v5073_v40  ;;  %v5255_v15 = vunpack.c.l.bf16 %v732_v3 }
 0x13e   : > { %v2015_v46 = vpack.c.bf16 %v1967_v52, %v1967_v52  ;;  %v2126_v48 = vunpack.c.l.bf16 %v2014_v36  ;;  %v2841_v18 = vpack.c.bf16 %v2808_v20, %v2808_v20  ;;  %v2921_v33 = vunpack.c.l.bf16 %v2840_v26 }
 0x13f   : > { %v2128_v4 = vunpack.c.l.bf16 %v2016_v24  ;;  %v2602_v51 = vrot.slane %v2536_v61, 2  ;;  %v3202_v38 = vmul.f32 %v4878_v32, %v5090_v62  ;;  %v3232_v60 = vpack.c.bf16 %v3201_v56, %v3201_v56 }
 0x140   : > { %v2127_v41 = vunpack.c.l.bf16 %v2015_v46  ;;  %v2330_v34 = vadd.f32 %v2236_v53, %v2126_v48  ;;  %v2922_v30 = vunpack.c.l.bf16 %v2841_v18  ;;  %v2238_v5 = vsel %vm1495_vm1, %v2236_v53, %v2237_v39 }
 0x141   : > { %v2332_v9 = vadd.f32 %v2237_v39, %v2128_v4  ;;  %v2601_v47 = vrot.slane %v2535_v10, 2  ;;  %v2991_v55 = vrot.slane %v2921_v33, 2  ;;  %v3233_v36 = vpack.c.bf16 %v3202_v38, %v3202_v38 }
 0x142   : > { %v2331_v3 = vadd.f32 %v2238_v5, %v2127_v41  ;;  %v2378_v54 = vpack.c.bf16 %v2330_v34, %v2330_v34  ;;  %v2992_v52 = vrot.slane %v2922_v30, 2  ;;  %v5260_v24 = vunpack.c.l.bf16 %v3232_v60  ;;  %v537_v5 = vpop.f32.mrf.mxu0 }
 0x143   : > { %v2380_v20 = vpack.c.bf16 %v2332_v9, %v2332_v9  ;;  %v789_v61 = vmul.f32 %v4813_v43, %v5013_v12  ;;  %v790_v26 = vmul.f32 %v4813_v43, %v5032_v58  ;;  %v2603_v53 = vsel %vm2594_vm2, %v2601_v47, %v2602_v51  ;;  %v560_v9 = vpop.f32.mrf.mxu3 }
 0x144   : > { %v2379_v46 = vpack.c.bf16 %v2331_v3, %v2331_v3  ;;  %v2490_v56 = vunpack.c.l.bf16 %v2378_v54  ;;  %v2604_v39 = vsel %vm2594_vm2, %v2602_v51, %v4906_v19  ;;  %v2993_v48 = vsel %vm2594_vm2, %v2991_v55, %v2992_v52 }
 0x145   : > { %v2492_v10 = vunpack.c.l.bf16 %v2380_v20  ;;  %v3312_v18 = vunpack.c.l.bf16 %v3233_v36  ;;  %v913_v4 = vpack.c.bf16 %v789_v61, %v789_v61  ;;  %v2994_v41 = vsel %vm2594_vm2, %v2992_v52, %v4909_v21 }
 0x146   : > { %v2491_v33 = vunpack.c.l.bf16 %v2379_v46  ;;  %v2710_v38 = vadd.f32 %v2601_v47, %v2490_v56  ;;  %v953_v34 = vmul.f32 %v4815_v44, %v5073_v40  ;;  %v3377_v60 = vrot.slane %v5260_v24, 2 }
 0x147   : > { %v2712_v30 = vadd.f32 %v2604_v39, %v2492_v10  ;;  %v914_v3 = vpack.c.bf16 %v790_v26, %v790_v26  ;;  %v954_v51 = vmul.f32 %v4815_v44, %v5090_v62  ;;  %v596_v20 = vmul.f32 %v5229_v22, %v537_v5 }
 0x148   : > { %v2711_v54 = vadd.f32 %v2603_v53, %v2491_v33  ;;  %v2758_v36 = vpack.c.bf16 %v2710_v38, %v2710_v38  ;;  %v605_v47 = vmul.f32 %v5229_v22, %v560_v9  ;;  %v3378_v52 = vrot.slane %v3312_v18, 2 }
 0x149   : > { %v2760_v61 = vpack.c.bf16 %v2712_v30, %v2712_v30  ;;  %v986_v46 = vpack.c.bf16 %v953_v34, %v953_v34  ;;  %v1017_v56 = vunpack.c.l.bf16 %v913_v4  ;;  %v632_v24 = vadd.f32 %v5211_v42, %v596_v20 }
 0x14a   : > { %v2759_v63 = vpack.c.bf16 %v2711_v54, %v2711_v54  ;;  %v2874_v39 = vunpack.c.l.bf16 %v2758_v36  ;;  %v641_v10 = vadd.f32 %v5211_v42, %v605_v47  ;;  %v987_v14 = vpack.c.bf16 %v954_v51, %v954_v51 }
 0x14b   : > { %v2876_v26 = vunpack.c.l.bf16 %v2760_v61  ;;  %v1018_v31 = vunpack.c.l.bf16 %v914_v3  ;;  %v1050_v50 = vunpack.c.l.bf16 %v986_v46  ;;  %v664_v38 = vmax.f32 %v632_v24, 0.0  ;;  %v562_v47 = vpop.f32.mrf.mxu3 }
 0x14c   : > { %v2875_v53 = vunpack.c.l.bf16 %v2759_v63  ;;  %v3101_v33 = vadd.f32 %v2991_v55, %v2874_v39  ;;  %v673_v5 = vmax.f32 %v641_v10, 0.0  ;;  %v1051_v9 = vunpack.c.l.bf16 %v987_v14 }
 0x14d   : > { %v3103_v37 = vadd.f32 %v2994_v41, %v2876_v26  ;;  %v1083_v30 = vadd.f32 %v1050_v50, %v1017_v56  ;;  %v1151_v18 = vmul.f32 %v4830_v57, %v5108_v35  ;;  %v696_v54 = vmin.f32 %v664_v38, 6.0 }
 0x14e   : > { %v3102_v4 = vadd.f32 %v2993_v48, %v2875_v53  ;;  %v3149_v34 = vpack.c.bf16 %v3101_v33, %v3101_v33  ;;  %v705_v36 = vmin.f32 %v673_v5, 6.0  ;;  %v1084_v61 = vadd.f32 %v1051_v9, %v1018_v31 }
 0x14f   : > { %v3151_v20 = vpack.c.bf16 %v3103_v37, %v3103_v37  ;;  %v1116_v51 = vpack.c.bf16 %v1083_v30, %v1083_v30  ;;  %v1152_v63 = vmul.f32 %v4830_v57, %v5135_v17  ;;  %v3379_v41 = vsel %vm2594_vm2, %v3377_v60, %v3378_v52 }
 0x150   : > { %v3150_v55 = vpack.c.bf16 %v3102_v4, %v3102_v4  ;;  %v3264_v3 = vunpack.c.l.bf16 %v3149_v34  ;;  %v3380_v50 = vsel %vm2594_vm2, %v3378_v52, %v4914_v27  ;;  %v606_v48 = vmul.f32 %v5229_v22, %v562_v47 }
 0x151   : > { %v3266_v14 = vunpack.c.l.bf16 %v3151_v20  ;;  %v1117_v46 = vpack.c.bf16 %v1084_v61, %v1084_v61  ;;  %v1182_v56 = vpack.c.bf16 %v1151_v18, %v1151_v18  ;;  %v733_v24 = vpack.c.bf16 %v696_v54, %v696_v54 }
 0x152   : > { %v3265_v39 = vunpack.c.l.bf16 %v3150_v55  ;;  %v3483_v37 = vadd.f32 %v3377_v60, %v3264_v3  ;;  %v742_v31 = vpack.c.bf16 %v705_v36, %v705_v36  ;;  %v642_v26 = vadd.f32 %v5211_v42, %v606_v48 }
 0x153   : > { %v3485_v10 = vadd.f32 %v3380_v50, %v3266_v14  ;;  %v1183_v53 = vpack.c.bf16 %v1152_v63, %v1152_v63  ;;  %v1213_v33 = vunpack.c.l.bf16 %v1116_v51  ;;  %v1214_v9 = vunpack.c.l.bf16 %v1117_v46 }
 0x154   : > { %v3484_v38 = vadd.f32 %v3379_v41, %v3265_v39  ;;  %v3531_v5 = vpack.c.bf16 %v3483_v37, %v3483_v37  ;;  %v1246_v30 = vunpack.c.l.bf16 %v1182_v56  ;;  %v674_v52 = vmax.f32 %v642_v26, 0.0 }
 0x155   : > { %v3533_v4 = vpack.c.bf16 %v3485_v10, %v3485_v10  ;;  %v1247_v34 = vunpack.c.l.bf16 %v1183_v53  ;;  %v1343_v20 = vmul.f32 %v4837_v0, %v5013_v12  ;;  %v1344_v54 = vmul.f32 %v4837_v0, %v5032_v58 }
 0x156   : > { %v3532_v18 = vpack.c.bf16 %v3484_v38, %v3484_v38  ;;  %v3579_v47 = vunpack.c.l.bf16 %v3531_v5  ;;  %v1277_v60 = vadd.f32 %v1246_v30, %v1213_v33  ;;  %v5294_v61 = vunpack.c.l.bf16 %v733_v24 }
 0x157   : > { %v3581_v36 = vunpack.c.l.bf16 %v3533_v4  ;;  %v1278_v51 = vadd.f32 %v1247_v34, %v1214_v9  ;;  %v1374_v63 = vpack.c.bf16 %v1343_v20, %v1343_v20  ;;  %v5296_v3 = vunpack.c.l.bf16 %v742_v31 }
 0x158   : > { %v3580_v55 = vunpack.c.l.bf16 %v3532_v18  ;;  %v1310_v41 = vpack.c.bf16 %v1277_v60, %v1277_v60  ;;  %v1375_v50 = vpack.c.bf16 %v1344_v54, %v1344_v54  ;;  %v5298_v48 = vmin.f32 %v674_v52, 6.0 }
 0x159   : > { %v3683_v14 = vrot.slane %v3581_v36, 7  ;;  %v1311_v46 = vpack.c.bf16 %v1278_v51, %v1278_v51  ;;  %v1438_v56 = vunpack.c.l.bf16 %v1374_v63  ;;  %v3680_v39 = vrot.slane %v3579_v47, 7 }
 0x15a   : > { %v3681_v37 = vrot.slane %v3580_v55, 7  ;;  %v1439_v10 = vunpack.c.l.bf16 %v1375_v50  ;;  %v1694_v26 = vmul.f32 %v4886_v45, %v5073_v40  ;;  %v1407_v24 = vunpack.c.l.bf16 %v1310_v41 }
 0x15b   : > { %v1408_v53 = vunpack.c.l.bf16 %v1311_v46  ;;  %v1504_v33 = vrot.slane %v1438_v56, 1  ;;  %v1695_v31 = vmul.f32 %v4886_v45, %v5090_v62  ;;  %v2064_v54 = vmul.f32 %v4911_v23, %v5108_v35 }
 0x15c   : > { %v3682_v38 = vsel %vm3669_vm3, %v3680_v39, %v3681_v37  ;;  %v3684_v5 = vsel %vm3669_vm3, %v3681_v37, %v3683_v14  ;;  %v1505_v9 = vrot.slane %v1439_v10, 1  ;;  %v1726_v30 = vpack.c.bf16 %v1694_v26, %v1694_v26 }
 0x15d   : > { %v3790_v4 = vmul.f32 %v5116_v8, %v3682_v38  ;;  %v3791_v52 = vmul.f32 %v5116_v8, %v3684_v5  ;;  %v1599_v34 = vadd.f32 %v1504_v33, %v4872_v29  ;;  %v1727_v20 = vpack.c.bf16 %v1695_v31, %v1695_v31 }
 0x15e   : > { %v1506_v18 = vsel %vm1495_vm1, %v1504_v33, %v1505_v9  ;;  %v1601_v47 = vadd.f32 %v1505_v9, %v1408_v53  ;;  %v1806_v60 = vunpack.c.l.bf16 %v1726_v30  ;;  %v2065_v8 = vmul.f32 %v4911_v23, %v5135_v17 }
 0x15f   : > { %v3826_v36 = vadd.f32 %v5123_v16, %v3790_v4  ;;  %v3827_v51 = vadd.f32 %v5123_v16, %v3791_v52  ;;  %v1600_v63 = vadd.f32 %v1506_v18, %v1407_v24  ;;  %v1647_v55 = vpack.c.bf16 %v1599_v34, %v1599_v34 }
 0x160   : > { %v1649_v41 = vpack.c.bf16 %v1601_v47, %v1601_v47  ;;  %v1807_v50 = vunpack.c.l.bf16 %v1727_v20  ;;  %v1873_v14 = vrot.slane %v1806_v60, 1  ;;  %v2095_v53 = vpack.c.bf16 %v2064_v54, %v2064_v54 }
 0x161   : > { %v3858_v46 = vmax.f32 %v3826_v36, 0.0  ;;  %v3859_v56 = vmax.f32 %v3827_v51, 0.0  ;;  %v1648_v39 = vpack.c.bf16 %v1600_v63, %v1600_v63  ;;  %v1761_v37 = vunpack.c.l.bf16 %v1647_v55 }
 0x162   : > { %v1763_v10 = vunpack.c.l.bf16 %v1649_v41  ;;  %v1874_v26 = vrot.slane %v1807_v50, 1  ;;  %v2096_v33 = vpack.c.bf16 %v2065_v8, %v2065_v8  ;;  %v2174_v30 = vunpack.c.l.bf16 %v2095_v53 }
 0x163   : > { %v3890_v31 = vmin.f32 %v3858_v46, 6.0  ;;  %v3891_v38 = vmin.f32 %v3859_v56, 6.0  ;;  %v1762_v5 = vunpack.c.l.bf16 %v1648_v39  ;;  %v1969_v16 = vadd.f32 %v1873_v14, %v1761_v37 }
 0x164   : > { %v1875_v24 = vsel %vm1495_vm1, %v1873_v14, %v1874_v26  ;;  %v1971_v9 = vadd.f32 %v1874_v26, %v1763_v10  ;;  %v2175_v4 = vunpack.c.l.bf16 %v2096_v33  ;;  %v2427_v18 = vmul.f32 %v4867_v25, %v5013_v12 }
 0x165   : > { %v3920_v52 = vpack.c.bf16 %v3891_v38, %v3890_v31  ;;  %v1970_v34 = vadd.f32 %v1875_v24, %v1762_v5  ;;  %v2017_v20 = vpack.c.bf16 %v1969_v16, %v1969_v16  ;;  %v2239_v60 = vrot.slane %v2174_v30, 1 }
 0x166   : > { %v2019_v47 = vpack.c.bf16 %v1971_v9, %v1971_v9  ;;  %v2240_v36 = vrot.slane %v2175_v4, 1  ;;  %v2428_v54 = vmul.f32 %v4867_v25, %v5032_v58  ;;  %v2458_v55 = vpack.c.bf16 %v2427_v18, %v2427_v18 }
 0x167   : > { %4376 = vmatmul.msk.bf16.gmra.mxu1 %vm3966_vm4, %v3920_v52  ;;  %v2018_v51 = vpack.c.bf16 %v1970_v34, %v1970_v34  ;;  %v2129_v63 = vunpack.c.l.bf16 %v2017_v20  ;;  %v2809_v41 = vmul.f32 %v4870_v28, %v5073_v40  ;;  %v2810_v12 = vmul.f32 %v4870_v28, %v5090_v62 }
 0x168   : > { %v2131_v50 = vunpack.c.l.bf16 %v2019_v47  ;;  %v2241_v14 = vsel %vm1495_vm1, %v2239_v60, %v2240_v36  ;;  %v2459_v8 = vpack.c.bf16 %v2428_v54, %v2428_v54  ;;  %v2537_v39 = vunpack.c.l.bf16 %v2458_v55 }
 0x169   : > { %v2130_v46 = vunpack.c.l.bf16 %v2018_v51  ;;  %v2333_v56 = vadd.f32 %v2239_v60, %v2129_v63  ;;  %v2842_v37 = vpack.c.bf16 %v2809_v41, %v2809_v41  ;;  %v2843_v26 = vpack.c.bf16 %v2810_v12, %v2810_v12 }
 0x16a   : > { %v2335_v58 = vadd.f32 %v2240_v36, %v2131_v50  ;;  %v2538_v10 = vunpack.c.l.bf16 %v2459_v8  ;;  %v3203_v53 = vmul.f32 %v4878_v32, %v5108_v35  ;;  %v743_v33 = vpack.c.bf16 %v5298_v48, %v5298_v48  ;;  %v565_v8 = vpop.f32.mrf.mxu3 }
 0x16b   : > { %v2334_v31 = vadd.f32 %v2241_v14, %v2130_v46  ;;  %v2381_v38 = vpack.c.bf16 %v2333_v56, %v2333_v56  ;;  %v2923_v5 = vunpack.c.l.bf16 %v2842_v37  ;;  %v2924_v9 = vunpack.c.l.bf16 %v2843_v26 }
 0x16c   : > { %v2383_v16 = vpack.c.bf16 %v2335_v58, %v2335_v58  ;;  %v2606_v24 = vrot.slane %v2538_v10, 2  ;;  %v3204_v30 = vmul.f32 %v4878_v32, %v5135_v17  ;;  %v2605_v34 = vrot.slane %v2537_v39, 2 }
 0x16d   : > { %v2382_v4 = vpack.c.bf16 %v2334_v31, %v2334_v31  ;;  %v2493_v52 = vunpack.c.l.bf16 %v2381_v38  ;;  %v3234_v20 = vpack.c.bf16 %v3203_v53, %v3203_v53  ;;  %v2995_v60 = vrot.slane %v2923_v5, 2 }
 0x16e   : > { %v2495_v18 = vunpack.c.l.bf16 %v2383_v16  ;;  %v2608_v47 = vsel %vm2594_vm2, %v2606_v24, %v4906_v19  ;;  %v2996_v36 = vrot.slane %v2924_v9, 2  ;;  %v3235_v63 = vpack.c.bf16 %v3204_v30, %v3204_v30 }
 0x16f   : > { %v2494_v54 = vunpack.c.l.bf16 %v2382_v4  ;;  %v2713_v51 = vadd.f32 %v2605_v34, %v2493_v52  ;;  %v3313_v55 = vunpack.c.l.bf16 %v3234_v20  ;;  %v2607_v41 = vsel %vm2594_vm2, %v2605_v34, %v2606_v24 }
 0x170   : > { %v2715_v50 = vadd.f32 %v2608_v47, %v2495_v18  ;;  %v2997_v14 = vsel %vm2594_vm2, %v2995_v60, %v2996_v36  ;;  %v791_v12 = vmul.f32 %v4813_v43, %v5073_v40  ;;  %v3314_v39 = vunpack.c.l.bf16 %v3235_v63 }
 0x171   : > { %v2714_v46 = vadd.f32 %v2607_v41, %v2494_v54  ;;  %v2761_v56 = vpack.c.bf16 %v2713_v51, %v2713_v51  ;;  %v3381_v37 = vrot.slane %v3313_v55, 2  ;;  %v607_v10 = vmul.f32 %v5229_v22, %v565_v8 }
 0x172   : > { %v2763_v58 = vpack.c.bf16 %v2715_v50, %v2715_v50  ;;  %v792_v26 = vmul.f32 %v4813_v43, %v5090_v62  ;;  %v915_v53 = vpack.c.bf16 %v791_v12, %v791_v12  ;;  %v3382_v5 = vrot.slane %v3314_v39, 2 }
 0x173   : > { %v2762_v31 = vpack.c.bf16 %v2714_v46, %v2714_v46  ;;  %v2877_v38 = vunpack.c.l.bf16 %v2761_v56  ;;  %v955_v16 = vmul.f32 %v4815_v44, %v5108_v35  ;;  %v643_v9 = vadd.f32 %v5211_v42, %v607_v10  ;;  %v567_v56 = vpop.f32.mrf.mxu3 }
 0x174   : > { %v2879_v24 = vunpack.c.l.bf16 %v2763_v58  ;;  %v916_v30 = vpack.c.bf16 %v792_v26, %v792_v26  ;;  %v956_v4 = vmul.f32 %v4815_v44, %v5135_v17  ;;  %v2998_v34 = vsel %vm2594_vm2, %v2996_v36, %v4909_v21 }
 0x175   : > { %v2878_v52 = vunpack.c.l.bf16 %v2762_v31  ;;  %v3104_v20 = vadd.f32 %v2995_v60, %v2877_v38  ;;  %v3383_v18 = vsel %vm2594_vm2, %v3381_v37, %v3382_v5  ;;  %v675_v54 = vmax.f32 %v643_v9, 0.0 }
 0x176   : > { %v3106_v47 = vadd.f32 %v2998_v34, %v2879_v24  ;;  %v988_v51 = vpack.c.bf16 %v955_v16, %v955_v16  ;;  %v989_v63 = vpack.c.bf16 %v956_v4, %v956_v4  ;;  %v1019_v50 = vunpack.c.l.bf16 %v915_v53 }
 0x177   : > { %v3105_v55 = vadd.f32 %v2997_v14, %v2878_v52  ;;  %v3152_v41 = vpack.c.bf16 %v3104_v20, %v3104_v20  ;;  %v1020_v8 = vunpack.c.l.bf16 %v916_v30  ;;  %v707_v46 = vmin.f32 %v675_v54, 6.0 }
 0x178   : > { %v3154_v12 = vpack.c.bf16 %v3106_v47, %v3106_v47  ;;  %v1052_v39 = vunpack.c.l.bf16 %v988_v51  ;;  %v1053_v58 = vunpack.c.l.bf16 %v989_v63  ;;  %v608_v36 = vmul.f32 %v5229_v22, %v567_v56 }
 0x179   : > { %v3153_v10 = vpack.c.bf16 %v3105_v55, %v3105_v55  ;;  %v3267_v26 = vunpack.c.l.bf16 %v3152_v41  ;;  %v1153_v60 = vmul.f32 %v4830_v57, %v5146_v49  ;;  %v3384_v38 = vsel %vm2594_vm2, %v3382_v5, %v4914_v27 }
 0x17a   : > { %v3269_v31 = vunpack.c.l.bf16 %v3154_v12  ;;  %v1085_v14 = vadd.f32 %v1052_v39, %v1019_v50  ;;  %v1086_v16 = vadd.f32 %v1053_v58, %v1020_v8  ;;  %v644_v9 = vadd.f32 %v5211_v42, %v608_v36 }
 0x17b   : > { %v3268_v53 = vunpack.c.l.bf16 %v3153_v10  ;;  %v3486_v24 = vadd.f32 %v3381_v37, %v3267_v26  ;;  %v1154_v30 = vmul.f32 %v4830_v57, %v5168_v2  ;;  %v744_v52 = vpack.c.bf16 %v707_v46, %v707_v46 }
 0x17c   : > { %v3488_v4 = vadd.f32 %v3384_v38, %v3269_v31  ;;  %v1118_v34 = vpack.c.bf16 %v1085_v14, %v1085_v14  ;;  %v1119_v20 = vpack.c.bf16 %v1086_v16, %v1086_v16  ;;  %v676_v51 = vmax.f32 %v644_v9, 0.0 }
 0x17d   : > { %v3487_v47 = vadd.f32 %v3383_v18, %v3268_v53  ;;  %v3534_v54 = vpack.c.bf16 %v3486_v24, %v3486_v24  ;;  %v1184_v63 = vpack.c.bf16 %v1153_v60, %v1153_v60  ;;  %v5361_v5 = vunpack.c.l.bf16 %v743_v33 }
 0x17e   : > { %v3536_v55 = vpack.c.bf16 %v3488_v4, %v3488_v4  ;;  %v1185_v37 = vpack.c.bf16 %v1154_v30, %v1154_v30  ;;  %v1215_v41 = vunpack.c.l.bf16 %v1118_v34  ;;  %v1216_v12 = vunpack.c.l.bf16 %v1119_v20 }
 0x17f   : > { %v3535_v50 = vpack.c.bf16 %v3487_v47, %v3487_v47  ;;  %v3582_v8 = vunpack.c.l.bf16 %v3534_v54  ;;  %v1248_v56 = vunpack.c.l.bf16 %v1184_v63  ;;  %v1345_v18 = vmul.f32 %v4837_v0, %v5073_v40 }
 0x180   : > { %v3584_v39 = vunpack.c.l.bf16 %v3536_v55  ;;  %v1249_v46 = vunpack.c.l.bf16 %v1185_v37  ;;  %v1346_v58 = vmul.f32 %v4837_v0, %v5090_v62  ;;  %v5367_v26 = vunpack.c.l.bf16 %v744_v52 }
 0x181   : > { %v3583_v10 = vunpack.c.l.bf16 %v3535_v50  ;;  %v5369_v48 = vmin.f32 %v676_v51, 6.0  ;;  %v1279_v33 = vadd.f32 %v1248_v56, %v1215_v41  ;;  %v1376_v31 = vpack.c.bf16 %v1345_v18, %v1345_v18  ;;  %v5380_v51 = vld [vmem:[%s6401_s5] ss:$0 sm:$0xff] }
 0x182   : > { %v3688_v36 = vrot.slane %v3584_v39, 7  ;;  %v1280_v60 = vadd.f32 %v1249_v46, %v1216_v12  ;;  %v1377_v38 = vpack.c.bf16 %v1346_v58, %v1346_v58  ;;  %v3685_v14 = vrot.slane %v3582_v8, 7  ;;  %v5389_v39 = vld [vmem:[%s6402_s6] ss:$0 sm:$0xff] }
 0x183   : > { %v3686_v16 = vrot.slane %v3583_v10, 7  ;;  %v1312_v53 = vpack.c.bf16 %v1279_v33, %v1279_v33  ;;  %v1696_v24 = vmul.f32 %v4886_v45, %v5108_v35  ;;  %v1440_v30 = vunpack.c.l.bf16 %v1376_v31 }
 0x184   : > { %v1313_v9 = vpack.c.bf16 %v1280_v60, %v1280_v60  ;;  %v1441_v4 = vunpack.c.l.bf16 %v1377_v38  ;;  %v1697_v52 = vmul.f32 %v4886_v45, %v5135_v17  ;;  %v2066_v56 = vmul.f32 %v4911_v23, %v5146_v49 }
 0x185   : > { %v3687_v34 = vsel %vm3669_vm3, %v3685_v14, %v3686_v16  ;;  %v3689_v20 = vsel %vm3669_vm3, %v3686_v16, %v3688_v36  ;;  %v1409_v47 = vunpack.c.l.bf16 %v1312_v53  ;;  %v1728_v54 = vpack.c.bf16 %v1696_v24, %v1696_v24 }
 0x186   : > { %v3792_v63 = vmul.f32 %v5380_v51, %v3687_v34  ;;  %v3793_v55 = vmul.f32 %v5380_v51, %v3689_v20  ;;  %v1410_v37 = vunpack.c.l.bf16 %v1313_v9  ;;  %v1507_v41 = vrot.slane %v1440_v30, 1 }
 0x187   : > { %v1508_v50 = vrot.slane %v1441_v4, 1  ;;  %v1729_v8 = vpack.c.bf16 %v1697_v52, %v1697_v52  ;;  %v1808_v12 = vunpack.c.l.bf16 %v1728_v54  ;;  %v2067_v10 = vmul.f32 %v4911_v23, %v5168_v2 }
 0x188   : > { %v3828_v46 = vadd.f32 %v5389_v39, %v3792_v63  ;;  %v3829_v18 = vadd.f32 %v5389_v39, %v3793_v55  ;;  %v1602_v58 = vadd.f32 %v1507_v41, %v4872_v29  ;;  %v2097_v30 = vpack.c.bf16 %v2066_v56, %v2066_v56 }
 0x189   : > { %v1509_v33 = vsel %vm1495_vm1, %v1507_v41, %v1508_v50  ;;  %v1604_v36 = vadd.f32 %v1508_v50, %v1410_v37  ;;  %v1809_v60 = vunpack.c.l.bf16 %v1729_v8  ;;  %v1876_v31 = vrot.slane %v1808_v12, 1 }
 0x18a   : > { %v3860_v38 = vmax.f32 %v3828_v46, 0.0  ;;  %v3861_v14 = vmax.f32 %v3829_v18, 0.0  ;;  %v1603_v16 = vadd.f32 %v1509_v33, %v1409_v47  ;;  %v1650_v53 = vpack.c.bf16 %v1602_v58, %v1602_v58 }
 0x18b   : > { %v1652_v24 = vpack.c.bf16 %v1604_v36, %v1604_v36  ;;  %v1877_v9 = vrot.slane %v1809_v60, 1  ;;  %v2098_v4 = vpack.c.bf16 %v2067_v10, %v2067_v10  ;;  %v2176_v13 = vunpack.c.l.bf16 %v2097_v30 }
 0x18c   : > { %v3892_v52 = vmin.f32 %v3860_v38, 6.0  ;;  %v3893_v34 = vmin.f32 %v3861_v14, 6.0  ;;  %v1651_v20 = vpack.c.bf16 %v1603_v16, %v1603_v16  ;;  %v1764_v54 = vunpack.c.l.bf16 %v1650_v53 }
 0x18d   : > { %v1766_v63 = vunpack.c.l.bf16 %v1652_v24  ;;  %v1878_v55 = vsel %vm1495_vm1, %v1876_v31, %v1877_v9  ;;  %v2177_v41 = vunpack.c.l.bf16 %v2098_v4  ;;  %v2429_v47 = vmul.f32 %v4867_v25, %v5073_v40 }
 0x18e   : > { %v3921_v37 = vpack.c.bf16 %v3893_v34, %v3892_v52  ;;  %v1765_v50 = vunpack.c.l.bf16 %v1651_v20  ;;  %v1972_v8 = vadd.f32 %v1876_v31, %v1764_v54  ;;  %v2242_v46 = vrot.slane %v2176_v13, 1 }
 0x18f   : > { %v1974_v12 = vadd.f32 %v1877_v9, %v1766_v63  ;;  %v2243_v18 = vrot.slane %v2177_v41, 1  ;;  %v2430_v56 = vmul.f32 %v4867_v25, %v5090_v62  ;;  %v2460_v33 = vpack.c.bf16 %v2429_v47, %v2429_v47 }
 0x190   : > { %4377 = vmatmul.msk.bf16.gmra.mxu1 %vm3966_vm4, %v3921_v37  ;;  %v1973_v58 = vadd.f32 %v1878_v55, %v1765_v50  ;;  %v2020_v10 = vpack.c.bf16 %v1972_v8, %v1972_v8  ;;  %v2811_v36 = vmul.f32 %v4870_v28, %v5108_v35  ;;  %v745_v60 = vpack.c.bf16 %v5369_v48, %v5369_v48 }
 0x191   : > { %v2022_v31 = vpack.c.bf16 %v1974_v12, %v1974_v12  ;;  %v2461_v38 = vpack.c.bf16 %v2430_v56, %v2430_v56  ;;  %v2812_v40 = vmul.f32 %v4870_v28, %v5135_v17  ;;  %v2539_v16 = vunpack.c.l.bf16 %v2460_v33 }
 0x192   : > { %v2021_v13 = vpack.c.bf16 %v1973_v58, %v1973_v58  ;;  %v2132_v14 = vunpack.c.l.bf16 %v2020_v10  ;;  %v2844_v62 = vpack.c.bf16 %v2811_v36, %v2811_v36  ;;  %v3205_v30 = vmul.f32 %v4878_v32, %v5146_v49 }
 0x193   : > { %v2134_v53 = vunpack.c.l.bf16 %v2022_v31  ;;  %v2540_v24 = vunpack.c.l.bf16 %v2461_v38  ;;  %v2845_v9 = vpack.c.bf16 %v2812_v40, %v2812_v40  ;;  %v2244_v52 = vsel %vm1495_vm1, %v2242_v46, %v2243_v18 }
 0x194   : > { %v2133_v4 = vunpack.c.l.bf16 %v2021_v13  ;;  %v2336_v34 = vadd.f32 %v2242_v46, %v2132_v14  ;;  %v2925_v48 = vunpack.c.l.bf16 %v2844_v62  ;;  %v3206_v55 = vmul.f32 %v4878_v32, %v5168_v2 }
 0x195   : > { %v2338_v20 = vadd.f32 %v2243_v18, %v2134_v53  ;;  %v2610_v54 = vrot.slane %v2540_v24, 2  ;;  %v2926_v63 = vunpack.c.l.bf16 %v2845_v9  ;;  %v2609_v50 = vrot.slane %v2539_v16, 2  ;;  %v570_v53 = vpop.f32.mrf.mxu3 }
 0x196   : > { %v2337_v41 = vadd.f32 %v2244_v52, %v2133_v4  ;;  %v2384_v37 = vpack.c.bf16 %v2336_v34, %v2336_v34  ;;  %v3236_v8 = vpack.c.bf16 %v3205_v30, %v3205_v30  ;;  %v5414_v47 = vunpack.c.l.bf16 %v745_v60 }
 0x197   : > { %v2386_v12 = vpack.c.bf16 %v2338_v20, %v2338_v20  ;;  %v2999_v56 = vrot.slane %v2925_v48, 2  ;;  %v3000_v58 = vrot.slane %v2926_v63, 2  ;;  %v2611_v46 = vsel %vm2594_vm2, %v2609_v50, %v2610_v54 }
 0x198   : > { %v2385_v10 = vpack.c.bf16 %v2337_v41, %v2337_v41  ;;  %v2496_v33 = vunpack.c.l.bf16 %v2384_v37  ;;  %v3237_v36 = vpack.c.bf16 %v3206_v55, %v3206_v55  ;;  %v2612_v31 = vsel %vm2594_vm2, %v2610_v54, %v4906_v19 }
 0x199   : > { %v2498_v18 = vunpack.c.l.bf16 %v2386_v12  ;;  %v3001_v38 = vsel %vm2594_vm2, %v2999_v56, %v3000_v58  ;;  %v3315_v40 = vunpack.c.l.bf16 %v3236_v8  ;;  %v3002_v60 = vsel %vm2594_vm2, %v3000_v58, %v4909_v21 }
 0x19a   : > { %v2497_v13 = vunpack.c.l.bf16 %v2385_v10  ;;  %v2716_v14 = vadd.f32 %v2609_v50, %v2496_v33  ;;  %v3316_v16 = vunpack.c.l.bf16 %v3237_v36  ;;  %v811_v24 = vmul.f32 %v4813_v43, %v5296_v3 }
 0x19b   : > { %v2718_v62 = vadd.f32 %v2612_v31, %v2498_v18  ;;  %v813_v9 = vmul.f32 %v4813_v43, %v5367_v26  ;;  %v975_v30 = vmul.f32 %v4815_v44, %v5367_v26  ;;  %v609_v48 = vmul.f32 %v5229_v22, %v570_v53 }
 0x19c   : > { %v2717_v4 = vadd.f32 %v2611_v46, %v2497_v13  ;;  %v2764_v52 = vpack.c.bf16 %v2716_v14, %v2716_v14  ;;  %v3386_v34 = vrot.slane %v3316_v16, 2  ;;  %v3385_v54 = vrot.slane %v3315_v40, 2 }
 0x19d   : > { %v2766_v20 = vpack.c.bf16 %v2718_v62, %v2718_v62  ;;  %v935_v63 = vpack.c.bf16 %v811_v24, %v811_v24  ;;  %v1008_v55 = vpack.c.bf16 %v975_v30, %v975_v30  ;;  %v937_v50 = vpack.c.bf16 %v813_v9, %v813_v9 }
 0x19e   : > { %v2765_v41 = vpack.c.bf16 %v2717_v4, %v2717_v4  ;;  %v2880_v37 = vunpack.c.l.bf16 %v2764_v52  ;;  %v5431_v8 = vmul.f32 %v4813_v43, %v5108_v35  ;;  %v3387_v58 = vsel %vm2594_vm2, %v3385_v54, %v3386_v34 }
 0x19f   : > { %v2882_v12 = vunpack.c.l.bf16 %v2766_v20  ;;  %v645_v10 = vadd.f32 %v5211_v42, %v609_v48  ;;  %v1039_v33 = vunpack.c.l.bf16 %v935_v63  ;;  %v1072_v18 = vunpack.c.l.bf16 %v1008_v55 }
 0x1a0   : > { %v2881_v46 = vunpack.c.l.bf16 %v2765_v41  ;;  %v3107_v36 = vadd.f32 %v2999_v56, %v2880_v37  ;;  %v1365_v31 = vmul.f32 %v4837_v0, %v5296_v3  ;;  %v1366_v14 = vmul.f32 %v4837_v0, %v5361_v5 }
 0x1a1   : > { %v3109_v40 = vadd.f32 %v3002_v60, %v2882_v12  ;;  %v677_v13 = vmax.f32 %v645_v10, 0.0  ;;  %v1367_v16 = vmul.f32 %v4837_v0, %v5367_v26  ;;  %v1105_v24 = vadd.f32 %v1072_v18, %v1039_v33 }
 0x1a2   : > { %v3108_v62 = vadd.f32 %v3001_v38, %v2881_v46  ;;  %v3155_v53 = vpack.c.bf16 %v3107_v36, %v3107_v36  ;;  %v1396_v9 = vpack.c.bf16 %v1365_v31, %v1365_v31  ;;  %v1397_v4 = vpack.c.bf16 %v1366_v14, %v1366_v14  ;;  %v572_v46 = vpop.f32.mrf.mxu3 }
 0x1a3   : > { %v3157_v42 = vpack.c.bf16 %v3109_v40, %v3109_v40  ;;  %v709_v30 = vmin.f32 %v677_v13, 6.0  ;;  %v1398_v56 = vpack.c.bf16 %v1367_v16, %v1367_v16  ;;  %v1138_v20 = vpack.c.bf16 %v1105_v24, %v1105_v24 }
 0x1a4   : > { %v3156_v52 = vpack.c.bf16 %v3108_v62, %v3108_v62  ;;  %v3270_v48 = vunpack.c.l.bf16 %v3155_v53  ;;  %v5441_v63 = vunpack.c.l.bf16 %v1396_v9  ;;  %v5443_v41 = vunpack.c.l.bf16 %v1397_v4 }
 0x1a5   : > { %v3272_v60 = vunpack.c.l.bf16 %v3157_v42  ;;  %v746_v55 = vpack.c.bf16 %v709_v30, %v709_v30  ;;  %v5445_v37 = vunpack.c.l.bf16 %v1398_v56  ;;  %v3388_v38 = vsel %vm2594_vm2, %v3386_v34, %v4914_v27 }
 0x1a6   : > { %v3271_v12 = vunpack.c.l.bf16 %v3156_v52  ;;  %v3489_v10 = vadd.f32 %v3385_v54, %v3270_v48  ;;  %v1041_v33 = vunpack.c.l.bf16 %v937_v50  ;;  %v1235_v31 = vunpack.c.l.bf16 %v1138_v20 }
 0x1a7   : > { %6459 = vst [vmem:[#allocation21_spill] sm:$0xff] %v5445_v37  ;;  %v3491_v36 = vadd.f32 %v3388_v38, %v3272_v60  ;;  %v5449_v18 = vunpack.c.l.bf16 %v746_v55  ;;  %v6424_v40 = vrot.slane %v5445_v37, 1  ;;  %v6425_v16 = vrot.slane %v5441_v63, 1 }
 0x1a8   : > { %v3490_v13 = vadd.f32 %v3387_v58, %v3271_v12  ;;  %v3537_v14 = vpack.c.bf16 %v3489_v10, %v3489_v10  ;;  %v1538_v62 = vrot.slane %v5443_v41, 1  ;;  %v610_v54 = vmul.f32 %v5229_v22, %v572_v46 }
 0x1a9   : > { %6460 = vst [vmem:[#allocation22_spill] sm:$0xff] %v5449_v18  ;;  %v3539_v53 = vpack.c.bf16 %v3491_v36, %v3491_v36  ;;  %v977_v24 = vmul.f32 %v4815_v44, %v5449_v18  ;;  %v1173_v34 = vmul.f32 %v4830_v57, %v5449_v18  ;;  %v1635_v58 = vadd.f32 %v6424_v40, %v4872_v29 }
 0x1aa   : > { %v3538_v50 = vpack.c.bf16 %v3490_v13, %v3490_v13  ;;  %v3585_v9 = vunpack.c.l.bf16 %v3537_v14  ;;  %v1718_v42 = vmul.f32 %v4886_v45, %v5449_v18  ;;  %v2086_v52 = vmul.f32 %v4911_v23, %v5449_v18  ;;  %v4468_v14 = vld [vmem:[%s6399_s3] ss:$0 sm:$0xff] }
 0x1ab   : > { %v3587_v30 = vunpack.c.l.bf16 %v3539_v53  ;;  %v1010_v4 = vpack.c.bf16 %v977_v24, %v977_v24  ;;  %v1204_v56 = vpack.c.bf16 %v1173_v34, %v1173_v34  ;;  %v1683_v20 = vpack.c.bf16 %v1635_v58, %v1635_v58 }
 0x1ac   : > { %v3586_v48 = vunpack.c.l.bf16 %v3538_v50  ;;  %v1750_v60 = vpack.c.bf16 %v1718_v42, %v1718_v42  ;;  %v812_v22 = vmul.f32 %v4813_v43, %v5361_v5  ;;  %v3690_v55 = vrot.slane %v3585_v9, 7 }
 0x1ad   : > { %v3693_v12 = vrot.slane %v3587_v30, 7  ;;  %v1074_v38 = vunpack.c.l.bf16 %v1010_v4  ;;  %v1268_v10 = vunpack.c.l.bf16 %v1204_v56  ;;  %v2117_v13 = vpack.c.bf16 %v2086_v52, %v2086_v52 }
 0x1ae   : > { %v3691_v46 = vrot.slane %v3586_v48, 7  ;;  %v5468_v36 = vunpack.c.l.bf16 %v1750_v60  ;;  %v646_v53 = vadd.f32 %v4468_v14, %v610_v54  ;;  %v1797_v50 = vunpack.c.l.bf16 %v1683_v20 }
 0x1af   : > { %v1107_v24 = vadd.f32 %v1074_v38, %v1041_v33  ;;  %v1299_v34 = vadd.f32 %v1268_v10, %v1235_v31  ;;  %v814_v58 = vmul.f32 %v4813_v43, %v5414_v47  ;;  %v1539_v33 = vsel %vm1495_vm1, %v6425_v16, %v1538_v62 }
 0x1b0   : > { %v3692_v9 = vsel %vm3669_vm3, %v3690_v55, %v3691_v46  ;;  %v3694_v42 = vsel %vm3669_vm3, %v3691_v46, %v3693_v12  ;;  %v1909_v30 = vrot.slane %v5468_v36, 1  ;;  %v678_v4 = vmax.f32 %v646_v53, 0.0 }
 0x1b1   : > { %v3794_v56 = vmul.f32 %v5380_v51, %v3692_v9  ;;  %v3795_v52 = vmul.f32 %v5380_v51, %v3694_v42  ;;  %v1140_v48 = vpack.c.bf16 %v1107_v24, %v1107_v24  ;;  %v1332_v60 = vpack.c.bf16 %v1299_v34, %v1299_v34 }
 0x1b2   : > { %v5485_v31 = vunpack.c.l.bf16 %v2117_v13  ;;  %v710_v54 = vmin.f32 %v678_v4, 6.0  ;;  %v936_v20 = vpack.c.bf16 %v812_v22, %v812_v22  ;;  %v5491_v46 = vadd.f32 %v1909_v30, %v1797_v50 }
 0x1b3   : > { %v3830_v55 = vadd.f32 %v5389_v39, %v3794_v56  ;;  %v3831_v12 = vadd.f32 %v5389_v39, %v3795_v52  ;;  %v1237_v38 = vunpack.c.l.bf16 %v1140_v48  ;;  %v1429_v10 = vunpack.c.l.bf16 %v1332_v60 }
 0x1b4   : > { %6461 = vst [vmem:[#allocation23_spill] sm:$0xff] %v5491_v46  ;;  %v747_v14 = vpack.c.bf16 %v710_v54, %v710_v54  ;;  %v938_v53 = vpack.c.bf16 %v814_v58, %v814_v58  ;;  %v976_v24 = vmul.f32 %v4815_v44, %v5414_v47  ;;  %v1040_v52 = vunpack.c.l.bf16 %v936_v20 }
 0x1b5   : > { %v3862_v34 = vmax.f32 %v3830_v55, 0.0  ;;  %v3863_v13 = vmax.f32 %v3831_v12, 0.0  ;;  %v1301_v9 = vadd.f32 %v4845_v7, %v1237_v38  ;;  %v1633_v22 = vadd.f32 %v1539_v33, %v1429_v10 }
 0x1b6   : > { %v944_v4 = vunpack.c.l.bf16 %v747_v14  ;;  %v1009_v56 = vpack.c.bf16 %v976_v24, %v976_v24  ;;  %v1368_v55 = vmul.f32 %v4837_v0, %v5414_v47  ;;  %v1042_v38 = vunpack.c.l.bf16 %v938_v53 }
 0x1b7   : > { %v3894_v48 = vmin.f32 %v3862_v34, 6.0  ;;  %v3895_v60 = vmin.f32 %v3863_v13, 6.0  ;;  %v1334_v40 = vpack.c.bf16 %v1301_v9, %v1301_v9  ;;  %v1681_v50 = vpack.c.bf16 %v1633_v22, %v1633_v22 }
 0x1b8   : > { %v978_v54 = vmul.f32 %v4815_v44, %v944_v4  ;;  %v1073_v58 = vunpack.c.l.bf16 %v1009_v56  ;;  %v1174_v16 = vmul.f32 %v4830_v57, %v944_v4  ;;  %v1719_v10 = vmul.f32 %v4886_v45, %v944_v4 }
 0x1b9   : > { %v3922_v12 = vpack.c.bf16 %v3895_v60, %v3894_v48  ;;  %v1399_v34 = vpack.c.bf16 %v1368_v55, %v1368_v55  ;;  %v5505_v13 = vunpack.c.l.bf16 %v1334_v40  ;;  %v2087_v22 = vmul.f32 %v4911_v23, %v944_v4 }
 0x1ba   : > { %v1011_v20 = vpack.c.bf16 %v978_v54, %v978_v54  ;;  %v1106_v14 = vadd.f32 %v1073_v58, %v1040_v52  ;;  %v1205_v24 = vpack.c.bf16 %v1174_v16, %v1174_v16  ;;  %v1751_v9 = vpack.c.bf16 %v1719_v10, %v1719_v10 }
 0x1bb   : > { %4378 = vmatmul.msk.bf16.gmra.mxu1 %vm3966_vm4, %v3922_v12  ;;  %6462 = vst [vmem:[#allocation24_spill] sm:$0xff] %v5505_v13  ;;  %v5509_v56 = vmul.f32 %v4870_v28, %v944_v4  ;;  %v5511_v48 = vunpack.c.l.bf16 %v1681_v50  ;;  %v5513_v42 = vunpack.c.l.bf16 %v1399_v34  ;;  %v2118_v16 = vpack.c.bf16 %v2087_v22, %v2087_v22 }
 0x1bc   : > { %v1075_v60 = vunpack.c.l.bf16 %v1011_v20  ;;  %v1139_v53 = vpack.c.bf16 %v1106_v14, %v1106_v14  ;;  %v1269_v33 = vunpack.c.l.bf16 %v1205_v24  ;;  %v5515_v52 = vunpack.c.l.bf16 %v1751_v9 }
 0x1bd   : > { %6463 = vst [vmem:[#allocation25_spill] sm:$0xff] %v5509_v56  ;;  %v794_v40 = vmul.f32 %v4813_v43, %v5135_v17  ;;  %v5520_v55 = vmul.f32 %v4878_v32, %v944_v4  ;;  %v917_v50 = vpack.c.bf16 %v5431_v8, %v5431_v8  ;;  %v5525_v10 = vunpack.c.l.bf16 %v2118_v16 }
 0x1be   : > { %6464 = vst [vmem:[#allocation26_spill] sm:$0xff] %v5513_v42  ;;  %v1108_v54 = vadd.f32 %v1075_v60, %v1042_v38  ;;  %v1236_v58 = vunpack.c.l.bf16 %v1139_v53  ;;  %v6426_v12 = vrot.slane %v5515_v52, 1  ;;  %v957_v38 = vmul.f32 %v4815_v44, %v5146_v49 }
 0x1bf   : > { %6465 = vst [vmem:[#allocation27_spill] sm:$0xff] %v5520_v55  ;;  %v918_v14 = vpack.c.bf16 %v794_v40, %v794_v40  ;;  %v958_v4 = vmul.f32 %v4815_v44, %v5168_v2  ;;  %v1021_v60 = vunpack.c.l.bf16 %v917_v50  ;;  %v1156_v20 = vmul.f32 %v4830_v57, %v5199_v59 }
 0x1c0   : > { %v1141_v24 = vpack.c.bf16 %v1108_v54, %v1108_v54  ;;  %v1300_v34 = vadd.f32 %v1269_v33, %v1236_v58  ;;  %v5539_v8 = vsel %vm1495_vm1, %v1909_v30, %v6426_v12  ;;  %v990_v16 = vpack.c.bf16 %v957_v38, %v957_v38 }
 0x1c1   : > { %6466 = vst [vmem:[#allocation28_spill] sm:$0xff] %v5539_v8  ;;  %v991_v40 = vpack.c.bf16 %v958_v4, %v958_v4  ;;  %v1022_v54 = vunpack.c.l.bf16 %v918_v14  ;;  %v1155_v58 = vmul.f32 %v4830_v57, %v5185_v6  ;;  %v1347_v36 = vmul.f32 %v4837_v0, %v5108_v35 }
 0x1c2   : > { %v1238_v53 = vunpack.c.l.bf16 %v1141_v24  ;;  %v1333_v33 = vpack.c.bf16 %v1300_v34, %v1300_v34  ;;  %v1054_v9 = vunpack.c.l.bf16 %v990_v16  ;;  %v1187_v24 = vpack.c.bf16 %v1156_v20, %v1156_v20 }
 0x1c3   : > { %v1055_v22 = vunpack.c.l.bf16 %v991_v40  ;;  %v1186_v50 = vpack.c.bf16 %v1155_v58, %v1155_v58  ;;  %v1348_v34 = vmul.f32 %v4837_v0, %v5135_v17  ;;  %v1378_v14 = vpack.c.bf16 %v1347_v36, %v1347_v36 }
 0x1c4   : > { %v1302_v30 = vadd.f32 %v4845_v7, %v1238_v53  ;;  %v1430_v12 = vunpack.c.l.bf16 %v1333_v33  ;;  %v1087_v56 = vadd.f32 %v1054_v9, %v1021_v60  ;;  %v1251_v13 = vunpack.c.l.bf16 %v1187_v24 }
 0x1c5   : > { %v1088_v8 = vadd.f32 %v1055_v22, %v1022_v54  ;;  %v1250_v46 = vunpack.c.l.bf16 %v1186_v50  ;;  %v1379_v37 = vpack.c.bf16 %v1348_v34, %v1348_v34  ;;  %v1442_v55 = vunpack.c.l.bf16 %v1378_v14 }
 0x1c6   : > { %v1335_v38 = vpack.c.bf16 %v1302_v30, %v1302_v30  ;;  %v1634_v4 = vadd.f32 %v1538_v62, %v1430_v12  ;;  %v1120_v33 = vpack.c.bf16 %v1087_v56, %v1087_v56  ;;  %v1698_v58 = vmul.f32 %v4886_v45, %v5146_v49 }
 0x1c7   : > { %v1121_v16 = vpack.c.bf16 %v1088_v8, %v1088_v8  ;;  %v1443_v40 = vunpack.c.l.bf16 %v1379_v37  ;;  %v1510_v20 = vrot.slane %v1442_v55, 1  ;;  %v1699_v36 = vmul.f32 %v4886_v45, %v5168_v2 }
 0x1c8   : > { %v1432_v7 = vunpack.c.l.bf16 %v1335_v38  ;;  %v1682_v53 = vpack.c.bf16 %v1634_v4, %v1634_v4  ;;  %v6467_v41 = vrot.slane %v5513_v42, 1  ;;  %v1217_v9 = vunpack.c.l.bf16 %v1120_v33 }
 0x1c9   : > { %v1218_v22 = vunpack.c.l.bf16 %v1121_v16  ;;  %v1511_v60 = vrot.slane %v1443_v40, 1  ;;  %v1605_v54 = vadd.f32 %v1510_v20, %v4872_v29  ;;  %v1730_v56 = vpack.c.bf16 %v1698_v58, %v1698_v58 }
 0x1ca   : > { %v1637_v62 = vadd.f32 %v6467_v41, %v1432_v7  ;;  %v5559_v12 = vunpack.c.l.bf16 %v1682_v53  ;;  %v1731_v8 = vpack.c.bf16 %v1699_v36, %v1699_v36  ;;  %v1281_v55 = vadd.f32 %v1250_v46, %v1217_v9 }
 0x1cb   : > { %v1282_v30 = vadd.f32 %v1251_v13, %v1218_v22  ;;  %v2068_v50 = vmul.f32 %v4911_v23, %v5185_v6  ;;  %v1512_v24 = vsel %vm1495_vm1, %v1510_v20, %v1511_v60  ;;  %v1653_v34 = vpack.c.bf16 %v1605_v54, %v1605_v54 }
 0x1cc   : > { %v1685_v37 = vpack.c.bf16 %v1637_v62, %v1637_v62  ;;  %v1810_v14 = vunpack.c.l.bf16 %v1730_v56  ;;  %v1811_v38 = vunpack.c.l.bf16 %v1731_v8  ;;  %v1314_v7 = vpack.c.bf16 %v1281_v55, %v1281_v55 }
 0x1cd   : > { %v1315_v53 = vpack.c.bf16 %v1282_v30, %v1282_v30  ;;  %v2069_v33 = vmul.f32 %v4911_v23, %v5199_v59  ;;  %v1767_v16 = vunpack.c.l.bf16 %v1653_v34  ;;  %v2099_v36 = vpack.c.bf16 %v2068_v50, %v2068_v50 }
 0x1ce   : > { %v1799_v4 = vunpack.c.l.bf16 %v1685_v37  ;;  %v1879_v40 = vrot.slane %v1810_v14, 1  ;;  %v1880_v58 = vrot.slane %v1811_v38, 1  ;;  %v6468_v46 = vrot.slane %v5515_v52, 1 }
 0x1cf   : > { %v1411_v41 = vunpack.c.l.bf16 %v1314_v7  ;;  %v1412_v62 = vunpack.c.l.bf16 %v1315_v53  ;;  %v2100_v20 = vpack.c.bf16 %v2069_v33, %v2069_v33  ;;  %v2178_v54 = vunpack.c.l.bf16 %v2099_v36 }
 0x1d0   : > { %v5569_v13 = vadd.f32 %v6468_v46, %v1799_v4  ;;  %v1881_v9 = vsel %vm1495_vm1, %v1879_v40, %v1880_v58  ;;  %v1975_v22 = vadd.f32 %v1879_v40, %v1767_v16  ;;  %v2431_v56 = vmul.f32 %v4867_v25, %v5108_v35 }
 0x1d1   : > { %v1606_v37 = vadd.f32 %v1512_v24, %v1411_v41  ;;  %v1607_v55 = vadd.f32 %v1511_v60, %v1412_v62  ;;  %v2179_v30 = vunpack.c.l.bf16 %v2100_v20  ;;  %v2245_v52 = vrot.slane %v2178_v54, 1 }
 0x1d2   : > { %6469 = vst [vmem:[#allocation29_spill] sm:$0xff] %v5569_v13  ;;  %v2023_v50 = vpack.c.bf16 %v1975_v22, %v1975_v22  ;;  %v2432_v34 = vmul.f32 %v4867_v25, %v5135_v17  ;;  %v2462_v14 = vpack.c.bf16 %v2431_v56, %v2431_v56  ;;  %v2813_v53 = vmul.f32 %v4870_v28, %v5146_v49 }
 0x1d3   : > { %v1654_v38 = vpack.c.bf16 %v1606_v37, %v1606_v37  ;;  %v1655_v4 = vpack.c.bf16 %v1607_v55, %v1607_v55  ;;  %v2246_v7 = vrot.slane %v2179_v30, 1  ;;  %v2814_v24 = vmul.f32 %v4870_v28, %v5168_v2 }
 0x1d4   : > { %v2135_v33 = vunpack.c.l.bf16 %v2023_v50  ;;  %v2463_v35 = vpack.c.bf16 %v2432_v34, %v2432_v34  ;;  %v2541_v16 = vunpack.c.l.bf16 %v2462_v14  ;;  %v2846_v46 = vpack.c.bf16 %v2813_v53, %v2813_v53 }
 0x1d5   : > { %v1768_v60 = vunpack.c.l.bf16 %v1654_v38  ;;  %v1769_v40 = vunpack.c.l.bf16 %v1655_v4  ;;  %v2247_v36 = vsel %vm1495_vm1, %v2245_v52, %v2246_v7  ;;  %v2847_v20 = vpack.c.bf16 %v2814_v24, %v2814_v24 }
 0x1d6   : > { %v2339_v41 = vadd.f32 %v2245_v52, %v2135_v33  ;;  %v2542_v17 = vunpack.c.l.bf16 %v2463_v35  ;;  %v2613_v62 = vrot.slane %v2541_v16, 2  ;;  %v2927_v56 = vunpack.c.l.bf16 %v2846_v46 }
 0x1d7   : > { %v1976_v22 = vadd.f32 %v1881_v9, %v1768_v60  ;;  %v1977_v54 = vadd.f32 %v1880_v58, %v1769_v40  ;;  %v3207_v37 = vmul.f32 %v4878_v32, %v5185_v6  ;;  %v2928_v50 = vunpack.c.l.bf16 %v2847_v20 }
 0x1d8   : > { %v2387_v55 = vpack.c.bf16 %v2339_v41, %v2339_v41  ;;  %v2614_v30 = vrot.slane %v2542_v17, 2  ;;  %v3208_v34 = vmul.f32 %v4878_v32, %v5199_v59  ;;  %v3003_v4 = vrot.slane %v2927_v56, 2 }
 0x1d9   : > { %v2024_v14 = vpack.c.bf16 %v1976_v22, %v1976_v22  ;;  %v2025_v38 = vpack.c.bf16 %v1977_v54, %v1977_v54  ;;  %v3238_v53 = vpack.c.bf16 %v3207_v37, %v3207_v37  ;;  %v3004_v9 = vrot.slane %v2928_v50, 2 }
 0x1da   : > { %v2499_v52 = vunpack.c.l.bf16 %v2387_v55  ;;  %v2615_v33 = vsel %vm2594_vm2, %v2613_v62, %v2614_v30  ;;  %v2616_v58 = vsel %vm2594_vm2, %v2614_v30, %v4906_v19  ;;  %v3239_v24 = vpack.c.bf16 %v3208_v34, %v3208_v34 }
 0x1db   : > { %v2136_v35 = vunpack.c.l.bf16 %v2024_v14  ;;  %v2137_v16 = vunpack.c.l.bf16 %v2025_v38  ;;  %v3317_v60 = vunpack.c.l.bf16 %v3238_v53  ;;  %v3005_v46 = vsel %vm2594_vm2, %v3003_v4, %v3004_v9 }
 0x1dc   : > { %v2719_v40 = vadd.f32 %v2613_v62, %v2499_v52  ;;  %v3006_v41 = vsel %vm2594_vm2, %v3004_v9, %v4909_v21  ;;  %v795_v17 = vmul.f32 %v4813_v43, %v5146_v49  ;;  %v3318_v54 = vunpack.c.l.bf16 %v3239_v24 }
 0x1dd   : > { %v2340_v20 = vadd.f32 %v2247_v36, %v2136_v35  ;;  %v2341_v22 = vadd.f32 %v2246_v7, %v2137_v16  ;;  %v3389_v56 = vrot.slane %v3317_v60, 2  ;;  %v796_v55 = vmul.f32 %v4813_v43, %v5168_v2 }
 0x1de   : > { %v2767_v37 = vpack.c.bf16 %v2719_v40, %v2719_v40  ;;  %v919_v30 = vpack.c.bf16 %v795_v17, %v795_v17  ;;  %v959_v62 = vmul.f32 %v4815_v44, %v5185_v6  ;;  %v3390_v14 = vrot.slane %v3318_v54, 2 }
 0x1df   : > { %v2388_v50 = vpack.c.bf16 %v2340_v20, %v2340_v20  ;;  %v2389_v34 = vpack.c.bf16 %v2341_v22, %v2341_v22  ;;  %v960_v38 = vmul.f32 %v4815_v44, %v5199_v59  ;;  %v920_v52 = vpack.c.bf16 %v796_v55, %v796_v55 }
 0x1e0   : > { %v2883_v53 = vunpack.c.l.bf16 %v2767_v37  ;;  %v992_v36 = vpack.c.bf16 %v959_v62, %v959_v62  ;;  %v1023_v7 = vunpack.c.l.bf16 %v919_v30  ;;  %v3391_v16 = vsel %vm2594_vm2, %v3389_v56, %v3390_v14 }
 0x1e1   : > { %v2500_v9 = vunpack.c.l.bf16 %v2388_v50  ;;  %v2501_v35 = vunpack.c.l.bf16 %v2389_v34  ;;  %v3392_v24 = vsel %vm2594_vm2, %v3390_v14, %v4914_v27  ;;  %v993_v40 = vpack.c.bf16 %v960_v38, %v960_v38 }
 0x1e2   : > { %v3110_v60 = vadd.f32 %v3003_v4, %v2883_v53  ;;  %v1024_v17 = vunpack.c.l.bf16 %v920_v52  ;;  %v1056_v20 = vunpack.c.l.bf16 %v992_v36  ;;  %v1157_v8 = vmul.f32 %v4830_v57, %v5242_v1 }
 0x1e3   : > { %v2720_v22 = vadd.f32 %v2615_v33, %v2500_v9  ;;  %v2721_v54 = vadd.f32 %v2616_v58, %v2501_v35  ;;  %v1158_v37 = vmul.f32 %v4830_v57, %v5244_v11  ;;  %v1057_v30 = vunpack.c.l.bf16 %v993_v40 }
 0x1e4   : > { %v3158_v55 = vpack.c.bf16 %v3110_v60, %v3110_v60  ;;  %v1089_v62 = vadd.f32 %v1056_v20, %v1023_v7  ;;  %v1349_v50 = vmul.f32 %v4837_v0, %v5146_v49  ;;  %v1188_v4 = vpack.c.bf16 %v1157_v8, %v1157_v8 }
 0x1e5   : > { %v2768_v34 = vpack.c.bf16 %v2720_v22, %v2720_v22  ;;  %v2769_v14 = vpack.c.bf16 %v2721_v54, %v2721_v54  ;;  %v1189_v38 = vpack.c.bf16 %v1158_v37, %v1158_v37  ;;  %v1090_v52 = vadd.f32 %v1057_v30, %v1024_v17 }
 0x1e6   : > { %v3273_v53 = vunpack.c.l.bf16 %v3158_v55  ;;  %v1122_v33 = vpack.c.bf16 %v1089_v62, %v1089_v62  ;;  %v1350_v58 = vmul.f32 %v4837_v0, %v5168_v2  ;;  %v1252_v35 = vunpack.c.l.bf16 %v1188_v4 }
 0x1e7   : > { %v2884_v36 = vunpack.c.l.bf16 %v2768_v34  ;;  %v2885_v9 = vunpack.c.l.bf16 %v2769_v14  ;;  %v1253_v13 = vunpack.c.l.bf16 %v1189_v38  ;;  %v1123_v40 = vpack.c.bf16 %v1090_v52, %v1090_v52 }
 0x1e8   : > { %v3492_v60 = vadd.f32 %v3389_v56, %v3273_v53  ;;  %v1219_v7 = vunpack.c.l.bf16 %v1122_v33  ;;  %v1380_v20 = vpack.c.bf16 %v1349_v50, %v1349_v50  ;;  %v1381_v22 = vpack.c.bf16 %v1350_v58, %v1350_v58 }
 0x1e9   : > { %v3111_v42 = vadd.f32 %v3005_v46, %v2884_v36  ;;  %v3112_v18 = vadd.f32 %v3006_v41, %v2885_v9  ;;  %v1700_v8 = vmul.f32 %v4886_v45, %v5185_v6  ;;  %v1220_v17 = vunpack.c.l.bf16 %v1123_v40 }
 0x1ea   : > { %v3540_v54 = vpack.c.bf16 %v3492_v60, %v3492_v60  ;;  %v1283_v37 = vadd.f32 %v1252_v35, %v1219_v7  ;;  %v1444_v55 = vunpack.c.l.bf16 %v1380_v20  ;;  %v1445_v34 = vunpack.c.l.bf16 %v1381_v22 }
 0x1eb   : > { %v3159_v30 = vpack.c.bf16 %v3111_v42, %v3111_v42  ;;  %v3160_v62 = vpack.c.bf16 %v3112_v18, %v3112_v18  ;;  %v1701_v14 = vmul.f32 %v4886_v45, %v5199_v59  ;;  %v1284_v4 = vadd.f32 %v1253_v13, %v1220_v17 }
 0x1ec   : > { %v3588_v56 = vunpack.c.l.bf16 %v3540_v54  ;;  %v1316_v38 = vpack.c.bf16 %v1283_v37, %v1283_v37  ;;  %v1513_v50 = vrot.slane %v1444_v55, 1  ;;  %v1514_v53 = vrot.slane %v1445_v34, 1 }
 0x1ed   : > { %v3274_v46 = vunpack.c.l.bf16 %v3159_v30  ;;  %v3275_v41 = vunpack.c.l.bf16 %v3160_v62  ;;  %v1732_v52 = vpack.c.bf16 %v1700_v8, %v1700_v8  ;;  %v1317_v58 = vpack.c.bf16 %v1284_v4, %v1284_v4 }
 0x1ee   : > { %v3695_v33 = vrot.slane %v3588_v56, 7  ;;  %v1413_v36 = vunpack.c.l.bf16 %v1316_v38  ;;  %v1608_v9 = vadd.f32 %v1513_v50, %v4872_v29  ;;  %v1515_v18 = vsel %vm1495_vm1, %v1513_v50, %v1514_v53 }
 0x1ef   : > { %v3493_v35 = vadd.f32 %v3391_v16, %v3274_v46  ;;  %v3494_v42 = vadd.f32 %v3392_v24, %v3275_v41  ;;  %v1733_v60 = vpack.c.bf16 %v1701_v14, %v1701_v14  ;;  %v1414_v40 = vunpack.c.l.bf16 %v1317_v58 }
 0x1f0   : > { %v1609_v7 = vadd.f32 %v1515_v18, %v1413_v36  ;;  %v1656_v20 = vpack.c.bf16 %v1608_v9, %v1608_v9  ;;  %v1812_v13 = vunpack.c.l.bf16 %v1732_v52  ;;  %v2070_v8 = vmul.f32 %v4911_v23, %v5242_v1 }
 0x1f1   : > { %v3541_v22 = vpack.c.bf16 %v3493_v35, %v3493_v35  ;;  %v3542_v54 = vpack.c.bf16 %v3494_v42, %v3494_v42  ;;  %v1813_v17 = vunpack.c.l.bf16 %v1733_v60  ;;  %v1610_v37 = vadd.f32 %v1514_v53, %v1414_v40 }
 0x1f2   : > { %v1657_v55 = vpack.c.bf16 %v1609_v7, %v1609_v7  ;;  %v1770_v30 = vunpack.c.l.bf16 %v1656_v20  ;;  %v1882_v62 = vrot.slane %v1812_v13, 1  ;;  %v2071_v14 = vmul.f32 %v4911_v23, %v5244_v11 }
 0x1f3   : > { %v3589_v34 = vunpack.c.l.bf16 %v3541_v22  ;;  %v3590_v16 = vunpack.c.l.bf16 %v3542_v54  ;;  %v1883_v24 = vrot.slane %v1813_v17, 1  ;;  %v1658_v56 = vpack.c.bf16 %v1610_v37, %v1610_v37 }
 0x1f4   : > { %v1771_v4 = vunpack.c.l.bf16 %v1657_v55  ;;  %v1978_v38 = vadd.f32 %v1882_v62, %v1770_v30  ;;  %v2101_v50 = vpack.c.bf16 %v2070_v8, %v2070_v8  ;;  %v2102_v58 = vpack.c.bf16 %v2071_v14, %v2071_v14 }
 0x1f5   : > { %v3696_v46 = vrot.slane %v3589_v34, 7  ;;  %v3698_v41 = vrot.slane %v3590_v16, 7  ;;  %v1884_v52 = vsel %vm1495_vm1, %v1882_v62, %v1883_v24  ;;  %v1772_v36 = vunpack.c.l.bf16 %v1658_v56 }
 0x1f6   : > { %v1979_v53 = vadd.f32 %v1884_v52, %v1771_v4  ;;  %v2026_v9 = vpack.c.bf16 %v1978_v38, %v1978_v38  ;;  %v2180_v35 = vunpack.c.l.bf16 %v2101_v50  ;;  %v2181_v60 = vunpack.c.l.bf16 %v2102_v58 }
 0x1f7   : > { %v3697_v42 = vsel %vm3669_vm3, %v3695_v33, %v3696_v46  ;;  %v3699_v18 = vsel %vm3669_vm3, %v3696_v46, %v3698_v41  ;;  %v2433_v40 = vmul.f32 %v4867_v25, %v5146_v49  ;;  %v1980_v13 = vadd.f32 %v1883_v24, %v1772_v36 }
 0x1f8   : > { %v3796_v7 = vmul.f32 %v5380_v51, %v3697_v42  ;;  %v3797_v20 = vmul.f32 %v5380_v51, %v3699_v18  ;;  %v2027_v22 = vpack.c.bf16 %v1979_v53, %v1979_v53  ;;  %v2138_v54 = vunpack.c.l.bf16 %v2026_v9 }
 0x1f9   : > { %v2248_v17 = vrot.slane %v2180_v35, 1  ;;  %v2249_v8 = vrot.slane %v2181_v60, 1  ;;  %v2434_v37 = vmul.f32 %v4867_v25, %v5168_v2  ;;  %v2028_v30 = vpack.c.bf16 %v1980_v13, %v1980_v13 }
 0x1fa   : > { %v3832_v33 = vadd.f32 %v5389_v39, %v3796_v7  ;;  %v3833_v55 = vadd.f32 %v5389_v39, %v3797_v20  ;;  %v2139_v62 = vunpack.c.l.bf16 %v2027_v22  ;;  %v2464_v16 = vpack.c.bf16 %v2433_v40, %v2433_v40 }
 0x1fb   : > { %v2250_v49 = vsel %vm1495_vm1, %v2248_v17, %v2249_v8  ;;  %v2342_v34 = vadd.f32 %v2248_v17, %v2138_v54  ;;  %v2465_v14 = vpack.c.bf16 %v2434_v37, %v2434_v37  ;;  %v2140_v56 = vunpack.c.l.bf16 %v2028_v30 }
 0x1fc   : > { %v3864_v51 = vmax.f32 %v3832_v33, 0.0  ;;  %v3865_v24 = vmax.f32 %v3833_v55, 0.0  ;;  %v2343_v4 = vadd.f32 %v2250_v49, %v2139_v62  ;;  %v2543_v50 = vunpack.c.l.bf16 %v2464_v16 }
 0x1fd   : > { %v2390_v38 = vpack.c.bf16 %v2342_v34, %v2342_v34  ;;  %v2544_v46 = vunpack.c.l.bf16 %v2465_v14  ;;  %v2815_v2 = vmul.f32 %v4870_v28, %v5185_v6  ;;  %v2344_v39 = vadd.f32 %v2249_v8, %v2140_v56 }
 0x1fe   : > { %v3896_v41 = vmin.f32 %v3864_v51, 6.0  ;;  %v3897_v52 = vmin.f32 %v3865_v24, 6.0  ;;  %v2391_v58 = vpack.c.bf16 %v2343_v4, %v2343_v4  ;;  %v2617_v53 = vrot.slane %v2543_v50, 2 }
 0x1ff   : > { %v2502_v36 = vunpack.c.l.bf16 %v2390_v38  ;;  %v2618_v9 = vrot.slane %v2544_v46, 2  ;;  %v2816_v35 = vmul.f32 %v4870_v28, %v5199_v59  ;;  %v2392_v18 = vpack.c.bf16 %v2344_v39, %v2344_v39 }
 0x200   : > { %v3923_v42 = vpack.c.bf16 %v3897_v52, %v3896_v41  ;;  %v2503_v60 = vunpack.c.l.bf16 %v2391_v58  ;;  %v2848_v40 = vpack.c.bf16 %v2815_v2, %v2815_v2  ;;  %v3209_v37 = vmul.f32 %v4878_v32, %v5242_v1 }
 0x201   : > { %v2619_v7 = vsel %vm2594_vm2, %v2617_v53, %v2618_v9  ;;  %v2620_v20 = vsel %vm2594_vm2, %v2618_v9, %v4906_v19  ;;  %v2722_v13 = vadd.f32 %v2617_v53, %v2502_v36  ;;  %v2849_v22 = vpack.c.bf16 %v2816_v35, %v2816_v35 }
 0x202   : > { %4379 = vmatmul.msk.bf16.gmra.mxu1 %vm3966_vm4, %v3923_v42  ;;  %v2504_v54 = vunpack.c.l.bf16 %v2392_v18  ;;  %v2723_v17 = vadd.f32 %v2619_v7, %v2503_v60  ;;  %v2929_v8 = vunpack.c.l.bf16 %v2848_v40  ;;  %v3210_v30 = vmul.f32 %v4878_v32, %v5244_v11 }
 0x203   : > { %v2770_v33 = vpack.c.bf16 %v2722_v13, %v2722_v13  ;;  %v2930_v55 = vunpack.c.l.bf16 %v2849_v22  ;;  %v797_v62 = vmul.f32 %v4813_v43, %v5185_v6  ;;  %v3240_v14 = vpack.c.bf16 %v3209_v37, %v3209_v37 }
 0x204   : > { %v2724_v49 = vadd.f32 %v2620_v20, %v2504_v54  ;;  %v2771_v34 = vpack.c.bf16 %v2723_v17, %v2723_v17  ;;  %v3007_v16 = vrot.slane %v2929_v8, 2  ;;  %v3241_v56 = vpack.c.bf16 %v3210_v30, %v3210_v30 }
 0x205   : > { %v2886_v51 = vunpack.c.l.bf16 %v2770_v33  ;;  %v3008_v24 = vrot.slane %v2930_v55, 2  ;;  %v798_v4 = vmul.f32 %v4813_v43, %v5199_v59  ;;  %v3319_v46 = vunpack.c.l.bf16 %v3240_v14 }
 0x206   : > { %v2772_v38 = vpack.c.bf16 %v2724_v49, %v2724_v49  ;;  %v2887_v50 = vunpack.c.l.bf16 %v2771_v34  ;;  %v921_v2 = vpack.c.bf16 %v797_v62, %v797_v62  ;;  %v3320_v58 = vunpack.c.l.bf16 %v3241_v56 }
 0x207   : > { %v3009_v41 = vsel %vm2594_vm2, %v3007_v16, %v3008_v24  ;;  %v3010_v52 = vsel %vm2594_vm2, %v3008_v24, %v4909_v21  ;;  %v3113_v39 = vadd.f32 %v3007_v16, %v2886_v51  ;;  %v3393_v9 = vrot.slane %v3319_v46, 2 }
 0x208   : > { %v2888_v36 = vunpack.c.l.bf16 %v2772_v38  ;;  %v3114_v53 = vadd.f32 %v3009_v41, %v2887_v50  ;;  %v922_v35 = vpack.c.bf16 %v798_v4, %v798_v4  ;;  %v3394_v18 = vrot.slane %v3320_v58, 2 }
 0x209   : > { %v3161_v42 = vpack.c.bf16 %v3113_v39, %v3113_v39  ;;  %v961_v60 = vmul.f32 %v4815_v44, %v5242_v1  ;;  %v962_v40 = vmul.f32 %v4815_v44, %v5244_v11  ;;  %v1025_v13 = vunpack.c.l.bf16 %v921_v2 }
 0x20a   : > { %v3115_v7 = vadd.f32 %v3010_v52, %v2888_v36  ;;  %v3162_v20 = vpack.c.bf16 %v3114_v53, %v3114_v53  ;;  %v1026_v22 = vunpack.c.l.bf16 %v922_v35  ;;  %v3395_v17 = vsel %vm2594_vm2, %v3393_v9, %v3394_v18 }
 0x20b   : > { %v3276_v54 = vunpack.c.l.bf16 %v3161_v42  ;;  %v3396_v8 = vsel %vm2594_vm2, %v3394_v18, %v4914_v27  ;;  %v994_v37 = vpack.c.bf16 %v961_v60, %v961_v60  ;;  %v995_v30 = vpack.c.bf16 %v962_v40, %v962_v40 }
 0x20c   : > { %v3163_v33 = vpack.c.bf16 %v3115_v7, %v3115_v7  ;;  %v3277_v55 = vunpack.c.l.bf16 %v3162_v20  ;;  %v1159_v62 = vmul.f32 %v4830_v57, %v5255_v15  ;;  %v1160_v16 = vmul.f32 %v4830_v57, %v5294_v61 }
 0x20d   : > { %v3495_v49 = vadd.f32 %v3393_v9, %v3276_v54  ;;  %v1058_v34 = vunpack.c.l.bf16 %v994_v37  ;;  %v1351_v14 = vmul.f32 %v4837_v0, %v5185_v6  ;;  %v1059_v56 = vunpack.c.l.bf16 %v995_v30 }
 0x20e   : > { %v3278_v51 = vunpack.c.l.bf16 %v3163_v33  ;;  %v3496_v24 = vadd.f32 %v3395_v17, %v3277_v55  ;;  %v1190_v4 = vpack.c.bf16 %v1159_v62, %v1159_v62  ;;  %v1191_v46 = vpack.c.bf16 %v1160_v16, %v1160_v16 }
 0x20f   : > { %v3543_v38 = vpack.c.bf16 %v3495_v49, %v3495_v49  ;;  %v1091_v50 = vadd.f32 %v1058_v34, %v1025_v13  ;;  %v1352_v2 = vmul.f32 %v4837_v0, %v5199_v59  ;;  %v1092_v39 = vadd.f32 %v1059_v56, %v1026_v22 }
 0x210   : > { %v3497_v41 = vadd.f32 %v3396_v8, %v3278_v51  ;;  %v3544_v52 = vpack.c.bf16 %v3496_v24, %v3496_v24  ;;  %v1254_v58 = vunpack.c.l.bf16 %v1190_v4  ;;  %v1255_v9 = vunpack.c.l.bf16 %v1191_v46  ;;  %v5676_v51 = vld [vmem:[%s6401_s5] ss:$0 sm:$0xff] }
 0x211   : > { %v3591_v36 = vunpack.c.l.bf16 %v3543_v38  ;;  %v1124_v53 = vpack.c.bf16 %v1091_v50, %v1091_v50  ;;  %v1382_v35 = vpack.c.bf16 %v1351_v14, %v1351_v14  ;;  %v1125_v60 = vpack.c.bf16 %v1092_v39, %v1092_v39  ;;  %v5686_v39 = vld [vmem:[%s6402_s6] ss:$0 sm:$0xff] }
 0x212   : > { %v3545_v42 = vpack.c.bf16 %v3497_v41, %v3497_v41  ;;  %v3592_v18 = vunpack.c.l.bf16 %v3544_v52  ;;  %v1383_v40 = vpack.c.bf16 %v1352_v2, %v1352_v2  ;;  %v1702_v13 = vmul.f32 %v4886_v45, %v5242_v1 }
 0x213   : > { %v3700_v7 = vrot.slane %v3591_v36, 7  ;;  %v1221_v20 = vunpack.c.l.bf16 %v1124_v53  ;;  %v1446_v54 = vunpack.c.l.bf16 %v1382_v35  ;;  %v1222_v8 = vunpack.c.l.bf16 %v1125_v60 }
 0x214   : > { %v3593_v17 = vunpack.c.l.bf16 %v3545_v42  ;;  %v3701_v37 = vrot.slane %v3592_v18, 7  ;;  %v1447_v33 = vunpack.c.l.bf16 %v1383_v40  ;;  %v1703_v30 = vmul.f32 %v4886_v45, %v5244_v11 }
 0x215   : > { %v1285_v22 = vadd.f32 %v1254_v58, %v1221_v20  ;;  %v1516_v55 = vrot.slane %v1446_v54, 1  ;;  %v1734_v62 = vpack.c.bf16 %v1702_v13, %v1702_v13  ;;  %v1286_v16 = vadd.f32 %v1255_v9, %v1222_v8 }
 0x216   : > { %v3702_v49 = vsel %vm3669_vm3, %v3700_v7, %v3701_v37  ;;  %v3703_v34 = vrot.slane %v3593_v17, 7  ;;  %v1517_v14 = vrot.slane %v1447_v33, 1  ;;  %v1735_v38 = vpack.c.bf16 %v1703_v30, %v1703_v30 }
 0x217   : > { %v3798_v24 = vmul.f32 %v5676_v51, %v3702_v49  ;;  %v1318_v56 = vpack.c.bf16 %v1285_v22, %v1285_v22  ;;  %v1611_v4 = vadd.f32 %v1516_v55, %v4872_v29  ;;  %v1319_v46 = vpack.c.bf16 %v1286_v16, %v1286_v16 }
 0x218   : > { %v3704_v50 = vsel %vm3669_vm3, %v3701_v37, %v3703_v34  ;;  %v1518_v2 = vsel %vm1495_vm1, %v1516_v55, %v1517_v14  ;;  %v1814_v41 = vunpack.c.l.bf16 %v1734_v62  ;;  %v1815_v35 = vunpack.c.l.bf16 %v1735_v38 }
 0x219   : > { %v3799_v52 = vmul.f32 %v5676_v51, %v3704_v50  ;;  %v3834_v58 = vadd.f32 %v5686_v39, %v3798_v24  ;;  %v1415_v36 = vunpack.c.l.bf16 %v1318_v56  ;;  %v1659_v53 = vpack.c.bf16 %v1611_v4, %v1611_v4 }
 0x21a   : > { %v1416_v9 = vunpack.c.l.bf16 %v1319_v46  ;;  %v1885_v42 = vrot.slane %v1814_v41, 1  ;;  %v2072_v18 = vmul.f32 %v4911_v23, %v5255_v15  ;;  %v1886_v13 = vrot.slane %v1815_v35, 1 }
 0x21b   : > { %v3835_v60 = vadd.f32 %v5686_v39, %v3799_v52  ;;  %v3866_v40 = vmax.f32 %v3834_v58, 0.0  ;;  %v1612_v7 = vadd.f32 %v1518_v2, %v1415_v36  ;;  %v1773_v20 = vunpack.c.l.bf16 %v1659_v53 }
 0x21c   : > { %v1613_v54 = vadd.f32 %v1517_v14, %v1416_v9  ;;  %v2073_v17 = vmul.f32 %v4911_v23, %v5294_v61  ;;  %v2103_v37 = vpack.c.bf16 %v2072_v18, %v2072_v18  ;;  %v1887_v62 = vsel %vm1495_vm1, %v1885_v42, %v1886_v13 }
 0x21d   : > { %v3867_v8 = vmax.f32 %v3835_v60, 0.0  ;;  %v3898_v33 = vmin.f32 %v3866_v40, 6.0  ;;  %v1660_v22 = vpack.c.bf16 %v1612_v7, %v1612_v7  ;;  %v1981_v55 = vadd.f32 %v1885_v42, %v1773_v20 }
 0x21e   : > { %v1661_v30 = vpack.c.bf16 %v1613_v54, %v1613_v54  ;;  %v2104_v49 = vpack.c.bf16 %v2073_v17, %v2073_v17  ;;  %v2182_v34 = vunpack.c.l.bf16 %v2103_v37  ;;  %v2435_v14 = vmul.f32 %v4867_v25, %v5185_v6 }
 0x21f   : > { %v3899_v16 = vmin.f32 %v3867_v8, 6.0  ;;  %v1774_v24 = vunpack.c.l.bf16 %v1660_v22  ;;  %v2029_v56 = vpack.c.bf16 %v1981_v55, %v1981_v55  ;;  %v2436_v46 = vmul.f32 %v4867_v25, %v5199_v59 }
 0x220   : > { %v1775_v4 = vunpack.c.l.bf16 %v1661_v30  ;;  %v2183_v38 = vunpack.c.l.bf16 %v2104_v49  ;;  %v2251_v50 = vrot.slane %v2182_v34, 1  ;;  %v2466_v58 = vpack.c.bf16 %v2435_v14, %v2435_v14 }
 0x221   : > { %v3924_v2 = vpack.c.bf16 %v3899_v16, %v3898_v33  ;;  %v1982_v41 = vadd.f32 %v1887_v62, %v1774_v24  ;;  %v2141_v52 = vunpack.c.l.bf16 %v2029_v56  ;;  %v2467_v9 = vpack.c.bf16 %v2436_v46, %v2436_v46 }
 0x222   : > { %v1983_v36 = vadd.f32 %v1886_v13, %v1775_v4  ;;  %v2252_v53 = vrot.slane %v2183_v38, 1  ;;  %v2817_v35 = vmul.f32 %v4870_v28, %v5242_v1  ;;  %v2545_v18 = vunpack.c.l.bf16 %v2466_v58 }
 0x223   : > { %4380 = vmatmul.msk.bf16.gmra.mxu1 %vm3966_vm4, %v3924_v2  ;;  %v2030_v42 = vpack.c.bf16 %v1982_v41, %v1982_v41  ;;  %v2345_v6 = vadd.f32 %v2251_v50, %v2141_v52  ;;  %v2818_v60 = vmul.f32 %v4870_v28, %v5244_v11  ;;  %v2546_v7 = vunpack.c.l.bf16 %v2467_v9 }
 0x224   : > { %v2031_v40 = vpack.c.bf16 %v1983_v36, %v1983_v36  ;;  %v2253_v59 = vsel %vm1495_vm1, %v2251_v50, %v2252_v53  ;;  %v2850_v20 = vpack.c.bf16 %v2817_v35, %v2817_v35  ;;  %v2621_v17 = vrot.slane %v2545_v18, 2 }
 0x225   : > { %v2142_v54 = vunpack.c.l.bf16 %v2030_v42  ;;  %v2393_v13 = vpack.c.bf16 %v2345_v6, %v2345_v6  ;;  %v2851_v37 = vpack.c.bf16 %v2818_v60, %v2818_v60  ;;  %v2622_v33 = vrot.slane %v2546_v7, 2 }
 0x226   : > { %v2143_v8 = vunpack.c.l.bf16 %v2031_v40  ;;  %v2931_v22 = vunpack.c.l.bf16 %v2850_v20  ;;  %v3211_v55 = vmul.f32 %v4878_v32, %v5255_v15  ;;  %v3212_v34 = vmul.f32 %v4878_v32, %v5294_v61 }
 0x227   : > { %v2346_v30 = vadd.f32 %v2253_v59, %v2142_v54  ;;  %v2505_v62 = vunpack.c.l.bf16 %v2393_v13  ;;  %v2932_v49 = vunpack.c.l.bf16 %v2851_v37  ;;  %v2623_v24 = vsel %vm2594_vm2, %v2621_v17, %v2622_v33 }
 0x228   : > { %v2347_v16 = vadd.f32 %v2252_v53, %v2143_v8  ;;  %v2624_v56 = vsel %vm2594_vm2, %v2622_v33, %v4906_v19  ;;  %v3011_v14 = vrot.slane %v2931_v22, 2  ;;  %v3242_v46 = vpack.c.bf16 %v3211_v55, %v3211_v55 }
 0x229   : > { %v2394_v4 = vpack.c.bf16 %v2346_v30, %v2346_v30  ;;  %v2725_v38 = vadd.f32 %v2621_v17, %v2505_v62  ;;  %v3012_v50 = vrot.slane %v2932_v49, 2  ;;  %v3243_v41 = vpack.c.bf16 %v3212_v34, %v3212_v34 }
 0x22a   : > { %v2395_v2 = vpack.c.bf16 %v2347_v16, %v2347_v16  ;;  %v799_v52 = vmul.f32 %v4813_v43, %v5242_v1  ;;  %v800_v58 = vmul.f32 %v4813_v43, %v5244_v11  ;;  %v3321_v6 = vunpack.c.l.bf16 %v3242_v46  ;;  %v6470_v46 = vld [vmem:[#allocation13_spill] sm:$0xff] }
 0x22b   : > { %v2506_v36 = vunpack.c.l.bf16 %v2394_v4  ;;  %v2773_v53 = vpack.c.bf16 %v2725_v38, %v2725_v38  ;;  %v3013_v9 = vsel %vm2594_vm2, %v3011_v14, %v3012_v50  ;;  %v3014_v35 = vsel %vm2594_vm2, %v3012_v50, %v4909_v21 }
 0x22c   : > { %v2507_v42 = vunpack.c.l.bf16 %v2395_v2  ;;  %v3322_v18 = vunpack.c.l.bf16 %v3243_v41  ;;  %v923_v60 = vpack.c.bf16 %v799_v52, %v799_v52  ;;  %v924_v7 = vpack.c.bf16 %v800_v58, %v800_v58  ;;  %v6471_v41 = vld [vmem:[#allocation14_spill] sm:$0xff] }
 0x22d   : > { %v2726_v40 = vadd.f32 %v2623_v24, %v2506_v36  ;;  %v2889_v59 = vunpack.c.l.bf16 %v2773_v53  ;;  %v963_v20 = vmul.f32 %v4815_v44, %v5255_v15  ;;  %v3397_v13 = vrot.slane %v3321_v6, 2 }
 0x22e   : > { %v2727_v54 = vadd.f32 %v2624_v56, %v2507_v42  ;;  %v3398_v17 = vrot.slane %v3322_v18, 2  ;;  %v964_v37 = vmul.f32 %v4815_v44, %v5294_v61  ;;  %v1027_v55 = vunpack.c.l.bf16 %v923_v60 }
 0x22f   : > { %v2774_v8 = vpack.c.bf16 %v2726_v40, %v2726_v40  ;;  %v3116_v33 = vadd.f32 %v3011_v14, %v2889_v59  ;;  %v996_v22 = vpack.c.bf16 %v963_v20, %v963_v20  ;;  %v1028_v4 = vunpack.c.l.bf16 %v924_v7 }
 0x230   : > { %v2775_v30 = vpack.c.bf16 %v2727_v54, %v2727_v54  ;;  %v3399_v62 = vsel %vm2594_vm2, %v3397_v13, %v3398_v17  ;;  %v3400_v49 = vsel %vm2594_vm2, %v3398_v17, %v4914_v27  ;;  %v997_v34 = vpack.c.bf16 %v964_v37, %v964_v37 }
 0x231   : > { %v2890_v16 = vunpack.c.l.bf16 %v2774_v8  ;;  %v3164_v24 = vpack.c.bf16 %v3116_v33, %v3116_v33  ;;  %v1060_v56 = vunpack.c.l.bf16 %v996_v22  ;;  %v1161_v2 = vmul.f32 %v4830_v57, %v6470_v46 }
 0x232   : > { %v2891_v38 = vunpack.c.l.bf16 %v2775_v30  ;;  %v1061_v50 = vunpack.c.l.bf16 %v997_v34  ;;  %v1162_v14 = vmul.f32 %v4830_v57, %v6471_v41  ;;  %v1353_v53 = vmul.f32 %v4837_v0, %v5242_v1 }
 0x233   : > { %v3117_v52 = vadd.f32 %v3013_v9, %v2890_v16  ;;  %v3279_v58 = vunpack.c.l.bf16 %v3164_v24  ;;  %v1093_v36 = vadd.f32 %v1060_v56, %v1027_v55  ;;  %v1192_v18 = vpack.c.bf16 %v1161_v2, %v1161_v2 }
 0x234   : > { %v3118_v42 = vadd.f32 %v3014_v35, %v2891_v38  ;;  %v1094_v6 = vadd.f32 %v1061_v50, %v1028_v4  ;;  %v1193_v60 = vpack.c.bf16 %v1162_v14, %v1162_v14  ;;  %v1354_v20 = vmul.f32 %v4837_v0, %v5244_v11 }
 0x235   : > { %v3165_v40 = vpack.c.bf16 %v3117_v52, %v3117_v52  ;;  %v3498_v59 = vadd.f32 %v3397_v13, %v3279_v58  ;;  %v1126_v7 = vpack.c.bf16 %v1093_v36, %v1093_v36  ;;  %v1256_v37 = vunpack.c.l.bf16 %v1192_v18 }
 0x236   : > { %v3166_v54 = vpack.c.bf16 %v3118_v42, %v3118_v42  ;;  %v1127_v17 = vpack.c.bf16 %v1094_v6, %v1094_v6  ;;  %v1257_v8 = vunpack.c.l.bf16 %v1193_v60  ;;  %v1384_v55 = vpack.c.bf16 %v1353_v53, %v1353_v53 }
 0x237   : > { %v3280_v9 = vunpack.c.l.bf16 %v3165_v40  ;;  %v3546_v33 = vpack.c.bf16 %v3498_v59, %v3498_v59  ;;  %v1223_v22 = vunpack.c.l.bf16 %v1126_v7  ;;  %v1385_v35 = vpack.c.bf16 %v1354_v20, %v1354_v20 }
 0x238   : > { %v3281_v30 = vunpack.c.l.bf16 %v3166_v54  ;;  %v1224_v34 = vunpack.c.l.bf16 %v1127_v17  ;;  %v1704_v16 = vmul.f32 %v4886_v45, %v5255_v15  ;;  %v1448_v56 = vunpack.c.l.bf16 %v1384_v55 }
 0x239   : > { %v3499_v24 = vadd.f32 %v3399_v62, %v3280_v9  ;;  %v3594_v13 = vunpack.c.l.bf16 %v3546_v33  ;;  %v1287_v4 = vadd.f32 %v1256_v37, %v1223_v22  ;;  %v1449_v2 = vunpack.c.l.bf16 %v1385_v35 }
 0x23a   : > { %v3500_v38 = vadd.f32 %v3400_v49, %v3281_v30  ;;  %v1288_v50 = vadd.f32 %v1257_v8, %v1224_v34  ;;  %v1705_v14 = vmul.f32 %v4886_v45, %v5294_v61  ;;  %v1519_v53 = vrot.slane %v1448_v56, 1 }
 0x23b   : > { %v3547_v52 = vpack.c.bf16 %v3499_v24, %v3499_v24  ;;  %v3705_v58 = vrot.slane %v3594_v13, 7  ;;  %v1320_v36 = vpack.c.bf16 %v1287_v4, %v1287_v4  ;;  %v1520_v18 = vrot.slane %v1449_v2, 1 }
 0x23c   : > { %v3548_v42 = vpack.c.bf16 %v3500_v38, %v3500_v38  ;;  %v1321_v6 = vpack.c.bf16 %v1288_v50, %v1288_v50  ;;  %v1736_v60 = vpack.c.bf16 %v1704_v16, %v1704_v16  ;;  %v1614_v62 = vadd.f32 %v1519_v53, %v4872_v29 }
 0x23d   : > { %v3595_v40 = vunpack.c.l.bf16 %v3547_v52  ;;  %v1417_v59 = vunpack.c.l.bf16 %v1320_v36  ;;  %v1737_v7 = vpack.c.bf16 %v1705_v14, %v1705_v14  ;;  %v1521_v54 = vsel %vm1495_vm1, %v1519_v53, %v1520_v18 }
 0x23e   : > { %v3596_v20 = vunpack.c.l.bf16 %v3548_v42  ;;  %v1418_v49 = vunpack.c.l.bf16 %v1321_v6  ;;  %v1816_v17 = vunpack.c.l.bf16 %v1736_v60  ;;  %v1662_v9 = vpack.c.bf16 %v1614_v62, %v1614_v62 }
 0x23f   : > { %v3706_v37 = vrot.slane %v3595_v40, 7  ;;  %v1615_v8 = vadd.f32 %v1521_v54, %v1417_v59  ;;  %v1817_v33 = vunpack.c.l.bf16 %v1737_v7  ;;  %v2074_v34 = vmul.f32 %v4911_v23, %v6470_v46 }
 0x240   : > { %v3708_v22 = vrot.slane %v3596_v20, 7  ;;  %v1616_v55 = vadd.f32 %v1520_v18, %v1418_v49  ;;  %v1888_v30 = vrot.slane %v1816_v17, 1  ;;  %v1776_v24 = vunpack.c.l.bf16 %v1662_v9 }
 0x241   : > { %v3707_v35 = vsel %vm3669_vm3, %v3705_v58, %v3706_v37  ;;  %v1663_v16 = vpack.c.bf16 %v1615_v8, %v1615_v8  ;;  %v1889_v13 = vrot.slane %v1817_v33, 1  ;;  %v2075_v50 = vmul.f32 %v4911_v23, %v6471_v41 }
 0x242   : > { %v3709_v4 = vsel %vm3669_vm3, %v3706_v37, %v3708_v22  ;;  %v3800_v56 = vmul.f32 %v5676_v51, %v3707_v35  ;;  %v1664_v38 = vpack.c.bf16 %v1616_v55, %v1616_v55  ;;  %v1984_v36 = vadd.f32 %v1888_v30, %v1776_v24 }
 0x243   : > { %v3801_v2 = vmul.f32 %v5676_v51, %v3709_v4  ;;  %v1777_v14 = vunpack.c.l.bf16 %v1663_v16  ;;  %v1890_v52 = vsel %vm1495_vm1, %v1888_v30, %v1889_v13  ;;  %v2105_v42 = vpack.c.bf16 %v2074_v34, %v2074_v34 }
 0x244   : > { %v3836_v53 = vadd.f32 %v5686_v39, %v3800_v56  ;;  %v1778_v58 = vunpack.c.l.bf16 %v1664_v38  ;;  %v2106_v6 = vpack.c.bf16 %v2075_v50, %v2075_v50  ;;  %v2032_v40 = vpack.c.bf16 %v1984_v36, %v1984_v36 }
 0x245   : > { %v3837_v18 = vadd.f32 %v5686_v39, %v3801_v2  ;;  %v1985_v60 = vadd.f32 %v1890_v52, %v1777_v14  ;;  %v2437_v59 = vmul.f32 %v4867_v25, %v5242_v1  ;;  %v2184_v20 = vunpack.c.l.bf16 %v2105_v42 }
 0x246   : > { %v3868_v62 = vmax.f32 %v3836_v53, 0.0  ;;  %v1986_v7 = vadd.f32 %v1889_v13, %v1778_v58  ;;  %v2185_v49 = vunpack.c.l.bf16 %v2106_v6  ;;  %v2144_v37 = vunpack.c.l.bf16 %v2032_v40 }
 0x247   : > { %v3869_v54 = vmax.f32 %v3837_v18, 0.0  ;;  %v2033_v17 = vpack.c.bf16 %v1985_v60, %v1985_v60  ;;  %v2438_v8 = vmul.f32 %v4867_v25, %v5244_v11  ;;  %v2254_v22 = vrot.slane %v2184_v20, 1 }
 0x248   : > { %v3900_v9 = vmin.f32 %v3868_v62, 6.0  ;;  %v2034_v33 = vpack.c.bf16 %v1986_v7, %v1986_v7  ;;  %v2255_v55 = vrot.slane %v2185_v49, 1  ;;  %v2468_v35 = vpack.c.bf16 %v2437_v59, %v2437_v59 }
 0x249   : > { %v3901_v30 = vmin.f32 %v3869_v54, 6.0  ;;  %v2145_v34 = vunpack.c.l.bf16 %v2033_v17  ;;  %v2469_v16 = vpack.c.bf16 %v2438_v8, %v2438_v8  ;;  %v2348_v13 = vadd.f32 %v2254_v22, %v2144_v37 }
 0x24a   : > { %v2146_v24 = vunpack.c.l.bf16 %v2034_v33  ;;  %v2256_v1 = vsel %vm1495_vm1, %v2254_v22, %v2255_v55  ;;  %v2819_v4 = vmul.f32 %v4870_v28, %v5255_v15  ;;  %v2547_v50 = vunpack.c.l.bf16 %v2468_v35 }
 0x24b   : > { %v3925_v56 = vpack.c.bf16 %v3901_v30, %v3900_v9  ;;  %v2349_v38 = vadd.f32 %v2256_v1, %v2145_v34  ;;  %v2548_v2 = vunpack.c.l.bf16 %v2469_v16  ;;  %v2396_v14 = vpack.c.bf16 %v2348_v13, %v2348_v13  ;;  %v5771_v30 = vld [vmem:[%s6404_s8] ss:$0 sm:$0xff] }
 0x24c   : > { %v2350_v11 = vadd.f32 %v2255_v55, %v2146_v24  ;;  %v2820_v52 = vmul.f32 %v4870_v28, %v5294_v61  ;;  %v2852_v36 = vpack.c.bf16 %v2819_v4, %v2819_v4  ;;  %v2625_v58 = vrot.slane %v2547_v50, 2  ;;  %v4024_v55 = vpop.f32.mrf.mxu1  ;;  %v5776_v34 = vld [vmem:[%s6405_s9] ss:$0 sm:$0xff] }
 0x24d   : > { %4381 = vmatmul.msk.bf16.gmra.mxu1 %vm3966_vm4, %v3925_v56  ;;  %v2397_v53 = vpack.c.bf16 %v2349_v38, %v2349_v38  ;;  %v2626_v42 = vrot.slane %v2548_v2, 2  ;;  %v3213_v6 = vmul.f32 %v4878_v32, %v6470_v46  ;;  %v2508_v60 = vunpack.c.l.bf16 %v2396_v14 }
 0x24e   : > { %v2398_v18 = vpack.c.bf16 %v2350_v11, %v2350_v11  ;;  %v2853_v40 = vpack.c.bf16 %v2820_v52, %v2820_v52  ;;  %v2933_v59 = vunpack.c.l.bf16 %v2852_v36  ;;  %v3214_v49 = vmul.f32 %v4878_v32, %v6471_v41 }
 0x24f   : > { %v2509_v62 = vunpack.c.l.bf16 %v2397_v53  ;;  %v2627_v7 = vsel %vm2594_vm2, %v2625_v58, %v2626_v42  ;;  %v2628_v20 = vsel %vm2594_vm2, %v2626_v42, %v4906_v19  ;;  %v2728_v17 = vadd.f32 %v2625_v58, %v2508_v60 }
 0x250   : > { %v2510_v54 = vunpack.c.l.bf16 %v2398_v18  ;;  %v2934_v37 = vunpack.c.l.bf16 %v2853_v40  ;;  %v3015_v8 = vrot.slane %v2933_v59, 2  ;;  %v3244_v33 = vpack.c.bf16 %v3213_v6, %v3213_v6 }
 0x251   : > { %v2729_v9 = vadd.f32 %v2627_v7, %v2509_v62  ;;  %v3245_v22 = vpack.c.bf16 %v3214_v49, %v3214_v49  ;;  %v801_v35 = vmul.f32 %v4813_v43, %v5255_v15  ;;  %v2776_v24 = vpack.c.bf16 %v2728_v17, %v2728_v17 }
 0x252   : > { %v2730_v16 = vadd.f32 %v2628_v20, %v2510_v54  ;;  %v3016_v1 = vrot.slane %v2934_v37, 2  ;;  %v802_v13 = vmul.f32 %v4813_v43, %v5294_v61  ;;  %v3323_v56 = vunpack.c.l.bf16 %v3244_v33  ;;  %v4471_v20 = vld [vmem:[%s4761_s28] sm:$0xff] }
 0x253   : > { %v2777_v4 = vpack.c.bf16 %v2729_v9, %v2729_v9  ;;  %v3324_v38 = vunpack.c.l.bf16 %v3245_v22  ;;  %v4108_v50 = vmul.f32 %v5771_v30, %v4024_v55  ;;  %v2892_v11 = vunpack.c.l.bf16 %v2776_v24 }
 0x254   : > { %v2778_v2 = vpack.c.bf16 %v2730_v16, %v2730_v16  ;;  %v3017_v14 = vsel %vm2594_vm2, %v3015_v8, %v3016_v1  ;;  %v3018_v52 = vsel %vm2594_vm2, %v3016_v1, %v4909_v21  ;;  %v3401_v53 = vrot.slane %v3323_v56, 2 }
 0x255   : > { %v2893_v36 = vunpack.c.l.bf16 %v2777_v4  ;;  %v3402_v58 = vrot.slane %v3324_v38, 2  ;;  %v4144_v42 = vadd.f32 %v5776_v34, %v4108_v50  ;;  %v3119_v18 = vadd.f32 %v3015_v8, %v2892_v11  ;;  %v4026_v8 = vpop.f32.mrf.mxu1  ;;  %v6473_v50 = vld [vmem:[#allocation16_spill] sm:$0xff] }
 0x256   : > { %v2894_v6 = vunpack.c.l.bf16 %v2778_v2  ;;  %v925_v60 = vpack.c.bf16 %v801_v35, %v801_v35  ;;  %v926_v40 = vpack.c.bf16 %v802_v13, %v802_v13  ;;  %v965_v37 = vmul.f32 %v4815_v44, %v6470_v46  ;;  %v6472_v35 = vld [vmem:[#allocation15_spill] sm:$0xff] }
 0x257   : > { %v3120_v59 = vadd.f32 %v3017_v14, %v2893_v36  ;;  %v3403_v62 = vsel %vm2594_vm2, %v3401_v53, %v3402_v58  ;;  %v3404_v7 = vsel %vm2594_vm2, %v3402_v58, %v4914_v27  ;;  %v4176_v49 = vadd.f32 %v4471_v20, %v4144_v42  ;;  %v4472_v20 = vld [vmem:[%s4761_s28 + $0x8] sm:$0xff] }
 0x258   : > { %v3121_v54 = vadd.f32 %v3018_v52, %v2894_v6  ;;  %v3167_v17 = vpack.c.bf16 %v3119_v18, %v3119_v18  ;;  %v966_v9 = vmul.f32 %v4815_v44, %v6471_v41  ;;  %v1029_v22 = vunpack.c.l.bf16 %v925_v60 }
 0x259   : > { %v3168_v33 = vpack.c.bf16 %v3120_v59, %v3120_v59  ;;  %4208 = vst.msk [vmem:[%s5797_s21] sm:$0xff] %vm437_vm0, %v4176_v49  ;;  %v1030_v55 = vunpack.c.l.bf16 %v926_v40  ;;  %v1163_v16 = vmul.f32 %v4830_v57, %v6472_v35  ;;  %v4109_v13 = vmul.f32 %v5771_v30, %v4026_v8 }
 0x25a   : > { %v3169_v24 = vpack.c.bf16 %v3121_v54, %v3121_v54  ;;  %v3282_v1 = vunpack.c.l.bf16 %v3167_v17  ;;  %v998_v4 = vpack.c.bf16 %v965_v37, %v965_v37  ;;  %v999_v38 = vpack.c.bf16 %v966_v9, %v966_v9 }
 0x25b   : > { %v3283_v56 = vunpack.c.l.bf16 %v3168_v33  ;;  %v1164_v2 = vmul.f32 %v4830_v57, %v6473_v50  ;;  %v1194_v11 = vpack.c.bf16 %v1163_v16, %v1163_v16  ;;  %v4145_v36 = vadd.f32 %v5776_v34, %v4109_v13 }
 0x25c   : > { %v3284_v14 = vunpack.c.l.bf16 %v3169_v24  ;;  %v3501_v52 = vadd.f32 %v3401_v53, %v3282_v1  ;;  %v1062_v58 = vunpack.c.l.bf16 %v998_v4  ;;  %v1063_v6 = vunpack.c.l.bf16 %v999_v38 }
 0x25d   : > { %v3502_v42 = vadd.f32 %v3403_v62, %v3283_v56  ;;  %v1195_v18 = vpack.c.bf16 %v1164_v2, %v1164_v2  ;;  %v1258_v60 = vunpack.c.l.bf16 %v1194_v11  ;;  %v4177_v49 = vadd.f32 %v4472_v20, %v4145_v36 }
 0x25e   : > { %v3503_v40 = vadd.f32 %v3404_v7, %v3284_v14  ;;  %v3549_v59 = vpack.c.bf16 %v3501_v52, %v3501_v52  ;;  %v1095_v54 = vadd.f32 %v1062_v58, %v1029_v22  ;;  %v1096_v37 = vadd.f32 %v1063_v6, %v1030_v55 }
 0x25f   : > { %v3550_v17 = vpack.c.bf16 %v3502_v42, %v3502_v42  ;;  %v1259_v9 = vunpack.c.l.bf16 %v1195_v18  ;;  %v1355_v33 = vmul.f32 %v4837_v0, %v5255_v15  ;;  %4209 = vst.msk [vmem:[%s5797_s21 + $0x8] sm:$0xff] %vm437_vm0, %v4177_v49  ;;  %v1356_v62 = vmul.f32 %v4837_v0, %v5294_v61 }
 0x260   : > { %v3551_v53 = vpack.c.bf16 %v3503_v40, %v3503_v40  ;;  %v3597_v8 = vunpack.c.l.bf16 %v3549_v59  ;;  %v1128_v16 = vpack.c.bf16 %v1095_v54, %v1095_v54  ;;  %v1129_v7 = vpack.c.bf16 %v1096_v37, %v1096_v37 }
 0x261   : > { %v3598_v24 = vunpack.c.l.bf16 %v3550_v17  ;;  %v1386_v1 = vpack.c.bf16 %v1355_v33, %v1355_v33  ;;  %v1706_v22 = vmul.f32 %v4886_v45, %v6470_v46  ;;  %v1387_v56 = vpack.c.bf16 %v1356_v62, %v1356_v62 }
 0x262   : > { %v3599_v13 = vunpack.c.l.bf16 %v3551_v53  ;;  %v3710_v55 = vrot.slane %v3597_v8, 7  ;;  %v1225_v4 = vunpack.c.l.bf16 %v1128_v16  ;;  %v1226_v2 = vunpack.c.l.bf16 %v1129_v7 }
 0x263   : > { %v3711_v38 = vrot.slane %v3598_v24, 7  ;;  %v1450_v11 = vunpack.c.l.bf16 %v1386_v1  ;;  %v1707_v14 = vmul.f32 %v4886_v45, %v6471_v41  ;;  %v1451_v58 = vunpack.c.l.bf16 %v1387_v56 }
 0x264   : > { %v3713_v52 = vrot.slane %v3599_v13, 7  ;;  %v1289_v36 = vadd.f32 %v1258_v60, %v1225_v4  ;;  %v1738_v42 = vpack.c.bf16 %v1706_v22, %v1706_v22  ;;  %v1290_v18 = vadd.f32 %v1259_v9, %v1226_v2 }
 0x265   : > { %v3712_v6 = vsel %vm3669_vm3, %v3710_v55, %v3711_v38  ;;  %v1522_v40 = vrot.slane %v1450_v11, 1  ;;  %v1739_v59 = vpack.c.bf16 %v1707_v14, %v1707_v14  ;;  %v1523_v17 = vrot.slane %v1451_v58, 1 }
 0x266   : > { %v3714_v20 = vsel %vm3669_vm3, %v3711_v38, %v3713_v52  ;;  %v3802_v49 = vmul.f32 %v5676_v51, %v3712_v6  ;;  %v1322_v54 = vpack.c.bf16 %v1289_v36, %v1289_v36  ;;  %v1323_v33 = vpack.c.bf16 %v1290_v18, %v1290_v18 }
 0x267   : > { %v3803_v37 = vmul.f32 %v5676_v51, %v3714_v20  ;;  %v1617_v53 = vadd.f32 %v1522_v40, %v4872_v29  ;;  %v1818_v8 = vunpack.c.l.bf16 %v1738_v42  ;;  %v1524_v62 = vsel %vm1495_vm1, %v1522_v40, %v1523_v17 }
 0x268   : > { %v3838_v60 = vadd.f32 %v5686_v39, %v3802_v49  ;;  %v1419_v16 = vunpack.c.l.bf16 %v1322_v54  ;;  %v1819_v9 = vunpack.c.l.bf16 %v1739_v59  ;;  %v1420_v7 = vunpack.c.l.bf16 %v1323_v33 }
 0x269   : > { %v3839_v24 = vadd.f32 %v5686_v39, %v3803_v37  ;;  %v1665_v1 = vpack.c.bf16 %v1617_v53, %v1617_v53  ;;  %v1891_v22 = vrot.slane %v1818_v8, 1  ;;  %v2076_v56 = vmul.f32 %v4911_v23, %v6472_v35 }
 0x26a   : > { %v3870_v13 = vmax.f32 %v3838_v60, 0.0  ;;  %v1618_v55 = vadd.f32 %v1524_v62, %v1419_v16  ;;  %v1892_v4 = vrot.slane %v1819_v9, 1  ;;  %v1619_v2 = vadd.f32 %v1523_v17, %v1420_v7 }
 0x26b   : > { %v3871_v38 = vmax.f32 %v3839_v24, 0.0  ;;  %v1779_v11 = vunpack.c.l.bf16 %v1665_v1  ;;  %v2077_v14 = vmul.f32 %v4911_v23, %v6473_v50  ;;  %v2107_v42 = vpack.c.bf16 %v2076_v56, %v2076_v56 }
 0x26c   : > { %v3902_v52 = vmin.f32 %v3870_v13, 6.0  ;;  %v1666_v36 = vpack.c.bf16 %v1618_v55, %v1618_v55  ;;  %v1893_v58 = vsel %vm1495_vm1, %v1891_v22, %v1892_v4  ;;  %v1667_v18 = vpack.c.bf16 %v1619_v2, %v1619_v2 }
 0x26d   : > { %v3903_v6 = vmin.f32 %v3871_v38, 6.0  ;;  %v1987_v40 = vadd.f32 %v1891_v22, %v1779_v11  ;;  %v2108_v59 = vpack.c.bf16 %v2077_v14, %v2077_v14  ;;  %v2186_v49 = vunpack.c.l.bf16 %v2107_v42 }
 0x26e   : > { %v1780_v20 = vunpack.c.l.bf16 %v1666_v36  ;;  %v2439_v54 = vmul.f32 %v4867_v25, %v5255_v15  ;;  %v2440_v17 = vmul.f32 %v4867_v25, %v5294_v61  ;;  %v1781_v33 = vunpack.c.l.bf16 %v1667_v18 }
 0x26f   : > { %v3926_v37 = vpack.c.bf16 %v3903_v6, %v3902_v52  ;;  %v2035_v53 = vpack.c.bf16 %v1987_v40, %v1987_v40  ;;  %v2187_v8 = vunpack.c.l.bf16 %v2108_v59  ;;  %v2257_v16 = vrot.slane %v2186_v49, 1 }
 0x270   : > { %v1988_v60 = vadd.f32 %v1893_v58, %v1780_v20  ;;  %v2470_v62 = vpack.c.bf16 %v2439_v54, %v2439_v54  ;;  %v2471_v9 = vpack.c.bf16 %v2440_v17, %v2440_v17  ;;  %v1989_v24 = vadd.f32 %v1892_v4, %v1781_v33 }
 0x271   : > { %4382 = vmatmul.msk.bf16.vlgmr.msra.gmra.mxu2 %vm3966_vm4, %v3926_v37  ;;  %v2147_v7 = vunpack.c.l.bf16 %v2035_v53  ;;  %v2258_v1 = vrot.slane %v2187_v8, 1  ;;  %v2821_v22 = vmul.f32 %v4870_v28, %v6470_v46  ;;  %v2822_v61 = vmul.f32 %v4870_v28, %v6471_v41 }
 0x272   : > { %v2036_v15 = vpack.c.bf16 %v1988_v60, %v1988_v60  ;;  %v2549_v13 = vunpack.c.l.bf16 %v2470_v62  ;;  %v2550_v55 = vunpack.c.l.bf16 %v2471_v9  ;;  %v2037_v56 = vpack.c.bf16 %v1989_v24, %v1989_v24 }
 0x273   : > { %v2259_v38 = vsel %vm1495_vm1, %v2257_v16, %v2258_v1  ;;  %v2351_v2 = vadd.f32 %v2257_v16, %v2147_v7  ;;  %v2854_v11 = vpack.c.bf16 %v2821_v22, %v2821_v22  ;;  %v2855_v4 = vpack.c.bf16 %v2822_v61, %v2822_v61 }
 0x274   : > { %v2148_v14 = vunpack.c.l.bf16 %v2036_v15  ;;  %v2629_v52 = vrot.slane %v2549_v13, 2  ;;  %v2630_v36 = vrot.slane %v2550_v55, 2  ;;  %v2149_v58 = vunpack.c.l.bf16 %v2037_v56 }
 0x275   : > { %v2399_v42 = vpack.c.bf16 %v2351_v2, %v2351_v2  ;;  %v2935_v6 = vunpack.c.l.bf16 %v2854_v11  ;;  %v3215_v18 = vmul.f32 %v4878_v32, %v6472_v35  ;;  %v2936_v49 = vunpack.c.l.bf16 %v2855_v4 }
 0x276   : > { %v2352_v40 = vadd.f32 %v2259_v38, %v2148_v14  ;;  %v2631_v59 = vsel %vm2594_vm2, %v2629_v52, %v2630_v36  ;;  %v2632_v20 = vsel %vm2594_vm2, %v2630_v36, %v4906_v19  ;;  %v2353_v54 = vadd.f32 %v2258_v1, %v2149_v58  ;;  %v4029_v14 = vpop.f32.mrf.mxu1 }
 0x277   : > { %v2511_v17 = vunpack.c.l.bf16 %v2399_v42  ;;  %v3019_v37 = vrot.slane %v2935_v6, 2  ;;  %v3216_v33 = vmul.f32 %v4878_v32, %v6473_v50  ;;  %v3020_v8 = vrot.slane %v2936_v49, 2 }
 0x278   : > { %v2400_v53 = vpack.c.bf16 %v2352_v40, %v2352_v40  ;;  %v3246_v60 = vpack.c.bf16 %v3215_v18, %v3215_v18  ;;  %v803_v16 = vmul.f32 %v4813_v43, %v6470_v46  ;;  %v2401_v62 = vpack.c.bf16 %v2353_v54, %v2353_v54 }
 0x279   : > { %v2731_v9 = vadd.f32 %v2629_v52, %v2511_v17  ;;  %v3247_v24 = vpack.c.bf16 %v3216_v33, %v3216_v33  ;;  %v804_v7 = vmul.f32 %v4813_v43, %v6471_v41  ;;  %v3021_v1 = vsel %vm2594_vm2, %v3019_v37, %v3020_v8 }
 0x27a   : > { %v2512_v22 = vunpack.c.l.bf16 %v2400_v53  ;;  %v3022_v15 = vsel %vm2594_vm2, %v3020_v8, %v4909_v21  ;;  %v3325_v13 = vunpack.c.l.bf16 %v3246_v60  ;;  %v2513_v55 = vunpack.c.l.bf16 %v2401_v62 }
 0x27b   : > { %v2779_v61 = vpack.c.bf16 %v2731_v9, %v2731_v9  ;;  %v3326_v56 = vunpack.c.l.bf16 %v3247_v24  ;;  %v927_v38 = vpack.c.bf16 %v803_v16, %v803_v16  ;;  %v928_v36 = vpack.c.bf16 %v804_v7, %v804_v7  ;;  %v6474_v7 = vld [vmem:[#allocation17_spill] sm:$0xff] }
 0x27c   : > { %v2732_v2 = vadd.f32 %v2631_v59, %v2512_v22  ;;  %v3405_v11 = vrot.slane %v3325_v13, 2  ;;  %v967_v52 = vmul.f32 %v4815_v44, %v6472_v35  ;;  %v2733_v4 = vadd.f32 %v2632_v20, %v2513_v55  ;;  %v4473_v55 = vld [vmem:[%s4761_s28 + $0x10] sm:$0xff] }
 0x27d   : > { %v2895_v58 = vunpack.c.l.bf16 %v2779_v61  ;;  %v3406_v42 = vrot.slane %v3326_v56, 2  ;;  %v4110_v6 = vmul.f32 %v5771_v30, %v4029_v14  ;;  %v968_v40 = vmul.f32 %v4815_v44, %v6473_v50  ;;  %v6475_v56 = vld [vmem:[#allocation18_spill] sm:$0xff] }
 0x27e   : > { %v2780_v18 = vpack.c.bf16 %v2732_v2, %v2732_v2  ;;  %v1000_v49 = vpack.c.bf16 %v967_v52, %v967_v52  ;;  %v1031_v54 = vunpack.c.l.bf16 %v927_v38  ;;  %v2781_v17 = vpack.c.bf16 %v2733_v4, %v2733_v4 }
 0x27f   : > { %v3122_v59 = vadd.f32 %v3019_v37, %v2895_v58  ;;  %v3407_v33 = vsel %vm2594_vm2, %v3405_v11, %v3406_v42  ;;  %v3408_v53 = vsel %vm2594_vm2, %v3406_v42, %v4914_v27  ;;  %v4146_v20 = vadd.f32 %v5776_v34, %v4110_v6 }
 0x280   : > { %v2896_v8 = vunpack.c.l.bf16 %v2780_v18  ;;  %v1001_v60 = vpack.c.bf16 %v968_v40, %v968_v40  ;;  %v1032_v16 = vunpack.c.l.bf16 %v928_v36  ;;  %v2897_v62 = vunpack.c.l.bf16 %v2781_v17  ;;  %v4031_v36 = vpop.f32.mrf.mxu1 }
 0x281   : > { %v3170_v9 = vpack.c.bf16 %v3122_v59, %v3122_v59  ;;  %v1064_v24 = vunpack.c.l.bf16 %v1000_v49  ;;  %v1165_v22 = vmul.f32 %v4830_v57, %v6474_v7  ;;  %v4178_v37 = vadd.f32 %v4473_v55, %v4146_v20 }
 0x282   : > { %v3123_v13 = vadd.f32 %v3021_v1, %v2896_v8  ;;  %v1065_v61 = vunpack.c.l.bf16 %v1001_v60  ;;  %v1166_v38 = vmul.f32 %v4830_v57, %v6475_v56  ;;  %v3124_v2 = vadd.f32 %v3022_v15, %v2897_v62 }
 0x283   : > { %v3285_v14 = vunpack.c.l.bf16 %v3170_v9  ;;  %v1097_v52 = vadd.f32 %v1064_v24, %v1031_v54  ;;  %v1196_v4 = vpack.c.bf16 %v1165_v22, %v1165_v22  ;;  %4210 = vst.msk [vmem:[%s5797_s21 + $0x10] sm:$0xff] %vm437_vm0, %v4178_v37  ;;  %v1357_v18 = vmul.f32 %v4837_v0, %v6470_v46  ;;  %v4474_v37 = vld [vmem:[%s4761_s28 + $0x18] sm:$0xff] }
 0x284   : > { %v3171_v58 = vpack.c.bf16 %v3123_v13, %v3123_v13  ;;  %v1098_v42 = vadd.f32 %v1065_v61, %v1032_v16  ;;  %v1197_v6 = vpack.c.bf16 %v1166_v38, %v1166_v38  ;;  %v3172_v1 = vpack.c.bf16 %v3124_v2, %v3124_v2 }
 0x285   : > { %v3504_v40 = vadd.f32 %v3405_v11, %v3285_v14  ;;  %v4111_v49 = vmul.f32 %v5771_v30, %v4031_v36  ;;  %v1130_v17 = vpack.c.bf16 %v1097_v52, %v1097_v52  ;;  %v1260_v8 = vunpack.c.l.bf16 %v1196_v4 }
 0x286   : > { %v3286_v59 = vunpack.c.l.bf16 %v3171_v58  ;;  %v1131_v15 = vpack.c.bf16 %v1098_v42, %v1098_v42  ;;  %v1261_v54 = vunpack.c.l.bf16 %v1197_v6  ;;  %v3287_v20 = vunpack.c.l.bf16 %v3172_v1 }
 0x287   : > { %v3552_v60 = vpack.c.bf16 %v3504_v40, %v3504_v40  ;;  %v4147_v62 = vadd.f32 %v5776_v34, %v4111_v49  ;;  %v1227_v9 = vunpack.c.l.bf16 %v1130_v17  ;;  %v1358_v22 = vmul.f32 %v4837_v0, %v6471_v41 }
 0x288   : > { %v3505_v16 = vadd.f32 %v3407_v33, %v3286_v59  ;;  %v1228_v24 = vunpack.c.l.bf16 %v1131_v15  ;;  %v1388_v11 = vpack.c.bf16 %v1357_v18, %v1357_v18  ;;  %v3506_v13 = vadd.f32 %v3408_v53, %v3287_v20 }
 0x289   : > { %v3600_v55 = vunpack.c.l.bf16 %v3552_v60  ;;  %v4179_v61 = vadd.f32 %v4474_v37, %v4147_v62  ;;  %v1291_v38 = vadd.f32 %v1260_v8, %v1227_v9  ;;  %v1389_v52 = vpack.c.bf16 %v1358_v22, %v1358_v22 }
 0x28a   : > { %v3553_v2 = vpack.c.bf16 %v3505_v16, %v3505_v16  ;;  %v1292_v14 = vadd.f32 %v1261_v54, %v1228_v24  ;;  %v1452_v4 = vunpack.c.l.bf16 %v1388_v11  ;;  %v3554_v58 = vpack.c.bf16 %v3506_v13, %v3506_v13 }
 0x28b   : > { %v3715_v36 = vrot.slane %v3600_v55, 7  ;;  %4211 = vst.msk [vmem:[%s5797_s21 + $0x18] sm:$0xff] %vm437_vm0, %v4179_v61  ;;  %v1324_v42 = vpack.c.bf16 %v1291_v38, %v1291_v38  ;;  %v1708_v33 = vmul.f32 %v4886_v45, %v6472_v35  ;;  %v1453_v18 = vunpack.c.l.bf16 %v1389_v52 }
 0x28c   : > { %v3601_v6 = vunpack.c.l.bf16 %v3553_v2  ;;  %v1325_v1 = vpack.c.bf16 %v1292_v14, %v1292_v14  ;;  %v1525_v53 = vrot.slane %v1452_v4, 1  ;;  %v3602_v40 = vunpack.c.l.bf16 %v3554_v58 }
 0x28d   : > { %v1421_v49 = vunpack.c.l.bf16 %v1324_v42  ;;  %v1709_v17 = vmul.f32 %v4886_v45, %v6473_v50  ;;  %v1740_v59 = vpack.c.bf16 %v1708_v33, %v1708_v33  ;;  %v1526_v54 = vrot.slane %v1453_v18, 1 }
 0x28e   : > { %v3716_v15 = vrot.slane %v3601_v6, 7  ;;  %v1422_v8 = vunpack.c.l.bf16 %v1325_v1  ;;  %v1620_v20 = vadd.f32 %v1525_v53, %v4872_v29  ;;  %v3718_v60 = vrot.slane %v3602_v40, 7 }
 0x28f   : > { %v1741_v62 = vpack.c.bf16 %v1709_v17, %v1709_v17  ;;  %v1820_v9 = vunpack.c.l.bf16 %v1740_v59  ;;  %v2078_v16 = vmul.f32 %v4911_v23, %v6474_v7  ;;  %v1527_v22 = vsel %vm1495_vm1, %v1525_v53, %v1526_v54 }
 0x290   : > { %v3717_v24 = vsel %vm3669_vm3, %v3715_v36, %v3716_v15  ;;  %v1622_v11 = vadd.f32 %v1526_v54, %v1422_v8  ;;  %v1668_v13 = vpack.c.bf16 %v1620_v20, %v1620_v20  ;;  %v3719_v55 = vsel %vm3669_vm3, %v3716_v15, %v3718_v60 }
 0x291   : > { %v3804_v37 = vmul.f32 %v5676_v51, %v3717_v24  ;;  %v1621_v61 = vadd.f32 %v1527_v22, %v1421_v49  ;;  %v1821_v38 = vunpack.c.l.bf16 %v1741_v62  ;;  %v3805_v2 = vmul.f32 %v5676_v51, %v3719_v55 }
 0x292   : > { %v1670_v14 = vpack.c.bf16 %v1622_v11, %v1622_v11  ;;  %v1782_v52 = vunpack.c.l.bf16 %v1668_v13  ;;  %v1894_v4 = vrot.slane %v1820_v9, 1  ;;  %v2079_v36 = vmul.f32 %v4911_v23, %v6475_v56 }
 0x293   : > { %v3840_v58 = vadd.f32 %v5686_v39, %v3804_v37  ;;  %v1669_v42 = vpack.c.bf16 %v1621_v61, %v1621_v61  ;;  %v1895_v33 = vrot.slane %v1821_v38, 1  ;;  %v3841_v6 = vadd.f32 %v5686_v39, %v3805_v2 }
 0x294   : > { %v1784_v1 = vunpack.c.l.bf16 %v1670_v14  ;;  %v1990_v18 = vadd.f32 %v1894_v4, %v1782_v52  ;;  %v2109_v53 = vpack.c.bf16 %v2078_v16, %v2078_v16  ;;  %v2110_v51 = vpack.c.bf16 %v2079_v36, %v2079_v36 }
 0x295   : > { %v3872_v40 = vmax.f32 %v3840_v58, 0.0  ;;  %v1783_v49 = vunpack.c.l.bf16 %v1669_v42  ;;  %v1896_v17 = vsel %vm1495_vm1, %v1894_v4, %v1895_v33  ;;  %v3873_v59 = vmax.f32 %v3841_v6, 0.0 }
 0x296   : > { %v1992_v15 = vadd.f32 %v1895_v33, %v1784_v1  ;;  %v2038_v8 = vpack.c.bf16 %v1990_v18, %v1990_v18  ;;  %v2188_v54 = vunpack.c.l.bf16 %v2109_v53  ;;  %v2189_v62 = vunpack.c.l.bf16 %v2110_v51 }
 0x297   : > { %v3904_v20 = vmin.f32 %v3872_v40, 6.0  ;;  %v1991_v60 = vadd.f32 %v1896_v17, %v1783_v49  ;;  %v2441_v9 = vmul.f32 %v4867_v25, %v6470_v46  ;;  %v3905_v24 = vmin.f32 %v3873_v59, 6.0 }
 0x298   : > { %v2040_v39 = vpack.c.bf16 %v1992_v15, %v1992_v15  ;;  %v2150_v22 = vunpack.c.l.bf16 %v2038_v8  ;;  %v2260_v11 = vrot.slane %v2188_v54, 1  ;;  %v2261_v13 = vrot.slane %v2189_v62, 1 }
 0x299   : > { %v2039_v16 = vpack.c.bf16 %v1991_v60, %v1991_v60  ;;  %v2442_v55 = vmul.f32 %v4867_v25, %v6471_v41  ;;  %v2472_v37 = vpack.c.bf16 %v2441_v9, %v2441_v9  ;;  %v3927_v61 = vpack.c.bf16 %v3905_v24, %v3904_v20 }
 0x29a   : > { %v2152_v38 = vunpack.c.l.bf16 %v2040_v39  ;;  %v2354_v2 = vadd.f32 %v2260_v11, %v2150_v22  ;;  %v2823_v14 = vmul.f32 %v4870_v28, %v6472_v35  ;;  %v2262_v4 = vsel %vm1495_vm1, %v2260_v11, %v2261_v13 }
 0x29b   : > { %v2151_v52 = vunpack.c.l.bf16 %v2039_v16  ;;  %v2473_v46 = vpack.c.bf16 %v2442_v55, %v2442_v55  ;;  %v2551_v58 = vunpack.c.l.bf16 %v2472_v37  ;;  %4383 = vmatmul.msk.bf16.gmra.mxu2 %vm3966_vm4, %v3927_v61  ;;  %v2824_v36 = vmul.f32 %v4870_v28, %v6473_v50  ;;  %v4034_v61 = vpop.f32.mrf.mxu1 }
 0x29c   : > { %v2356_v42 = vadd.f32 %v2261_v13, %v2152_v38  ;;  %v2402_v33 = vpack.c.bf16 %v2354_v2, %v2354_v2  ;;  %v2856_v41 = vpack.c.bf16 %v2823_v14, %v2823_v14  ;;  %v3217_v53 = vmul.f32 %v4878_v32, %v6474_v7 }
 0x29d   : > { %v2355_v6 = vadd.f32 %v2262_v4, %v2151_v52  ;;  %v2552_v1 = vunpack.c.l.bf16 %v2473_v46  ;;  %v2633_v18 = vrot.slane %v2551_v58, 2  ;;  %v2857_v17 = vpack.c.bf16 %v2824_v36, %v2824_v36 }
 0x29e   : > { %v2404_v40 = vpack.c.bf16 %v2356_v42, %v2356_v42  ;;  %v2514_v49 = vunpack.c.l.bf16 %v2402_v33  ;;  %v2937_v51 = vunpack.c.l.bf16 %v2856_v41  ;;  %v3218_v8 = vmul.f32 %v4878_v32, %v6475_v56 }
 0x29f   : > { %v2403_v59 = vpack.c.bf16 %v2355_v6, %v2355_v6  ;;  %v2634_v15 = vrot.slane %v2552_v1, 2  ;;  %v3248_v54 = vpack.c.bf16 %v3217_v53, %v3217_v53  ;;  %v2938_v62 = vunpack.c.l.bf16 %v2857_v17 }
 0x2a0   : > { %v2516_v20 = vunpack.c.l.bf16 %v2404_v40  ;;  %v2734_v60 = vadd.f32 %v2633_v18, %v2514_v49  ;;  %v3023_v9 = vrot.slane %v2937_v51, 2  ;;  %v3249_v11 = vpack.c.bf16 %v3218_v8, %v3218_v8 }
 0x2a1   : > { %v2515_v24 = vunpack.c.l.bf16 %v2403_v59  ;;  %v2635_v39 = vsel %vm2594_vm2, %v2633_v18, %v2634_v15  ;;  %v2636_v22 = vsel %vm2594_vm2, %v2634_v15, %v4906_v19  ;;  %v3024_v55 = vrot.slane %v2938_v62, 2  ;;  %v4475_v59 = vld [vmem:[%s4761_s28 + $0x20] sm:$0xff] }
 0x2a2   : > { %v2736_v16 = vadd.f32 %v2636_v22, %v2516_v20  ;;  %v2782_v13 = vpack.c.bf16 %v2734_v60, %v2734_v60  ;;  %v3327_v37 = vunpack.c.l.bf16 %v3248_v54  ;;  %v3328_v2 = vunpack.c.l.bf16 %v3249_v11 }
 0x2a3   : > { %v2735_v38 = vadd.f32 %v2635_v39, %v2515_v24  ;;  %v4112_v14 = vmul.f32 %v5771_v30, %v4034_v61  ;;  %v805_v52 = vmul.f32 %v4813_v43, %v6472_v35  ;;  %v3025_v58 = vsel %vm2594_vm2, %v3023_v9, %v3024_v55  ;;  %v6476_v39 = vld [vmem:[#allocation19_spill] sm:$0xff] }
 0x2a4   : > { %v2784_v4 = vpack.c.bf16 %v2736_v16, %v2736_v16  ;;  %v2898_v46 = vunpack.c.l.bf16 %v2782_v13  ;;  %v3026_v42 = vsel %vm2594_vm2, %v3024_v55, %v4909_v21  ;;  %v3409_v36 = vrot.slane %v3327_v37, 2  ;;  %v4036_v13 = vpop.f32.mrf.mxu1 }
 0x2a5   : > { %v2783_v33 = vpack.c.bf16 %v2735_v38, %v2735_v38  ;;  %v3410_v41 = vrot.slane %v3328_v2, 2  ;;  %v4148_v6 = vadd.f32 %v5776_v34, %v4112_v14  ;;  %v806_v53 = vmul.f32 %v4813_v43, %v6473_v50  ;;  %v6477_v14 = vld [vmem:[#allocation20_spill] sm:$0xff] }
 0x2a6   : > { %v2900_v1 = vunpack.c.l.bf16 %v2784_v4  ;;  %v3125_v18 = vadd.f32 %v3023_v9, %v2898_v46  ;;  %v929_v40 = vpack.c.bf16 %v805_v52, %v805_v52  ;;  %v969_v60 = vmul.f32 %v4815_v44, %v6474_v7 }
 0x2a7   : > { %v2899_v49 = vunpack.c.l.bf16 %v2783_v33  ;;  %v3411_v17 = vsel %vm2594_vm2, %v3409_v36, %v3410_v41  ;;  %v3412_v51 = vsel %vm2594_vm2, %v3410_v41, %v4914_v27  ;;  %v4180_v15 = vadd.f32 %v4475_v59, %v4148_v6  ;;  %v4476_v59 = vld [vmem:[%s4761_s28 + $0x28] sm:$0xff] }
 0x2a8   : > { %v3127_v8 = vadd.f32 %v3026_v42, %v2900_v1  ;;  %v3173_v54 = vpack.c.bf16 %v3125_v18, %v3125_v18  ;;  %v930_v20 = vpack.c.bf16 %v806_v53, %v806_v53  ;;  %v970_v9 = vmul.f32 %v4815_v44, %v6475_v56 }
 0x2a9   : > { %v3126_v62 = vadd.f32 %v3025_v58, %v2899_v49  ;;  %4212 = vst.msk [vmem:[%s5797_s21 + $0x20] sm:$0xff] %vm437_vm0, %v4180_v15  ;;  %v1033_v24 = vunpack.c.l.bf16 %v929_v40  ;;  %v1167_v22 = vmul.f32 %v4830_v57, %v6476_v39  ;;  %v1002_v55 = vpack.c.bf16 %v969_v60, %v969_v60 }
 0x2aa   : > { %v3175_v11 = vpack.c.bf16 %v3127_v8, %v3127_v8  ;;  %v3288_v16 = vunpack.c.l.bf16 %v3173_v54  ;;  %v1034_v37 = vunpack.c.l.bf16 %v930_v20  ;;  %v4113_v38 = vmul.f32 %v5771_v30, %v4036_v13 }
 0x2ab   : > { %v3174_v61 = vpack.c.bf16 %v3126_v62, %v3126_v62  ;;  %v1003_v2 = vpack.c.bf16 %v970_v9, %v970_v9  ;;  %v1168_v52 = vmul.f32 %v4830_v57, %v6477_v14  ;;  %v1066_v58 = vunpack.c.l.bf16 %v1002_v55 }
 0x2ac   : > { %v3290_v4 = vunpack.c.l.bf16 %v3175_v11  ;;  %v3507_v46 = vadd.f32 %v3409_v36, %v3288_v16  ;;  %v1198_v42 = vpack.c.bf16 %v1167_v22, %v1167_v22  ;;  %v4149_v41 = vadd.f32 %v5776_v34, %v4113_v38 }
 0x2ad   : > { %v3289_v33 = vunpack.c.l.bf16 %v3174_v61  ;;  %v1067_v6 = vunpack.c.l.bf16 %v1003_v2  ;;  %v1199_v1 = vpack.c.bf16 %v1168_v52, %v1168_v52  ;;  %v1099_v40 = vadd.f32 %v1066_v58, %v1033_v24 }
 0x2ae   : > { %v3509_v18 = vadd.f32 %v3412_v51, %v3290_v4  ;;  %v3555_v53 = vpack.c.bf16 %v3507_v46, %v3507_v46  ;;  %v1262_v49 = vunpack.c.l.bf16 %v1198_v42  ;;  %v4181_v15 = vadd.f32 %v4476_v59, %v4149_v41 }
 0x2af   : > { %v3508_v30 = vadd.f32 %v3411_v17, %v3289_v33  ;;  %v1100_v8 = vadd.f32 %v1067_v6, %v1034_v37  ;;  %v1263_v54 = vunpack.c.l.bf16 %v1199_v1  ;;  %v1132_v36 = vpack.c.bf16 %v1099_v40, %v1099_v40 }
 0x2b0   : > { %v3557_v20 = vpack.c.bf16 %v3509_v18, %v3509_v18  ;;  %v3603_v60 = vunpack.c.l.bf16 %v3555_v53  ;;  %v1359_v62 = vmul.f32 %v4837_v0, %v6472_v35  ;;  %4213 = vst.msk [vmem:[%s5797_s21 + $0x28] sm:$0xff] %vm437_vm0, %v4181_v15  ;;  %v1360_v51 = vmul.f32 %v4837_v0, %v6473_v50 }
 0x2b1   : > { %v3556_v9 = vpack.c.bf16 %v3508_v30, %v3508_v30  ;;  %v1133_v34 = vpack.c.bf16 %v1100_v8, %v1100_v8  ;;  %v1710_v17 = vmul.f32 %v4886_v45, %v6474_v7  ;;  %v1229_v11 = vunpack.c.l.bf16 %v1132_v36 }
 0x2b2   : > { %v3605_v24 = vunpack.c.l.bf16 %v3557_v20  ;;  %v3720_v22 = vrot.slane %v3603_v60, 7  ;;  %v1390_v16 = vpack.c.bf16 %v1359_v62, %v1359_v62  ;;  %v1391_v37 = vpack.c.bf16 %v1360_v51, %v1360_v51 }
 0x2b3   : > { %v3604_v13 = vunpack.c.l.bf16 %v3556_v9  ;;  %v1230_v55 = vunpack.c.l.bf16 %v1133_v34  ;;  %v1711_v61 = vmul.f32 %v4886_v45, %v6475_v56  ;;  %v1293_v2 = vadd.f32 %v1262_v49, %v1229_v11  ;;  %v5957_v49 = vld [vmem:[%s6401_s5] ss:$0 sm:$0xff] }
 0x2b4   : > { %v3723_v38 = vrot.slane %v3605_v24, 7  ;;  %v1454_v52 = vunpack.c.l.bf16 %v1390_v16  ;;  %v1742_v4 = vpack.c.bf16 %v1710_v17, %v1710_v17  ;;  %v1455_v42 = vunpack.c.l.bf16 %v1391_v37  ;;  %v5966_v34 = vld [vmem:[%s6402_s6] ss:$0 sm:$0xff] }
 0x2b5   : > { %v3721_v46 = vrot.slane %v3604_v13, 7  ;;  %v1294_v58 = vadd.f32 %v1263_v54, %v1230_v55  ;;  %v1743_v33 = vpack.c.bf16 %v1711_v61, %v1711_v61  ;;  %v1326_v41 = vpack.c.bf16 %v1293_v2, %v1293_v2 }
 0x2b6   : > { %v1528_v6 = vrot.slane %v1454_v52, 1  ;;  %v1822_v1 = vunpack.c.l.bf16 %v1742_v4  ;;  %v2080_v18 = vmul.f32 %v4911_v23, %v6476_v39  ;;  %v1529_v59 = vrot.slane %v1455_v42, 1 }
 0x2b7   : > { %v3722_v53 = vsel %vm3669_vm3, %v3720_v22, %v3721_v46  ;;  %v3724_v40 = vsel %vm3669_vm3, %v3721_v46, %v3723_v38  ;;  %v1327_v30 = vpack.c.bf16 %v1294_v58, %v1294_v58  ;;  %v1423_v54 = vunpack.c.l.bf16 %v1326_v41 }
 0x2b8   : > { %v3806_v15 = vmul.f32 %v5957_v49, %v3722_v53  ;;  %v3807_v8 = vmul.f32 %v5957_v49, %v3724_v40  ;;  %v1623_v20 = vadd.f32 %v1528_v6, %v4872_v29  ;;  %v1530_v36 = vsel %vm1495_vm1, %v1528_v6, %v1529_v59 }
 0x2b9   : > { %v1424_v60 = vunpack.c.l.bf16 %v1327_v30  ;;  %v1823_v62 = vunpack.c.l.bf16 %v1743_v33  ;;  %v1897_v9 = vrot.slane %v1822_v1, 1  ;;  %v1624_v24 = vadd.f32 %v1530_v36, %v1423_v54 }
 0x2ba   : > { %v3842_v51 = vadd.f32 %v5966_v34, %v3806_v15  ;;  %v3843_v17 = vadd.f32 %v5966_v34, %v3807_v8  ;;  %v1671_v22 = vpack.c.bf16 %v1623_v20, %v1623_v20  ;;  %v2081_v13 = vmul.f32 %v4911_v23, %v6477_v14 }
 0x2bb   : > { %v1625_v11 = vadd.f32 %v1529_v59, %v1424_v60  ;;  %v1898_v16 = vrot.slane %v1823_v62, 1  ;;  %v2111_v55 = vpack.c.bf16 %v2080_v18, %v2080_v18  ;;  %v1672_v38 = vpack.c.bf16 %v1624_v24, %v1624_v24 }
 0x2bc   : > { %v3874_v37 = vmax.f32 %v3842_v51, 0.0  ;;  %v3875_v61 = vmax.f32 %v3843_v17, 0.0  ;;  %v1785_v2 = vunpack.c.l.bf16 %v1671_v22  ;;  %v2112_v46 = vpack.c.bf16 %v2081_v13, %v2081_v13 }
 0x2bd   : > { %v1673_v52 = vpack.c.bf16 %v1625_v11, %v1625_v11  ;;  %v1899_v4 = vsel %vm1495_vm1, %v1897_v9, %v1898_v16  ;;  %v2190_v58 = vunpack.c.l.bf16 %v2111_v55  ;;  %v1786_v41 = vunpack.c.l.bf16 %v1672_v38 }
 0x2be   : > { %v3906_v42 = vmin.f32 %v3874_v37, 6.0  ;;  %v3907_v33 = vmin.f32 %v3875_v61, 6.0  ;;  %v1993_v6 = vadd.f32 %v1897_v9, %v1785_v2  ;;  %v2191_v53 = vunpack.c.l.bf16 %v2112_v46 }
 0x2bf   : > { %v1787_v1 = vunpack.c.l.bf16 %v1673_v52  ;;  %v2263_v40 = vrot.slane %v2190_v58, 1  ;;  %v2443_v30 = vmul.f32 %v4867_v25, %v6472_v35  ;;  %v1994_v59 = vadd.f32 %v1899_v4, %v1786_v41 }
 0x2c0   : > { %v3928_v18 = vpack.c.bf16 %v3907_v33, %v3906_v42  ;;  %v2041_v15 = vpack.c.bf16 %v1993_v6, %v1993_v6  ;;  %v2444_v8 = vmul.f32 %v4867_v25, %v6473_v50  ;;  %v2264_v20 = vrot.slane %v2191_v53, 1 }
 0x2c1   : > { %v1995_v54 = vadd.f32 %v1898_v16, %v1787_v1  ;;  %v2474_v60 = vpack.c.bf16 %v2443_v30, %v2443_v30  ;;  %v2825_v36 = vmul.f32 %v4870_v28, %v6474_v7  ;;  %v2042_v62 = vpack.c.bf16 %v1994_v59, %v1994_v59 }
 0x2c2   : > { %4384 = vmatmul.msk.bf16.gmra.mxu2 %vm3966_vm4, %v3928_v18  ;;  %v2153_v9 = vunpack.c.l.bf16 %v2041_v15  ;;  %v2475_v51 = vpack.c.bf16 %v2444_v8, %v2444_v8  ;;  %v2826_v35 = vmul.f32 %v4870_v28, %v6475_v56  ;;  %v2265_v24 = vsel %vm1495_vm1, %v2263_v40, %v2264_v20 }
 0x2c3   : > { %v2043_v17 = vpack.c.bf16 %v1995_v54, %v1995_v54  ;;  %v2553_v22 = vunpack.c.l.bf16 %v2474_v60  ;;  %v2858_v11 = vpack.c.bf16 %v2825_v36, %v2825_v36  ;;  %v2154_v50 = vunpack.c.l.bf16 %v2042_v62 }
 0x2c4   : > { %v2357_v16 = vadd.f32 %v2263_v40, %v2153_v9  ;;  %v2554_v13 = vunpack.c.l.bf16 %v2475_v51  ;;  %v2859_v55 = vpack.c.bf16 %v2826_v35, %v2826_v35  ;;  %v3219_v2 = vmul.f32 %v4878_v32, %v6476_v39 }
 0x2c5   : > { %v2155_v37 = vunpack.c.l.bf16 %v2043_v17  ;;  %v2637_v61 = vrot.slane %v2553_v22, 2  ;;  %v2939_v38 = vunpack.c.l.bf16 %v2858_v11  ;;  %v2358_v52 = vadd.f32 %v2265_v24, %v2154_v50  ;;  %v4039_v11 = vpop.f32.mrf.mxu1 }
 0x2c6   : > { %v2405_v4 = vpack.c.bf16 %v2357_v16, %v2357_v16  ;;  %v2638_v46 = vrot.slane %v2554_v13, 2  ;;  %v2940_v58 = vunpack.c.l.bf16 %v2859_v55  ;;  %v3220_v41 = vmul.f32 %v4878_v32, %v6477_v14  ;;  %v6000_v55 = vld [vmem:[%s6404_s8] ss:$0 sm:$0xff] }
 0x2c7   : > { %v2359_v42 = vadd.f32 %v2264_v20, %v2155_v37  ;;  %v3027_v33 = vrot.slane %v2939_v38, 2  ;;  %v3250_v6 = vpack.c.bf16 %v3219_v2, %v3219_v2  ;;  %v2406_v1 = vpack.c.bf16 %v2358_v52, %v2358_v52 }
 0x2c8   : > { %v2517_v53 = vunpack.c.l.bf16 %v2405_v4  ;;  %v2639_v40 = vsel %vm2594_vm2, %v2637_v61, %v2638_v46  ;;  %v2640_v30 = vsel %vm2594_vm2, %v2638_v46, %v4906_v19  ;;  %v3028_v59 = vrot.slane %v2940_v58, 2 }
 0x2c9   : > { %v2407_v18 = vpack.c.bf16 %v2359_v42, %v2359_v42  ;;  %v3251_v15 = vpack.c.bf16 %v3220_v41, %v3220_v41  ;;  %v3329_v8 = vunpack.c.l.bf16 %v3250_v6  ;;  %v2518_v54 = vunpack.c.l.bf16 %v2406_v1  ;;  %v6013_v41 = vld [vmem:[%s6405_s9] ss:$0 sm:$0xff] }
 0x2ca   : > { %v2737_v60 = vadd.f32 %v2637_v61, %v2517_v53  ;;  %v807_v20 = vmul.f32 %v4813_v43, %v6474_v7  ;;  %v808_v36 = vmul.f32 %v4813_v43, %v6475_v56  ;;  %v3029_v9 = vsel %vm2594_vm2, %v3027_v33, %v3028_v59 }
 0x2cb   : > { %v2519_v62 = vunpack.c.l.bf16 %v2407_v18  ;;  %v3030_v51 = vsel %vm2594_vm2, %v3028_v59, %v4909_v21  ;;  %v3330_v35 = vunpack.c.l.bf16 %v3251_v15  ;;  %v2738_v17 = vadd.f32 %v2639_v40, %v2518_v54  ;;  %v4481_v59 = vld [vmem:[%s4761_s28 + $0x30] sm:$0xff] }
 0x2cc   : > { %v2785_v24 = vpack.c.bf16 %v2737_v60, %v2737_v60  ;;  %v3413_v22 = vrot.slane %v3329_v8, 2  ;;  %v931_v50 = vpack.c.bf16 %v807_v20, %v807_v20  ;;  %v4114_v37 = vmul.f32 %v6000_v55, %v4039_v11 }
 0x2cd   : > { %v2739_v16 = vadd.f32 %v2640_v30, %v2519_v62  ;;  %v3414_v13 = vrot.slane %v3330_v35, 2  ;;  %v932_v61 = vpack.c.bf16 %v808_v36, %v808_v36  ;;  %v2786_v38 = vpack.c.bf16 %v2738_v17, %v2738_v17 }
 0x2ce   : > { %v2901_v2 = vunpack.c.l.bf16 %v2785_v24  ;;  %v971_v52 = vmul.f32 %v4815_v44, %v6476_v39  ;;  %v972_v4 = vmul.f32 %v4815_v44, %v6477_v14  ;;  %v4150_v6 = vadd.f32 %v6013_v41, %v4114_v37 }
 0x2cf   : > { %v2787_v46 = vpack.c.bf16 %v2739_v16, %v2739_v16  ;;  %v3415_v58 = vsel %vm2594_vm2, %v3413_v22, %v3414_v13  ;;  %v3416_v42 = vsel %vm2594_vm2, %v3414_v13, %v4914_v27  ;;  %v2902_v1 = vunpack.c.l.bf16 %v2786_v38 }
 0x2d0   : > { %v3128_v53 = vadd.f32 %v3027_v33, %v2901_v2  ;;  %v1004_v40 = vpack.c.bf16 %v971_v52, %v971_v52  ;;  %v1005_v30 = vpack.c.bf16 %v972_v4, %v972_v4  ;;  %v4182_v15 = vadd.f32 %v4481_v59, %v4150_v6 }
 0x2d1   : > { %v2903_v18 = vunpack.c.l.bf16 %v2787_v46  ;;  %v1035_v8 = vunpack.c.l.bf16 %v931_v50  ;;  %v1036_v54 = vunpack.c.l.bf16 %v932_v61  ;;  %v3129_v60 = vadd.f32 %v3029_v9, %v2902_v1  ;;  %v4041_v50 = vpop.f32.mrf.mxu1 }
 0x2d2   : > { %v3176_v20 = vpack.c.bf16 %v3128_v53, %v3128_v53  ;;  %v1068_v36 = vunpack.c.l.bf16 %v1004_v40  ;;  %v1069_v62 = vunpack.c.l.bf16 %v1005_v30  ;;  %4214 = vst.msk [vmem:[%s5797_s21 + $0x30] sm:$0xff] %vm437_vm0, %v4182_v15  ;;  %v1169_v17 = vmul.f32 %v4830_v57, %v5296_v3 }
 0x2d3   : > { %v3130_v35 = vadd.f32 %v3030_v51, %v2903_v18  ;;  %v1170_v33 = vmul.f32 %v4830_v57, %v5361_v5  ;;  %v1361_v24 = vmul.f32 %v4837_v0, %v6474_v7  ;;  %v3177_v11 = vpack.c.bf16 %v3129_v60, %v3129_v60 }
 0x2d4   : > { %v3291_v16 = vunpack.c.l.bf16 %v3176_v20  ;;  %v1101_v13 = vadd.f32 %v1068_v36, %v1035_v8  ;;  %v1102_v9 = vadd.f32 %v1069_v62, %v1036_v54  ;;  %v4115_v61 = vmul.f32 %v6000_v55, %v4041_v50  ;;  %v4482_v54 = vld [vmem:[%s4761_s28 + $0x38] sm:$0xff] }
 0x2d5   : > { %v3178_v37 = vpack.c.bf16 %v3130_v35, %v3130_v35  ;;  %v1200_v51 = vpack.c.bf16 %v1169_v17, %v1169_v17  ;;  %v1201_v38 = vpack.c.bf16 %v1170_v33, %v1170_v33  ;;  %v3292_v2 = vunpack.c.l.bf16 %v3177_v11 }
 0x2d6   : > { %v3510_v52 = vadd.f32 %v3413_v22, %v3291_v16  ;;  %v1134_v4 = vpack.c.bf16 %v1101_v13, %v1101_v13  ;;  %v1135_v46 = vpack.c.bf16 %v1102_v9, %v1102_v9  ;;  %v4151_v1 = vadd.f32 %v6013_v41, %v4115_v61 }
 0x2d7   : > { %v3293_v6 = vunpack.c.l.bf16 %v3178_v37  ;;  %v1264_v53 = vunpack.c.l.bf16 %v1200_v51  ;;  %v1265_v40 = vunpack.c.l.bf16 %v1201_v38  ;;  %v3511_v30 = vadd.f32 %v3415_v58, %v3292_v2 }
 0x2d8   : > { %v3558_v18 = vpack.c.bf16 %v3510_v52, %v3510_v52  ;;  %v1231_v59 = vunpack.c.l.bf16 %v1134_v4  ;;  %v1232_v15 = vunpack.c.l.bf16 %v1135_v46  ;;  %v4183_v60 = vadd.f32 %v4482_v54, %v4151_v1 }
 0x2d9   : > { %v3512_v8 = vadd.f32 %v3416_v42, %v3293_v6  ;;  %v1362_v20 = vmul.f32 %v4837_v0, %v6475_v56  ;;  %v1392_v36 = vpack.c.bf16 %v1361_v24, %v1361_v24  ;;  %v3559_v22 = vpack.c.bf16 %v3511_v30, %v3511_v30 }
 0x2da   : > { %v3606_v62 = vunpack.c.l.bf16 %v3558_v18  ;;  %v1295_v35 = vadd.f32 %v1264_v53, %v1231_v59  ;;  %v1296_v17 = vadd.f32 %v1265_v40, %v1232_v15  ;;  %4215 = vst.msk [vmem:[%s5797_s21 + $0x38] sm:$0xff] %vm437_vm0, %v4183_v60  ;;  %v1712_v58 = vmul.f32 %v4886_v45, %v6476_v39 }
 0x2db   : > { %v3560_v33 = vpack.c.bf16 %v3512_v8, %v3512_v8  ;;  %v1393_v11 = vpack.c.bf16 %v1362_v20, %v1362_v20  ;;  %v1456_v16 = vunpack.c.l.bf16 %v1392_v36  ;;  %v3607_v50 = vunpack.c.l.bf16 %v3559_v22 }
 0x2dc   : > { %v3725_v42 = vrot.slane %v3606_v62, 7  ;;  %v1328_v13 = vpack.c.bf16 %v1295_v35, %v1295_v35  ;;  %v1329_v9 = vpack.c.bf16 %v1296_v17, %v1296_v17  ;;  %v1713_v24 = vmul.f32 %v4886_v45, %v6477_v14 }
 0x2dd   : > { %v3608_v37 = vunpack.c.l.bf16 %v3560_v33  ;;  %v1457_v61 = vunpack.c.l.bf16 %v1393_v11  ;;  %v1531_v51 = vrot.slane %v1456_v16, 1  ;;  %v3726_v38 = vrot.slane %v3607_v50, 7 }
 0x2de   : > { %v1425_v2 = vunpack.c.l.bf16 %v1328_v13  ;;  %v1426_v52 = vunpack.c.l.bf16 %v1329_v9  ;;  %v1744_v4 = vpack.c.bf16 %v1712_v58, %v1712_v58  ;;  %v1745_v53 = vpack.c.bf16 %v1713_v24, %v1713_v24 }
 0x2df   : > { %v3728_v46 = vrot.slane %v3608_v37, 7  ;;  %v1532_v6 = vrot.slane %v1457_v61, 1  ;;  %v1626_v1 = vadd.f32 %v1531_v51, %v4872_v29  ;;  %v3727_v40 = vsel %vm3669_vm3, %v3725_v42, %v3726_v38 }
 0x2e0   : > { %v1824_v30 = vunpack.c.l.bf16 %v1744_v4  ;;  %v2082_v18 = vmul.f32 %v4911_v23, %v5296_v3  ;;  %v2083_v59 = vmul.f32 %v4911_v23, %v5361_v5  ;;  %v3808_v8 = vmul.f32 %v5957_v49, %v3727_v40 }
 0x2e1   : > { %v3729_v15 = vsel %vm3669_vm3, %v3726_v38, %v3728_v46  ;;  %v1533_v54 = vsel %vm1495_vm1, %v1531_v51, %v1532_v6  ;;  %v1628_v60 = vadd.f32 %v1532_v6, %v1426_v52  ;;  %v1674_v22 = vpack.c.bf16 %v1626_v1, %v1626_v1 }
 0x2e2   : > { %v3809_v20 = vmul.f32 %v5957_v49, %v3729_v15  ;;  %v1627_v36 = vadd.f32 %v1533_v54, %v1425_v2  ;;  %v1825_v62 = vunpack.c.l.bf16 %v1745_v53  ;;  %v3844_v35 = vadd.f32 %v5966_v34, %v3808_v8 }
 0x2e3   : > { %v1676_v17 = vpack.c.bf16 %v1628_v60, %v1628_v60  ;;  %v1900_v33 = vrot.slane %v1824_v30, 1  ;;  %v2113_v11 = vpack.c.bf16 %v2082_v18, %v2082_v18  ;;  %v1788_v50 = vunpack.c.l.bf16 %v1674_v22 }
 0x2e4   : > { %v3845_v16 = vadd.f32 %v5966_v34, %v3809_v20  ;;  %v1675_v58 = vpack.c.bf16 %v1627_v36, %v1627_v36  ;;  %v1901_v42 = vrot.slane %v1825_v62, 1  ;;  %v3876_v13 = vmax.f32 %v3844_v35, 0.0 }
 0x2e5   : > { %v1790_v9 = vunpack.c.l.bf16 %v1676_v17  ;;  %v2114_v37 = vpack.c.bf16 %v2083_v59, %v2083_v59  ;;  %v2192_v61 = vunpack.c.l.bf16 %v2113_v11  ;;  %v1996_v2 = vadd.f32 %v1900_v33, %v1788_v50 }
 0x2e6   : > { %v3877_v51 = vmax.f32 %v3845_v16, 0.0  ;;  %v1789_v24 = vunpack.c.l.bf16 %v1675_v58  ;;  %v1902_v38 = vsel %vm1495_vm1, %v1900_v33, %v1901_v42  ;;  %v3908_v52 = vmin.f32 %v3876_v13, 6.0 }
 0x2e7   : > { %v1998_v4 = vadd.f32 %v1901_v42, %v1790_v9  ;;  %v2193_v46 = vunpack.c.l.bf16 %v2114_v37  ;;  %v2266_v6 = vrot.slane %v2192_v61, 1  ;;  %v2044_v40 = vpack.c.bf16 %v1996_v2, %v1996_v2 }
 0x2e8   : > { %v3909_v1 = vmin.f32 %v3877_v51, 6.0  ;;  %v1997_v53 = vadd.f32 %v1902_v38, %v1789_v24  ;;  %v2445_v30 = vmul.f32 %v4867_v25, %v6474_v7  ;;  %v2446_v59 = vmul.f32 %v4867_v25, %v6475_v56 }
 0x2e9   : > { %v2046_v18 = vpack.c.bf16 %v1998_v4, %v1998_v4  ;;  %v2267_v15 = vrot.slane %v2193_v46, 1  ;;  %v2827_v8 = vmul.f32 %v4870_v28, %v6476_v39  ;;  %v2156_v20 = vunpack.c.l.bf16 %v2044_v40 }
 0x2ea   : > { %v3929_v54 = vpack.c.bf16 %v3909_v1, %v3908_v52  ;;  %v2045_v60 = vpack.c.bf16 %v1997_v53, %v1997_v53  ;;  %v2476_v36 = vpack.c.bf16 %v2445_v30, %v2445_v30  ;;  %v2477_v35 = vpack.c.bf16 %v2446_v59, %v2446_v59 }
 0x2eb   : > { %v2158_v22 = vunpack.c.l.bf16 %v2046_v18  ;;  %v2268_v62 = vsel %vm1495_vm1, %v2266_v6, %v2267_v15  ;;  %v2828_v17 = vmul.f32 %v4870_v28, %v6477_v14  ;;  %v2360_v33 = vadd.f32 %v2266_v6, %v2156_v20 }
 0x2ec   : > { %4385 = vmatmul.msk.bf16.gmra.mxu2 %vm3966_vm4, %v3929_v54  ;;  %v2157_v7 = vunpack.c.l.bf16 %v2045_v60  ;;  %v2555_v11 = vunpack.c.l.bf16 %v2476_v36  ;;  %v2860_v56 = vpack.c.bf16 %v2827_v8, %v2827_v8  ;;  %v2556_v58 = vunpack.c.l.bf16 %v2477_v35  ;;  %v4044_v36 = vpop.f32.mrf.mxu1 }
 0x2ed   : > { %v2362_v16 = vadd.f32 %v2267_v15, %v2158_v22  ;;  %v2861_v50 = vpack.c.bf16 %v2828_v17, %v2828_v17  ;;  %v3221_v42 = vmul.f32 %v4878_v32, %v5296_v3  ;;  %v2408_v9 = vpack.c.bf16 %v2360_v33, %v2360_v33 }
 0x2ee   : > { %v2361_v13 = vadd.f32 %v2268_v62, %v2157_v7  ;;  %v2641_v37 = vrot.slane %v2555_v11, 2  ;;  %v2941_v61 = vunpack.c.l.bf16 %v2860_v56  ;;  %v2642_v24 = vrot.slane %v2556_v58, 2 }
 0x2ef   : > { %v2410_v51 = vpack.c.bf16 %v2362_v16, %v2362_v16  ;;  %v2942_v38 = vunpack.c.l.bf16 %v2861_v50  ;;  %v3222_v2 = vmul.f32 %v4878_v32, %v5361_v5  ;;  %v2520_v4 = vunpack.c.l.bf16 %v2408_v9 }
 0x2f0   : > { %v2409_v52 = vpack.c.bf16 %v2361_v13, %v2361_v13  ;;  %v3031_v46 = vrot.slane %v2941_v61, 2  ;;  %v3252_v6 = vpack.c.bf16 %v3221_v42, %v3221_v42  ;;  %v2643_v53 = vsel %vm2594_vm2, %v2641_v37, %v2642_v24 }
 0x2f1   : > { %v2522_v1 = vunpack.c.l.bf16 %v2410_v51  ;;  %v2644_v40 = vsel %vm2594_vm2, %v2642_v24, %v4906_v19  ;;  %v3032_v30 = vrot.slane %v2942_v38, 2  ;;  %v2740_v15 = vadd.f32 %v2641_v37, %v2520_v4  ;;  %v4483_v4 = vld [vmem:[%s4761_s28 + $0x40] sm:$0xff] }
 0x2f2   : > { %v2521_v18 = vunpack.c.l.bf16 %v2409_v52  ;;  %v3253_v59 = vpack.c.bf16 %v3222_v2, %v3222_v2  ;;  %v3331_v8 = vunpack.c.l.bf16 %v3252_v6  ;;  %v809_v22 = vmul.f32 %v4813_v43, %v6476_v39 }
 0x2f3   : > { %v2742_v54 = vadd.f32 %v2644_v40, %v2522_v1  ;;  %v3033_v60 = vsel %vm2594_vm2, %v3031_v46, %v3032_v30  ;;  %v3034_v20 = vsel %vm2594_vm2, %v3032_v30, %v4909_v21  ;;  %v2788_v35 = vpack.c.bf16 %v2740_v15, %v2740_v15 }
 0x2f4   : > { %v2741_v62 = vadd.f32 %v2643_v53, %v2521_v18  ;;  %v3332_v17 = vunpack.c.l.bf16 %v3253_v59  ;;  %v3417_v7 = vrot.slane %v3331_v8, 2  ;;  %v4116_v11 = vmul.f32 %v6000_v55, %v4044_v36 }
 0x2f5   : > { %v2790_v33 = vpack.c.bf16 %v2742_v54, %v2742_v54  ;;  %v810_v56 = vmul.f32 %v4813_v43, %v6477_v14  ;;  %v933_v16 = vpack.c.bf16 %v809_v22, %v809_v22  ;;  %v2904_v50 = vunpack.c.l.bf16 %v2788_v35 }
 0x2f6   : > { %v2789_v58 = vpack.c.bf16 %v2741_v62, %v2741_v62  ;;  %v3418_v42 = vrot.slane %v3332_v17, 2  ;;  %v973_v13 = vmul.f32 %v4815_v44, %v5296_v3  ;;  %v4152_v37 = vadd.f32 %v6013_v41, %v4116_v11 }
 0x2f7   : > { %v2906_v9 = vunpack.c.l.bf16 %v2790_v33  ;;  %v934_v61 = vpack.c.bf16 %v810_v56, %v810_v56  ;;  %v974_v51 = vmul.f32 %v4815_v44, %v5361_v5  ;;  %v3131_v38 = vadd.f32 %v3031_v46, %v2904_v50  ;;  %v4046_v44 = vpop.f32.mrf.mxu1 }
 0x2f8   : > { %v2905_v24 = vunpack.c.l.bf16 %v2789_v58  ;;  %v3419_v2 = vsel %vm2594_vm2, %v3417_v7, %v3418_v42  ;;  %v3420_v43 = vsel %vm2594_vm2, %v3418_v42, %v4914_v27  ;;  %v4184_v6 = vadd.f32 %v4483_v4, %v4152_v37 }
 0x2f9   : > { %v3133_v52 = vadd.f32 %v3034_v20, %v2906_v9  ;;  %v1006_v1 = vpack.c.bf16 %v973_v13, %v973_v13  ;;  %v1007_v53 = vpack.c.bf16 %v974_v51, %v974_v51  ;;  %v3179_v30 = vpack.c.bf16 %v3131_v38, %v3131_v38  ;;  %v4484_v51 = vld [vmem:[%s4761_s28 + $0x48] sm:$0xff] }
 0x2fa   : > { %v3132_v40 = vadd.f32 %v3033_v60, %v2905_v24  ;;  %v1037_v18 = vunpack.c.l.bf16 %v933_v16  ;;  %v1038_v15 = vunpack.c.l.bf16 %v934_v61  ;;  %4216 = vst.msk [vmem:[%s5797_s21 + $0x40] sm:$0xff] %vm437_vm0, %v4184_v6  ;;  %v1171_v54 = vmul.f32 %v4830_v57, %v5367_v26 }
 0x2fb   : > { %v3181_v59 = vpack.c.bf16 %v3133_v52, %v3133_v52  ;;  %v1070_v8 = vunpack.c.l.bf16 %v1006_v1  ;;  %v1071_v46 = vunpack.c.l.bf16 %v1007_v53  ;;  %v3294_v22 = vunpack.c.l.bf16 %v3179_v30 }
 0x2fc   : > { %v3180_v36 = vpack.c.bf16 %v3132_v40, %v3132_v40  ;;  %v4117_v20 = vmul.f32 %v6000_v55, %v4046_v44  ;;  %v1172_v60 = vmul.f32 %v4830_v57, %v5414_v47  ;;  %v1202_v33 = vpack.c.bf16 %v1171_v54, %v1171_v54 }
 0x2fd   : > { %v3296_v62 = vunpack.c.l.bf16 %v3181_v59  ;;  %v1103_v35 = vadd.f32 %v1070_v8, %v1037_v18  ;;  %v1104_v17 = vadd.f32 %v1071_v46, %v1038_v15  ;;  %v3513_v56 = vadd.f32 %v3417_v7, %v3294_v22 }
 0x2fe   : > { %v3295_v11 = vunpack.c.l.bf16 %v3180_v36  ;;  %v4153_v16 = vadd.f32 %v6013_v41, %v4117_v20  ;;  %v1203_v58 = vpack.c.bf16 %v1172_v60, %v1172_v60  ;;  %v1266_v9 = vunpack.c.l.bf16 %v1202_v33 }
 0x2ff   : > { %v3515_v50 = vadd.f32 %v3420_v43, %v3296_v62  ;;  %v1136_v42 = vpack.c.bf16 %v1103_v35, %v1103_v35  ;;  %v1137_v13 = vpack.c.bf16 %v1104_v17, %v1104_v17  ;;  %v3561_v61 = vpack.c.bf16 %v3513_v56, %v3513_v56 }
 0x300   : > { %v3514_v37 = vadd.f32 %v3419_v2, %v3295_v11  ;;  %v4185_v24 = vadd.f32 %v4484_v51, %v4153_v16  ;;  %v1267_v38 = vunpack.c.l.bf16 %v1203_v58  ;;  %v1363_v6 = vmul.f32 %v4837_v0, %v6476_v39 }
 0x301   : > { %v3563_v57 = vpack.c.bf16 %v3515_v50, %v3515_v50  ;;  %v1233_v52 = vunpack.c.l.bf16 %v1136_v42  ;;  %v1234_v4 = vunpack.c.l.bf16 %v1137_v13  ;;  %v3609_v1 = vunpack.c.l.bf16 %v3561_v61 }
 0x302   : > { %v3562_v7 = vpack.c.bf16 %v3514_v37, %v3514_v37  ;;  %4217 = vst.msk [vmem:[%s5797_s21 + $0x48] sm:$0xff] %vm437_vm0, %v4185_v24  ;;  %v1364_v43 = vmul.f32 %v4837_v0, %v6477_v14  ;;  %v1714_v2 = vmul.f32 %v4886_v45, %v5296_v3  ;;  %v1394_v18 = vpack.c.bf16 %v1363_v6, %v1363_v6 }
 0x303   : > { %v3611_v53 = vunpack.c.l.bf16 %v3563_v57  ;;  %v1297_v40 = vadd.f32 %v1266_v9, %v1233_v52  ;;  %v1298_v30 = vadd.f32 %v1267_v38, %v1234_v4  ;;  %v3730_v59 = vrot.slane %v3609_v1, 7 }
 0x304   : > { %v3610_v15 = vunpack.c.l.bf16 %v3562_v7  ;;  %v1395_v44 = vpack.c.bf16 %v1364_v43, %v1364_v43  ;;  %v1715_v8 = vmul.f32 %v4886_v45, %v5361_v5  ;;  %v1458_v22 = vunpack.c.l.bf16 %v1394_v18 }
 0x305   : > { %v3733_v46 = vrot.slane %v3611_v53, 7  ;;  %v1330_v54 = vpack.c.bf16 %v1297_v40, %v1297_v40  ;;  %v1331_v36 = vpack.c.bf16 %v1298_v30, %v1298_v30  ;;  %v1746_v0 = vpack.c.bf16 %v1714_v2, %v1714_v2 }
 0x306   : > { %v3731_v20 = vrot.slane %v3610_v15, 7  ;;  %v1459_v60 = vunpack.c.l.bf16 %v1395_v44  ;;  %v1747_v62 = vpack.c.bf16 %v1715_v8, %v1715_v8  ;;  %v1534_v33 = vrot.slane %v1458_v22, 1 }
 0x307   : > { %v1427_v35 = vunpack.c.l.bf16 %v1330_v54  ;;  %v1428_v17 = vunpack.c.l.bf16 %v1331_v36  ;;  %v2084_v11 = vmul.f32 %v4911_v23, %v5367_v26  ;;  %v1826_v50 = vunpack.c.l.bf16 %v1746_v0 }
 0x308   : > { %v3732_v56 = vsel %vm3669_vm3, %v3730_v59, %v3731_v20  ;;  %v3734_v16 = vsel %vm3669_vm3, %v3731_v20, %v3733_v46  ;;  %v1535_v58 = vrot.slane %v1459_v60, 1  ;;  %v1629_v9 = vadd.f32 %v1534_v33, %v4872_v29 }
 0x309   : > { %v3810_v42 = vmul.f32 %v5957_v49, %v3732_v56  ;;  %v3811_v13 = vmul.f32 %v5957_v49, %v3734_v16  ;;  %v1827_v37 = vunpack.c.l.bf16 %v1747_v62  ;;  %v1903_v24 = vrot.slane %v1826_v50, 1 }
 0x30a   : > { %v1536_v61 = vsel %vm1495_vm1, %v1534_v33, %v1535_v58  ;;  %v1631_v51 = vadd.f32 %v1535_v58, %v1428_v17  ;;  %v2085_v38 = vmul.f32 %v4911_v23, %v5414_v47  ;;  %v1677_v6 = vpack.c.bf16 %v1629_v9, %v1629_v9 }
 0x30b   : > { %v3846_v57 = vadd.f32 %v5966_v34, %v3810_v42  ;;  %v3847_v52 = vadd.f32 %v5966_v34, %v3811_v13  ;;  %v1630_v4 = vadd.f32 %v1536_v61, %v1427_v35  ;;  %v1904_v1 = vrot.slane %v1827_v37, 1 }
 0x30c   : > { %v1679_v7 = vpack.c.bf16 %v1631_v51, %v1631_v51  ;;  %v2115_v43 = vpack.c.bf16 %v2084_v11, %v2084_v11  ;;  %v2116_v2 = vpack.c.bf16 %v2085_v38, %v2085_v38  ;;  %v1791_v18 = vunpack.c.l.bf16 %v1677_v6 }
 0x30d   : > { %v3878_v53 = vmax.f32 %v3846_v57, 0.0  ;;  %v3879_v40 = vmax.f32 %v3847_v52, 0.0  ;;  %v1678_v30 = vpack.c.bf16 %v1630_v4, %v1630_v4  ;;  %v1905_v59 = vsel %vm1495_vm1, %v1903_v24, %v1904_v1 }
 0x30e   : > { %v1793_v15 = vunpack.c.l.bf16 %v1679_v7  ;;  %v2194_v44 = vunpack.c.l.bf16 %v2115_v43  ;;  %v2195_v8 = vunpack.c.l.bf16 %v2116_v2  ;;  %v1999_v22 = vadd.f32 %v1903_v24, %v1791_v18 }
 0x30f   : > { %v3910_v46 = vmin.f32 %v3878_v53, 6.0  ;;  %v3911_v54 = vmin.f32 %v3879_v40, 6.0  ;;  %v1792_v36 = vunpack.c.l.bf16 %v1678_v30  ;;  %v2447_v62 = vmul.f32 %v4867_v25, %v6476_v39 }
 0x310   : > { %v2001_v20 = vadd.f32 %v1904_v1, %v1793_v15  ;;  %v2269_v60 = vrot.slane %v2194_v44, 1  ;;  %v2270_v0 = vrot.slane %v2195_v8, 1  ;;  %v2047_v33 = vpack.c.bf16 %v1999_v22, %v1999_v22 }
 0x311   : > { %v3930_v35 = vpack.c.bf16 %v3911_v54, %v3910_v46  ;;  %v2000_v17 = vadd.f32 %v1905_v59, %v1792_v36  ;;  %v2448_v11 = vmul.f32 %v4867_v25, %v6477_v14  ;;  %v2478_v58 = vpack.c.bf16 %v2447_v62, %v2447_v62 }
 0x312   : > { %v2049_v56 = vpack.c.bf16 %v2001_v20, %v2001_v20  ;;  %v2271_v16 = vsel %vm1495_vm1, %v2269_v60, %v2270_v0  ;;  %v2829_v50 = vmul.f32 %v4870_v28, %v5296_v3  ;;  %v2159_v13 = vunpack.c.l.bf16 %v2047_v33 }
 0x313   : > { %4386 = vmatmul.msk.bf16.gmra.mxu2 %vm3966_vm4, %v3930_v35  ;;  %v2048_v42 = vpack.c.bf16 %v2000_v17, %v2000_v17  ;;  %v2479_v9 = vpack.c.bf16 %v2448_v11, %v2448_v11  ;;  %v2830_v39 = vmul.f32 %v4870_v28, %v5361_v5  ;;  %v2557_v61 = vunpack.c.l.bf16 %v2478_v58 }
 0x314   : > { %v2161_v37 = vunpack.c.l.bf16 %v2049_v56  ;;  %v2862_v51 = vpack.c.bf16 %v2829_v50, %v2829_v50  ;;  %v3223_v14 = vmul.f32 %v4878_v32, %v5367_v26  ;;  %v2363_v38 = vadd.f32 %v2269_v60, %v2159_v13  ;;  %v4049_v50 = vpop.f32.mrf.mxu1 }
 0x315   : > { %v2160_v24 = vunpack.c.l.bf16 %v2048_v42  ;;  %v2558_v57 = vunpack.c.l.bf16 %v2479_v9  ;;  %v2863_v52 = vpack.c.bf16 %v2830_v39, %v2830_v39  ;;  %v2645_v6 = vrot.slane %v2557_v61, 2 }
 0x316   : > { %v2365_v4 = vadd.f32 %v2270_v0, %v2161_v37  ;;  %v2943_v7 = vunpack.c.l.bf16 %v2862_v51  ;;  %v3224_v1 = vmul.f32 %v4878_v32, %v5414_v47  ;;  %v2411_v2 = vpack.c.bf16 %v2363_v38, %v2363_v38 }
 0x317   : > { %v2364_v43 = vadd.f32 %v2271_v16, %v2160_v24  ;;  %v2646_v53 = vrot.slane %v2558_v57, 2  ;;  %v2944_v40 = vunpack.c.l.bf16 %v2863_v52  ;;  %v3254_v15 = vpack.c.bf16 %v3223_v14, %v3223_v14 }
 0x318   : > { %v2413_v30 = vpack.c.bf16 %v2365_v4, %v2365_v4  ;;  %v3035_v18 = vrot.slane %v2943_v7, 2  ;;  %v3255_v59 = vpack.c.bf16 %v3224_v1, %v3224_v1  ;;  %v2523_v8 = vunpack.c.l.bf16 %v2411_v2 }
 0x319   : > { %v2412_v44 = vpack.c.bf16 %v2364_v43, %v2364_v43  ;;  %v2647_v46 = vsel %vm2594_vm2, %v2645_v6, %v2646_v53  ;;  %v2648_v54 = vsel %vm2594_vm2, %v2646_v53, %v4906_v19  ;;  %v3036_v22 = vrot.slane %v2944_v40, 2 }
 0x31a   : > { %v2525_v36 = vunpack.c.l.bf16 %v2413_v30  ;;  %v3333_v20 = vunpack.c.l.bf16 %v3254_v15  ;;  %v3334_v60 = vunpack.c.l.bf16 %v3255_v59  ;;  %v2743_v62 = vadd.f32 %v2645_v6, %v2523_v8  ;;  %v4485_v30 = vld [vmem:[%s4761_s28 + $0x50] sm:$0xff] }
 0x31b   : > { %v2524_v0 = vunpack.c.l.bf16 %v2412_v44  ;;  %v6478_v35 = vrot.slane %v5441_v63, 1  ;;  %v1716_v33 = vmul.f32 %v4886_v45, %v5367_v26  ;;  %v3037_v56 = vsel %vm2594_vm2, %v3035_v18, %v3036_v22 }
 0x31c   : > { %v2745_v11 = vadd.f32 %v2648_v54, %v2525_v36  ;;  %v3038_v16 = vsel %vm2594_vm2, %v3036_v22, %v4909_v21  ;;  %v3421_v58 = vrot.slane %v3333_v20, 2  ;;  %v2791_v13 = vpack.c.bf16 %v2743_v62, %v2743_v62  ;;  %v4051_v22 = vpop.f32.mrf.mxu1 }
 0x31d   : > { %v1632_v17 = vadd.f32 %v6478_v35, %v4872_v29  ;;  %v2744_v42 = vadd.f32 %v2647_v46, %v2524_v0  ;;  %v3422_v9 = vrot.slane %v3334_v60, 2  ;;  %v4118_v39 = vmul.f32 %v6000_v55, %v4049_v50 }
 0x31e   : > { %v2793_v37 = vpack.c.bf16 %v2745_v11, %v2745_v11  ;;  %v1717_v29 = vmul.f32 %v4886_v45, %v5414_v47  ;;  %v1748_v63 = vpack.c.bf16 %v1716_v33, %v1716_v33  ;;  %v2907_v14 = vunpack.c.l.bf16 %v2791_v13 }
 0x31f   : > { %v1680_v61 = vpack.c.bf16 %v1632_v17, %v1632_v17  ;;  %v2792_v51 = vpack.c.bf16 %v2744_v42, %v2744_v42  ;;  %v3423_v24 = vsel %vm2594_vm2, %v3421_v58, %v3422_v9  ;;  %v3424_v38 = vsel %vm2594_vm2, %v3422_v9, %v4914_v27 }
 0x320   : > { %v2909_v57 = vunpack.c.l.bf16 %v2793_v37  ;;  %v4154_v52 = vadd.f32 %v6013_v41, %v4118_v39  ;;  %v1749_v4 = vpack.c.bf16 %v1717_v29, %v1717_v29  ;;  %v3134_v1 = vadd.f32 %v3035_v18, %v2907_v14 }
 0x321   : > { %v1794_v6 = vunpack.c.l.bf16 %v1680_v61  ;;  %v2908_v7 = vunpack.c.l.bf16 %v2792_v51  ;;  %v1828_v43 = vunpack.c.l.bf16 %v1748_v63  ;;  %v6479_v2 = vrot.slane %v5525_v10, 1  ;;  %v4486_v51 = vld [vmem:[%s4761_s28 + $0x58] sm:$0xff] }
 0x322   : > { %v6480_v45 = vrot.slane %v5485_v31, 1  ;;  %v3136_v40 = vadd.f32 %v3038_v16, %v2909_v57  ;;  %v4186_v15 = vadd.f32 %v4485_v30, %v4154_v52  ;;  %v1829_v59 = vunpack.c.l.bf16 %v1749_v4 }
 0x323   : > { %v2449_v44 = vmul.f32 %v4867_v25, %v5296_v3  ;;  %v3135_v8 = vadd.f32 %v3037_v56, %v2908_v7  ;;  %v3182_v46 = vpack.c.bf16 %v3134_v1, %v3134_v1  ;;  %v1906_v54 = vrot.slane %v1828_v43, 1 }
 0x324   : > { %v2274_v53 = vsel %vm1495_vm1, %v6480_v45, %v6479_v2  ;;  %v2450_v18 = vmul.f32 %v4867_v25, %v5361_v5  ;;  %v3184_v36 = vpack.c.bf16 %v3136_v40, %v3136_v40  ;;  %4218 = vst.msk [vmem:[%s5797_s21 + $0x50] sm:$0xff] %vm437_vm0, %v4186_v15  ;;  %v1907_v20 = vrot.slane %v1829_v59, 1 }
 0x325   : > { %v2480_v60 = vpack.c.bf16 %v2449_v44, %v2449_v44  ;;  %v2831_v0 = vmul.f32 %v4870_v28, %v5367_v26  ;;  %v3183_v62 = vpack.c.bf16 %v3135_v8, %v3135_v8  ;;  %v3297_v35 = vunpack.c.l.bf16 %v3182_v46 }
 0x326   : > { %v4119_v17 = vmul.f32 %v6000_v55, %v4051_v22  ;;  %v2002_v3 = vadd.f32 %v1906_v54, %v1794_v6  ;;  %v3299_v33 = vunpack.c.l.bf16 %v3184_v36  ;;  %v1908_v11 = vsel %vm1495_vm1, %v1906_v54, %v1907_v20 }
 0x327   : > { %v2004_v5 = vadd.f32 %v1907_v20, %v5559_v12  ;;  %v2481_v56 = vpack.c.bf16 %v2450_v18, %v2450_v18  ;;  %v3298_v16 = vunpack.c.l.bf16 %v3183_v62  ;;  %v3516_v50 = vadd.f32 %v3421_v58, %v3297_v35  ;;  %v6483_v35 = vld [vmem:[#allocation22_spill] sm:$0xff] }
 0x328   : > { %v4155_v42 = vadd.f32 %v6013_v41, %v4119_v17  ;;  %v2003_v13 = vadd.f32 %v1908_v11, %v5511_v48  ;;  %v3518_v9 = vadd.f32 %v3424_v38, %v3299_v33  ;;  %v2050_v39 = vpack.c.bf16 %v2002_v3, %v2002_v3 }
 0x329   : > { %v2052_v37 = vpack.c.bf16 %v2004_v5, %v2004_v5  ;;  %v2559_v61 = vunpack.c.l.bf16 %v2480_v60  ;;  %v3517_v29 = vadd.f32 %v3423_v24, %v3298_v16  ;;  %v3564_v63 = vpack.c.bf16 %v3516_v50, %v3516_v50 }
 0x32a   : > { %v4187_v14 = vadd.f32 %v4486_v51, %v4155_v42  ;;  %v2051_v57 = vpack.c.bf16 %v2003_v13, %v2003_v13  ;;  %v3566_v52 = vpack.c.bf16 %v3518_v9, %v3518_v9  ;;  %v2162_v4 = vunpack.c.l.bf16 %v2050_v39  ;;  %v4054_v42 = vpop.f32.mrf.mxu1 }
 0x32b   : > { %v2164_v12 = vunpack.c.l.bf16 %v2052_v37  ;;  %v2560_v6 = vunpack.c.l.bf16 %v2481_v56  ;;  %v3565_v7 = vpack.c.bf16 %v3517_v29, %v3517_v29  ;;  %v3612_v58 = vunpack.c.l.bf16 %v3564_v63 }
 0x32c   : > { %4219 = vst.msk [vmem:[%s5797_s21 + $0x58] sm:$0xff] %vm437_vm0, %v4187_v14  ;;  %v2163_v1 = vunpack.c.l.bf16 %v2051_v57  ;;  %v2649_v48 = vrot.slane %v2559_v61, 2  ;;  %v3614_v43 = vunpack.c.l.bf16 %v3566_v52  ;;  %v6481_v38 = vmov %v6480_v45  ;;  %v6484_v14 = vld [vmem:[#allocation27_spill] sm:$0xff] }
 0x32d   : > { %v2366_v2 = vadd.f32 %v6481_v38, %v2162_v4  ;;  %v6482_v24 = vrot.slane %v5525_v10, 1  ;;  %v2650_v40 = vrot.slane %v2560_v6, 2  ;;  %v3613_v30 = vunpack.c.l.bf16 %v3565_v7 }
 0x32e   : > { %v3735_v15 = vrot.slane %v3612_v58, 7  ;;  %v2367_v59 = vadd.f32 %v2274_v53, %v2163_v1  ;;  %v2832_v44 = vmul.f32 %v4870_v28, %v5414_v47  ;;  %v3738_v8 = vrot.slane %v3614_v43, 7 }
 0x32f   : > { %v2368_v45 = vadd.f32 %v6482_v24, %v2164_v12  ;;  %v2414_v46 = vpack.c.bf16 %v2366_v2, %v2366_v2  ;;  %v2651_v18 = vsel %vm2594_vm2, %v2649_v48, %v2650_v40  ;;  %v3736_v36 = vrot.slane %v3613_v30, 7 }
 0x330   : > { %v2415_v22 = vpack.c.bf16 %v2367_v59, %v2367_v59  ;;  %v2652_v31 = vsel %vm2594_vm2, %v2650_v40, %v4906_v19  ;;  %v2864_v20 = vpack.c.bf16 %v2831_v0, %v2831_v0  ;;  %v2865_v62 = vpack.c.bf16 %v2832_v44, %v2832_v44 }
 0x331   : > { %v2416_v54 = vpack.c.bf16 %v2368_v45, %v2368_v45  ;;  %v2526_v10 = vunpack.c.l.bf16 %v2414_v46  ;;  %v3225_v53 = vmul.f32 %v4878_v32, %v6483_v35  ;;  %v3737_v17 = vsel %vm3669_vm3, %v3735_v15, %v3736_v36  ;;  %v6485_v46 = vld [vmem:[#allocation26_spill] sm:$0xff] }
 0x332   : > { %v3739_v3 = vsel %vm3669_vm3, %v3736_v36, %v3738_v8  ;;  %v2527_v33 = vunpack.c.l.bf16 %v2415_v22  ;;  %v2945_v11 = vunpack.c.l.bf16 %v2864_v20  ;;  %v3812_v5 = vmul.f32 %v5957_v49, %v3737_v17  ;;  %v4056_v8 = vpop.f32.mrf.mxu1 }
 0x333   : > { %v2528_v60 = vunpack.c.l.bf16 %v2416_v54  ;;  %v3813_v56 = vmul.f32 %v5957_v49, %v3739_v3  ;;  %v2746_v16 = vadd.f32 %v2649_v48, %v2526_v10  ;;  %v2946_v13 = vunpack.c.l.bf16 %v2865_v62  ;;  %v6489_v3 = vld [vmem:[#allocation24_spill] sm:$0xff] }
 0x334   : > { %v2747_v0 = vadd.f32 %v2651_v18, %v2527_v33  ;;  %v3039_v9 = vrot.slane %v2945_v11, 2  ;;  %v3256_v39 = vpack.c.bf16 %v3225_v53, %v3225_v53  ;;  %v3848_v37 = vadd.f32 %v5966_v34, %v3812_v5  ;;  %v6487_v18 = vld [vmem:[#allocation21_spill] sm:$0xff]  ;;  %v4487_v5 = vld [vmem:[%s4761_s28 + $0x60] sm:$0xff] }
 0x335   : > { %v2748_v50 = vadd.f32 %v2652_v31, %v2528_v60  ;;  %v3849_v32 = vadd.f32 %v5966_v34, %v3813_v56  ;;  %v2794_v61 = vpack.c.bf16 %v2746_v16, %v2746_v16  ;;  %v3040_v51 = vrot.slane %v2946_v13, 2  ;;  %v6490_v16 = vld [vmem:[#allocation12_spill] sm:$0xff] }
 0x336   : > { %v2795_v63 = vpack.c.bf16 %v2747_v0, %v2747_v0  ;;  %v3257_v57 = vpack.c.bf16 %v6484_v14, %v6484_v14  ;;  %v3335_v52 = vunpack.c.l.bf16 %v3256_v39  ;;  %v3880_v49 = vmax.f32 %v3848_v37, 0.0 }
 0x337   : > { %v2796_v29 = vpack.c.bf16 %v2748_v50, %v2748_v50  ;;  %v3881_v4 = vmax.f32 %v3849_v32, 0.0  ;;  %v2910_v12 = vunpack.c.l.bf16 %v2794_v61  ;;  %v3041_v58 = vsel %vm2594_vm2, %v3039_v9, %v3040_v51 }
 0x338   : > { %v2911_v7 = vunpack.c.l.bf16 %v2795_v63  ;;  %v3042_v1 = vsel %vm2594_vm2, %v3040_v51, %v4909_v21  ;;  %v3336_v48 = vunpack.c.l.bf16 %v3257_v57  ;;  %v3912_v34 = vmin.f32 %v3880_v49, 6.0 }
 0x339   : > { %v2912_v6 = vunpack.c.l.bf16 %v2796_v29  ;;  %v3913_v43 = vmin.f32 %v3881_v4, 6.0  ;;  %v3137_v38 = vadd.f32 %v3039_v9, %v2910_v12  ;;  %v3425_v45 = vrot.slane %v3335_v52, 2  ;;  %v6493_v29 = vld [vmem:[#allocation29_spill] sm:$0xff] }
 0x33a   : > { %v3138_v24 = vadd.f32 %v3041_v58, %v2911_v7  ;;  %v3426_v40 = vrot.slane %v3336_v48, 2  ;;  %v4120_v30 = vmul.f32 %v6000_v55, %v4054_v42  ;;  %v6486_v54 = vrot.slane %v6485_v46, 1  ;;  %v6491_v42 = vld [vmem:[#allocation23_spill] sm:$0xff]  ;;  %v4488_v52 = vld [vmem:[%s4761_s28 + $0x68] sm:$0xff]  ;;  %v6495_v48 = vld [vmem:[#allocation28_spill] sm:$0xff] }
 0x33b   : > { %v3139_v2 = vadd.f32 %v3042_v1, %v2912_v6  ;;  %v3931_v15 = vpack.c.bf16 %v3913_v43, %v3912_v34  ;;  %v3185_v59 = vpack.c.bf16 %v3137_v38, %v3137_v38  ;;  %v6488_v36 = vrot.slane %v6487_v18, 1 }
 0x33c   : > { %v3186_v31 = vpack.c.bf16 %v3138_v24, %v3138_v24  ;;  %v3427_v20 = vsel %vm2594_vm2, %v3425_v45, %v3426_v40  ;;  %v3428_v10 = vsel %vm2594_vm2, %v3426_v40, %v4914_v27  ;;  %v4156_v60 = vadd.f32 %v6013_v41, %v4120_v30 }
 0x33d   : > { %v3187_v44 = vpack.c.bf16 %v3139_v2, %v3139_v2  ;;  %v1542_v22 = vsel %vm1495_vm1, %v6488_v36, %v6486_v54  ;;  %4387 = vmatmul.msk.bf16.gmra.mxu2 %vm3966_vm4, %v3931_v15  ;;  %v3300_v62 = vunpack.c.l.bf16 %v3185_v59  ;;  %v4121_v17 = vmul.f32 %v6000_v55, %v4056_v8  ;;  %v6496_v8 = vld [vmem:[#allocation25_spill] sm:$0xff] }
 0x33e   : > { %v1636_v33 = vadd.f32 %v1542_v22, %v6489_v3  ;;  %v3301_v11 = vunpack.c.l.bf16 %v3186_v31  ;;  %v4188_v56 = vadd.f32 %v4487_v5, %v4156_v60  ;;  %v2088_v50 = vmul.f32 %v4911_v23, %v6490_v16 }
 0x33f   : > { %v3302_v53 = vunpack.c.l.bf16 %v3187_v44  ;;  %v6492_v0 = vpack.c.bf16 %v6491_v42, %v6491_v42  ;;  %v3519_v9 = vadd.f32 %v3425_v45, %v3300_v62  ;;  %v4157_v37 = vadd.f32 %v6013_v41, %v4121_v17 }
 0x340   : > { %v1684_v32 = vpack.c.bf16 %v1636_v33, %v1636_v33  ;;  %v3520_v61 = vadd.f32 %v3427_v20, %v3301_v11  ;;  %4220 = vst.msk [vmem:[%s5797_s21 + $0x60] sm:$0xff] %vm437_vm0, %v4188_v56  ;;  %v2119_v55 = vpack.c.bf16 %v2088_v50, %v2088_v50  ;;  %v6494_v63 = vpack.c.bf16 %v6493_v29, %v6493_v29  ;;  %v6234_v20 = vld [vmem:[%s6401_s5] ss:$0 sm:$0xff]  ;;  %v4059_v29 = vpop.f32.mrf.mxu1 }
 0x341   : > { %v2165_v13 = vunpack.c.l.bf16 %v6492_v0  ;;  %v3521_v39 = vadd.f32 %v3428_v10, %v3302_v53  ;;  %v2451_v23 = vmul.f32 %v4867_v25, %v5367_v26  ;;  %v3567_v14 = vpack.c.bf16 %v3519_v9, %v3519_v9  ;;  %v6241_v11 = vld [vmem:[%s6402_s6] ss:$0 sm:$0xff] }
 0x342   : > { %v2167_v51 = vunpack.c.l.bf16 %v6494_v63  ;;  %v4189_v49 = vadd.f32 %v4488_v52, %v4157_v37  ;;  %v1798_v4 = vunpack.c.l.bf16 %v1684_v32  ;;  %v3568_v12 = vpack.c.bf16 %v3520_v61, %v3520_v61  ;;  %v4064_v63 = vpop.f32.mrf.mxu2 }
 0x343   : > { %v3569_v57 = vpack.c.bf16 %v3521_v39, %v3521_v39  ;;  %v2198_v41 = vunpack.c.l.bf16 %v2119_v55  ;;  %v2452_v6 = vmul.f32 %v4867_v25, %v5414_v47  ;;  %v2482_v7 = vpack.c.bf16 %v2451_v23, %v2451_v23 }
 0x344   : > { %v3615_v58 = vunpack.c.l.bf16 %v3567_v14  ;;  %4221 = vst.msk [vmem:[%s5797_s21 + $0x68] sm:$0xff] %vm437_vm0, %v4189_v49  ;;  %v2006_v34 = vadd.f32 %v6495_v48, %v1798_v4  ;;  %v2833_v26 = vmul.f32 %v4870_v28, %v6483_v35  ;;  %v3616_v43 = vunpack.c.l.bf16 %v3568_v12 }
 0x345   : > { %v3617_v1 = vunpack.c.l.bf16 %v3569_v57  ;;  %v2275_v38 = vrot.slane %v2198_v41, 1  ;;  %v2483_v2 = vpack.c.bf16 %v2452_v6, %v2452_v6  ;;  %v2561_v24 = vunpack.c.l.bf16 %v2482_v7 }
 0x346   : > { %v3740_v45 = vrot.slane %v3615_v58, 7  ;;  %v2054_v30 = vpack.c.bf16 %v2006_v34, %v2006_v34  ;;  %v2866_v15 = vpack.c.bf16 %v2833_v26, %v2833_v26  ;;  %v3741_v59 = vrot.slane %v3616_v43, 7 }
 0x347   : > { %v3743_v40 = vrot.slane %v3617_v1, 7  ;;  %v2369_v25 = vadd.f32 %v2275_v38, %v2165_v13  ;;  %v2371_v47 = vadd.f32 %v2275_v38, %v2167_v51  ;;  %v2562_v44 = vunpack.c.l.bf16 %v2483_v2  ;;  %v4493_v2 = vld [vmem:[%s4761_s28 + $0x70] sm:$0xff] }
 0x348   : > { %v6497_v46 = vpack.c.bf16 %v6496_v8, %v6496_v8  ;;  %v2166_v18 = vunpack.c.l.bf16 %v2054_v30  ;;  %v2653_v36 = vrot.slane %v2561_v24, 2  ;;  %v3742_v28 = vsel %vm3669_vm3, %v3740_v45, %v3741_v59  ;;  %v4494_v45 = vld [vmem:[%s4761_s28 + $0x80] sm:$0xff] }
 0x349   : > { %v3744_v35 = vsel %vm3669_vm3, %v3741_v59, %v3743_v40  ;;  %v2417_v22 = vpack.c.bf16 %v2369_v25, %v2369_v25  ;;  %v2419_v31 = vpack.c.bf16 %v2371_v47, %v2371_v47  ;;  %v3814_v10 = vmul.f32 %v6234_v20, %v3742_v28  ;;  %v4061_v25 = vpop.f32.mrf.mxu1 }
 0x34a   : > { %v2948_v54 = vunpack.c.l.bf16 %v6497_v46  ;;  %v3815_v60 = vmul.f32 %v6234_v20, %v3744_v35  ;;  %v2370_v62 = vadd.f32 %v2275_v38, %v2166_v18  ;;  %v2654_v53 = vrot.slane %v2562_v44, 2  ;;  %v4066_v47 = vpop.f32.mrf.mxu2 }
 0x34b   : > { %v2529_v17 = vunpack.c.l.bf16 %v2417_v22  ;;  %v2531_v3 = vunpack.c.l.bf16 %v2419_v31  ;;  %v2947_v33 = vunpack.c.l.bf16 %v2866_v15  ;;  %v3850_v5 = vadd.f32 %v6241_v11, %v3814_v10 }
 0x34c   : > { %v3851_v56 = vadd.f32 %v6241_v11, %v3815_v60  ;;  %v2418_v16 = vpack.c.bf16 %v2370_v62, %v2370_v62  ;;  %v3044_v50 = vrot.slane %v2948_v54, 2  ;;  %v2655_v42 = vsel %vm2594_vm2, %v2653_v36, %v2654_v53  ;;  %v4495_v62 = vld [vmem:[%s4761_s28 + $0x78] sm:$0xff] }
 0x34d   : > { %v2656_v0 = vsel %vm2594_vm2, %v2654_v53, %v4906_v19  ;;  %v2749_v13 = vadd.f32 %v2653_v36, %v2529_v17  ;;  %v3882_v9 = vmax.f32 %v3850_v5, 0.0  ;;  %v3043_v55 = vrot.slane %v2947_v33, 2  ;;  %v6253_v19 = vld [vmem:[%s6404_s8] ss:$0 sm:$0xff]  ;;  %v4496_v17 = vld [vmem:[%s4761_s28 + $0x88] sm:$0xff] }
 0x34e   : > { %v3883_v39 = vmax.f32 %v3851_v56, 0.0  ;;  %v2530_v37 = vunpack.c.l.bf16 %v2418_v16  ;;  %v2751_v32 = vadd.f32 %v2656_v0, %v2531_v3  ;;  %v3046_v49 = vsel %vm2594_vm2, %v3044_v50, %v4909_v21  ;;  %v6261_v21 = vld [vmem:[%s6405_s9] ss:$0 sm:$0xff] }
 0x34f   : > { %v2797_v61 = vpack.c.bf16 %v2749_v13, %v2749_v13  ;;  %v3914_v51 = vmin.f32 %v3882_v9, 6.0  ;;  %v4122_v4 = vmul.f32 %v6253_v19, %v4059_v29  ;;  %v4124_v12 = vmul.f32 %v6253_v19, %v4064_v63 }
 0x350   : > { %v3915_v23 = vmin.f32 %v3883_v39, 6.0  ;;  %v2750_v14 = vadd.f32 %v2655_v42, %v2530_v37  ;;  %v2799_v57 = vpack.c.bf16 %v2751_v32, %v2751_v32  ;;  %v3045_v58 = vsel %vm2594_vm2, %v3043_v55, %v3044_v50  ;;  %v4497_v32 = vld [vmem:[%s4761_s28 + $0x90] sm:$0xff] }
 0x351   : > { %v2913_v52 = vunpack.c.l.bf16 %v2797_v61  ;;  %v4158_v48 = vadd.f32 %v6261_v21, %v4122_v4  ;;  %v4160_v34 = vadd.f32 %v6261_v21, %v4124_v12  ;;  %v4123_v46 = vmul.f32 %v6253_v19, %v4061_v25 }
 0x352   : > { %v3932_v41 = vpack.c.bf16 %v3915_v23, %v3914_v51  ;;  %v2798_v6 = vpack.c.bf16 %v2750_v14, %v2750_v14  ;;  %v2915_v7 = vunpack.c.l.bf16 %v2799_v57  ;;  %v4125_v54 = vmul.f32 %v6253_v19, %v4066_v47  ;;  %v4069_v16 = vpop.f32.mrf.mxu2 }
 0x353   : > { %v3140_v1 = vadd.f32 %v3043_v55, %v2913_v52  ;;  %v4190_v24 = vadd.f32 %v4493_v2, %v4158_v48  ;;  %v4192_v40 = vadd.f32 %v4494_v45, %v4160_v34  ;;  %v4159_v35 = vadd.f32 %v6261_v21, %v4123_v46 }
 0x354   : > { %4388 = vmatmul.msk.bf16.gmra.mxu2 %vm3966_vm4, %v3932_v41  ;;  %v2914_v26 = vunpack.c.l.bf16 %v2798_v6  ;;  %v3142_v43 = vadd.f32 %v3046_v49, %v2915_v7  ;;  %v4161_v22 = vadd.f32 %v6261_v21, %v4125_v54  ;;  %v4498_v41 = vld [vmem:[%s4761_s28 + $0x98] sm:$0xff] }
 0x355   : > { %v3188_v38 = vpack.c.bf16 %v3140_v1, %v3140_v1  ;;  %4222 = vst.msk [vmem:[%s5797_s21 + $0x70] sm:$0xff] %vm437_vm0, %v4190_v24  ;;  %v4191_v53 = vadd.f32 %v4495_v62, %v4159_v35  ;;  %v4499_v1 = vld [vmem:[%s4761_s28 + $0xa0] sm:$0xff] }
 0x356   : > { %v3141_v30 = vadd.f32 %v3045_v58, %v2914_v26  ;;  %v3190_v15 = vpack.c.bf16 %v3142_v43, %v3142_v43  ;;  %4224 = vst.msk [vmem:[%s5797_s21 + $0x80] sm:$0xff] %vm437_vm0, %v4192_v40  ;;  %v4193_v3 = vadd.f32 %v4496_v17, %v4161_v22 }
 0x357   : > { %v3303_v59 = vunpack.c.l.bf16 %v3188_v38  ;;  %4223 = vst.msk [vmem:[%s5797_s21 + $0x78] sm:$0xff] %vm437_vm0, %v4191_v53  ;;  %v4500_v38 = vld [vmem:[%s4761_s28 + $0xa8] sm:$0xff] }
 0x358   : > { %v3189_v44 = vpack.c.bf16 %v3141_v30, %v3141_v30  ;;  %v3305_v8 = vunpack.c.l.bf16 %v3190_v15  ;;  %4225 = vst.msk [vmem:[%s5797_s21 + $0x88] sm:$0xff] %vm437_vm0, %v4193_v3  ;;  %v4501_v30 = vld [vmem:[%s4761_s28 + $0xb0] sm:$0xff] }
 0x359   : > { %v3522_v18 = vadd.f32 %v4914_v27, %v3303_v59  ;;  %v4505_v3 = vld [vmem:[%s4761_s28 + $0xd0] sm:$0xff] }
 0x35a   : > { %v3304_v36 = vunpack.c.l.bf16 %v3189_v44  ;;  %v3524_v28 = vadd.f32 %v4914_v27, %v3305_v8  ;;  %v4071_v23 = vpop.f32.mrf.mxu2  ;;  %v4502_v44 = vld [vmem:[%s4761_s28 + $0xb8] sm:$0xff] }
 0x35b   : > { %v3570_v31 = vpack.c.bf16 %v3522_v18, %v3522_v18  ;;  %v4127_v14 = vmul.f32 %v6253_v19, %v4071_v23 }
 0x35c   : > { %v3523_v10 = vadd.f32 %v4914_v27, %v3304_v36  ;;  %v3572_v60 = vpack.c.bf16 %v3524_v28, %v3524_v28  ;;  %v4126_v27 = vmul.f32 %v6253_v19, %v4069_v16  ;;  %v4503_v36 = vld [vmem:[%s4761_s28 + $0xc0] sm:$0xff] }
 0x35d   : > { %v3618_v33 = vunpack.c.l.bf16 %v3570_v31  ;;  %v4163_v49 = vadd.f32 %v6261_v21, %v4127_v14  ;;  %v4509_v14 = vld [vmem:[%s4761_s28 + $0xf0] sm:$0xff] }
 0x35e   : > { %v3571_v5 = vpack.c.bf16 %v3523_v10, %v3523_v10  ;;  %v3620_v56 = vunpack.c.l.bf16 %v3572_v60  ;;  %v4162_v9 = vadd.f32 %v6261_v21, %v4126_v27  ;;  %v4504_v10 = vld [vmem:[%s4761_s28 + $0xc8] sm:$0xff] }
 0x35f   : > { %v3745_v42 = vrot.slane %v3618_v33, 7 }
 0x360   : > { %v3619_v50 = vunpack.c.l.bf16 %v3571_v5  ;;  %v3748_v0 = vrot.slane %v3620_v56, 7  ;;  %v4194_v61 = vadd.f32 %v4497_v32, %v4162_v9  ;;  %v4507_v9 = vld [vmem:[%s4761_s28 + $0xe0] sm:$0xff] }
 0x362   : > { %v3746_v13 = vrot.slane %v3619_v50, 7  ;;  %4226 = vst.msk [vmem:[%s5797_s21 + $0x90] sm:$0xff] %vm437_vm0, %v4194_v61  ;;  %v4506_v50 = vld [vmem:[%s4761_s28 + $0xd8] sm:$0xff] }
 0x364   : > { %v3747_v39 = vsel %vm3669_vm3, %v3745_v42, %v3746_v13  ;;  %v3749_v37 = vsel %vm3669_vm3, %v3746_v13, %v3748_v0 }
 0x365   : > { %v3816_v55 = vmul.f32 %v6234_v20, %v3747_v39  ;;  %v3817_v29 = vmul.f32 %v6234_v20, %v3749_v37  ;;  %v4195_v20 = vadd.f32 %v4498_v41, %v4163_v49 }
 0x367   : > { %v3852_v63 = vadd.f32 %v6241_v11, %v3816_v55  ;;  %v3853_v51 = vadd.f32 %v6241_v11, %v3817_v29  ;;  %4227 = vst.msk [vmem:[%s5797_s21 + $0x98] sm:$0xff] %vm437_vm0, %v4195_v20  ;;  %v4074_v11 = vpop.f32.mrf.mxu2  ;;  %v4508_v55 = vld [vmem:[%s4761_s28 + $0xe8] sm:$0xff] }
 0x368   : > { %v4128_v7 = vmul.f32 %v6253_v19, %v4074_v11 }
 0x369   : > { %v3884_v57 = vmax.f32 %v3852_v63, 0.0  ;;  %v3885_v52 = vmax.f32 %v3853_v51, 0.0 }
 0x36a   : > { %v4164_v58 = vadd.f32 %v6261_v21, %v4128_v7 }
 0x36b   : > { %v3916_v4 = vmin.f32 %v3884_v57, 6.0  ;;  %v3917_v12 = vmin.f32 %v3885_v52, 6.0 }
 0x36c   : > { %v4196_v48 = vadd.f32 %v4499_v1, %v4164_v58 }
 0x36d   : > { %v3933_v6 = vpack.c.bf16 %v3917_v12, %v3916_v4  ;;  %v4510_v12 = vld [vmem:[%s4761_s28 + $0xf8] sm:$0xff] }
 0x36e   : > { %4228 = vst.msk [vmem:[%s5797_s21 + $0xa0] sm:$0xff] %vm437_vm0, %v4196_v48 }
 0x36f   : > { %4389 = vmatmul.msk.bf16.gmra.mxu2 %vm3966_vm4, %v3933_v6  ;;  %v4076_v34 = vpop.f32.mrf.mxu2 }
 0x370   : > { %v4129_v26 = vmul.f32 %v6253_v19, %v4076_v34 }
 0x372   : > { %v4165_v43 = vadd.f32 %v6261_v21, %v4129_v26 }
 0x374   : > { %v4197_v2 = vadd.f32 %v4500_v38, %v4165_v43 }
 0x376   : > { %4229 = vst.msk [vmem:[%s5797_s21 + $0xa8] sm:$0xff] %vm437_vm0, %v4197_v2 }
 0x377   : > { %v4079_v24 = vpop.f32.mrf.mxu2 }
 0x378   : > { %v4130_v45 = vmul.f32 %v6253_v19, %v4079_v24 }
 0x37a   : > { %v4166_v40 = vadd.f32 %v6261_v21, %v4130_v45 }
 0x37c   : > { %v4198_v15 = vadd.f32 %v4501_v30, %v4166_v40 }
 0x37e   : > { %4230 = vst.msk [vmem:[%s5797_s21 + $0xb0] sm:$0xff] %vm437_vm0, %v4198_v15 }
 0x37f   : > { %v4081_v59 = vpop.f32.mrf.mxu2 }
 0x380   : > { %v4131_v25 = vmul.f32 %v6253_v19, %v4081_v59 }
 0x382   : > { %v4167_v47 = vadd.f32 %v6261_v21, %v4131_v25 }
 0x384   : > { %v4199_v8 = vadd.f32 %v4502_v44, %v4167_v47 }
 0x386   : > { %4231 = vst.msk [vmem:[%s5797_s21 + $0xb8] sm:$0xff] %vm437_vm0, %v4199_v8 }
 0x396   : > { %v4084_v46 = vpop.f32.mrf.mxu2 }
 0x397   : > { %v4132_v54 = vmul.f32 %v6253_v19, %v4084_v46 }
 0x399   : > { %v4168_v18 = vadd.f32 %v6261_v21, %v4132_v54 }
 0x39b   : > { %v4200_v28 = vadd.f32 %v4503_v36, %v4168_v18 }
 0x39d   : > { %4232 = vst.msk [vmem:[%s5797_s21 + $0xc0] sm:$0xff] %vm437_vm0, %v4200_v28 }
 0x39e   : > { %v4086_v35 = vpop.f32.mrf.mxu2 }
 0x39f   : > { %v4133_v22 = vmul.f32 %v6253_v19, %v4086_v35 }
 0x3a1   : > { %v4169_v31 = vadd.f32 %v6261_v21, %v4133_v22 }
 0x3a3   : > { %v4201_v60 = vadd.f32 %v4504_v10, %v4169_v31 }
 0x3a5   : > { %4233 = vst.msk [vmem:[%s5797_s21 + $0xc8] sm:$0xff] %vm437_vm0, %v4201_v60 }
 0x3c0   : > { %v4089_v62 = vpop.f32.mrf.mxu2 }
 0x3c1   : > { %v4134_v53 = vmul.f32 %v6253_v19, %v4089_v62 }
 0x3c3   : > { %v4170_v17 = vadd.f32 %v6261_v21, %v4134_v53 }
 0x3c5   : > { %v4202_v33 = vadd.f32 %v4505_v3, %v4170_v17 }
 0x3c7   : > { %4234 = vst.msk [vmem:[%s5797_s21 + $0xd0] sm:$0xff] %vm437_vm0, %v4202_v33 }
 0x3c8   : > { %v4091_v5 = vpop.f32.mrf.mxu2 }
 0x3c9   : > { %v4135_v56 = vmul.f32 %v6253_v19, %v4091_v5 }
 0x3cb   : > { %v4171_v16 = vadd.f32 %v6261_v21, %v4135_v56 }
 0x3cd   : > { %v4203_v42 = vadd.f32 %v4506_v50, %v4171_v16 }
 0x3cf   : > { %4235 = vst.msk [vmem:[%s5797_s21 + $0xd8] sm:$0xff] %vm437_vm0, %v4203_v42 }
 0x3d7   : > { %v4094_v0 = vpop.f32.mrf.mxu2 }
 0x3d8   : > { %v4136_v27 = vmul.f32 %v6253_v19, %v4094_v0 }
 0x3da   : > { %v4172_v13 = vadd.f32 %v6261_v21, %v4136_v27 }
 0x3dc   : > { %v4204_v39 = vadd.f32 %v4507_v9, %v4172_v13 }
 0x3de   : > { %4236 = vst.msk [vmem:[%s5797_s21 + $0xe0] sm:$0xff] %vm437_vm0, %v4204_v39 }
 0x3df   : > { %v4096_v37 = vpop.f32.mrf.mxu2 }
 0x3e0   : > { %v4137_v32 = vmul.f32 %v6253_v19, %v4096_v37 }
 0x3e2   : > { %v4173_v61 = vadd.f32 %v6261_v21, %v4137_v32 }
 0x3e4   : > { %v4205_v29 = vadd.f32 %v4508_v55, %v4173_v61 }
 0x3e6   : > { %4237 = vst.msk [vmem:[%s5797_s21 + $0xe8] sm:$0xff] %vm437_vm0, %v4205_v29 }
 0x3f2   : > { %v4099_v63 = vpop.f32.mrf.mxu2 }
 0x3f3   : > { %v4138_v51 = vmul.f32 %v6253_v19, %v4099_v63 }
 0x3f5   : > { %v4174_v23 = vadd.f32 %v6261_v21, %v4138_v51 }
 0x3f7   : > { %v4206_v57 = vadd.f32 %v4509_v14, %v4174_v23 }
 0x3f9   : > { %4238 = vst.msk [vmem:[%s5797_s21 + $0xf0] sm:$0xff] %vm437_vm0, %v4206_v57 }
 0x3fa   : > { %v4101_v52 = vpop.f32.mrf.mxu2 }
 0x3fb   : > { %v4139_v49 = vmul.f32 %v6253_v19, %v4101_v52 }
 0x3fd   : > { %v4175_v4 = vadd.f32 %v6261_v21, %v4139_v49 }
 0x3ff   : > { %v4207_v41 = vadd.f32 %v4510_v12, %v4175_v4 }
 0x401   : > { %4239 = vst.msk [vmem:[%s5797_s21 + $0xf8] sm:$0xff] %vm437_vm0, %v4207_v41 }
 0x402   : > { %4568 = shalt.err (!%p4565_p4)
}
 0x403   : > { %s4612_s18 = smov 128   ;;  %s4613_s28 = smov 8  }
 0x404   : > { %4409 = dma.vmem_to_hbm [thread:$0]  (%p4719_p11), %s4254_s15, 4096, %s4256_s22, %s4241_s17, %s4612_s18, %s4612_s18, %s4613_s28  }
 0x405 PF: > { %s4270_s27 = sand.u32 1, %s4595_s13   ;;  %p6499_p7 = scmp.ge.s32.totalorder %s4607_s16, 2 }
 0x406   : > { %s4271_s12 = scalar_lea.sflag [#allocation4], %s4270_s27 }
 0x407   : > { %p4416_p5 = pnand %p6499_p7, %p4723_p12 }
 0x409   : > { %p4417_p8 = pneg %p4416_p5 }
 0x40b   : > { %4590 = dma.done.wait (%p4417_p8), %s4271_s12, 4096  }
 0x40c   : > { %4592 = vsyncadd (%p4417_p8), %s4271_s12, 4294963200  ;;  %s6500_s16 = sld [smem:[#allocation9_spill]]  ;;  %s6503_s13 = smov %s4599_s14 }
 0x40d   : > { %s6501_s26 = sld [smem:[#allocation8_spill]] }
 0x40e   : > { %s6502_s15 = sld [smem:[#allocation10_spill]] }
 0x412   : > { %p23_p10 = scmp.ge.s32.totalorder %s6500_s16, 4  }
 0x413   : > { %s6504_s14 = smov %s6501_s26 }
 0x414   :  { %25 = sbr.rel (!%p23_p10) target bundleno = 5 (0x5), region = 105 }
 0x419   :  { %4277 = vsyncpa [#allocation3], 1 }
 0x41a   :  { %4279 = vsyncpa [#allocation3 + $0x1], 1 }
 0x41b   :  { %4280 = vsyncpa [#allocation4], 1 }
 0x41c   :  { %4282 = vsyncpa [#allocation4 + $0x1], 1 }

</bundles_post_ra>
